<compile_context>
chip_gen: v5e
topology: v5e:2x2
jax: 0.10.0
libtpu: 0.0.40
codegen_flags: <defaults>
</compile_context>

<pallas_src>
import functools
import math

import jax
import jax.numpy as jnp
from jax.experimental import pallas as pl
from jax.experimental.pallas import tpu as pltpu


# ----------------------------------------------------------------------------
# In-kernel math helpers (pure jnp, traced inside Pallas kernels)
# ----------------------------------------------------------------------------
def _erf(z):
    # Abramowitz & Stegun 7.1.26 polynomial (|err| < 1.5e-7); exp/mul/add/where
    # only, which lower cleanly on Mosaic.  Matches torch exact GELU to f32 tol.
    a1, a2, a3, a4, a5 = 0.254829592, -0.284496736, 1.421413741, -1.453152027, 1.061405429
    p = 0.3275911
    sign = jnp.where(z >= 0.0, 1.0, -1.0)
    az = jnp.abs(z)
    t = 1.0 / (1.0 + p * az)
    poly = ((((a5 * t + a4) * t + a3) * t + a2) * t + a1) * t
    return sign * (1.0 - poly * jnp.exp(-az * az))


def _gelu_exact(x):
    # matches PyTorch F.gelu (approximate='none'): 0.5 * x * (1 + erf(x/sqrt(2)))
    return 0.5 * x * (1.0 + _erf(x * 0.7071067811865476))


def _layernorm(x, gamma, beta, eps=1e-5):
    mean = jnp.mean(x, axis=-1, keepdims=True)
    var = jnp.mean((x - mean) * (x - mean), axis=-1, keepdims=True)
    return (x - mean) * jax.lax.rsqrt(var + eps) * gamma + beta


def _vmem_limit_bytes():
    # per-chip scoped VMEM budget: ~3/4 of physical, capped at 100 MiB
    try:
        cap = int(pltpu.get_tpu_info().vmem_capacity_bytes)
    except Exception:
        cap = 64 * 1024 * 1024
    return max(32 * 1024 * 1024, min(100 * 1024 * 1024, (cap * 3) // 4))


# ----------------------------------------------------------------------------
# Pallas kernels
# ----------------------------------------------------------------------------
def _embed_kernel(p_ref, w_ref, b_ref, cls_ref, pos_ref, o_ref, *,
                  num_patches, bm, pad):
    # One grid step = bm images.
    # p_ref: (bm, num_patches, patch_dim)  -> o_ref: (bm, S_pad, D)
    # Token layout: rows [0, num_patches) = patches, row num_patches = cls token.
    patch_dim = p_ref.shape[2]
    d = w_ref.shape[1]

    p2 = p_ref[...].reshape(bm * num_patches, patch_dim).astype(jnp.bfloat16)
    emb = jnp.dot(p2, w_ref[...], preferred_element_type=jnp.float32) + b_ref[...]
    emb = emb.reshape(bm, num_patches, d)

    # dense, sublane-aligned store of the patch rows (+ their positional rows)
    o_ref[:, pl.ds(0, num_patches), :] = (
        emb + pos_ref[pl.ds(0, num_patches), :]
    ).astype(o_ref.dtype)

    # cls token row (+ its positional row), broadcast over the bm images
    cls_row = (cls_ref[...] + pos_ref[pl.ds(num_patches, 1), :]).astype(o_ref.dtype)
    o_ref[:, pl.ds(num_patches, 1), :] = jnp.broadcast_to(
        cls_row.reshape(1, 1, d), (bm, 1, d)
    )

    if pad > 0:  # zero the sublane-padding rows (static)
        o_ref[:, pl.ds(num_patches + 1, pad), :] = jnp.zeros(
            (bm, pad, d), o_ref.dtype
        )


def _encoder_kernel(
    mask_ref, x_ref,
    wqkv_ref, bqkv_ref, wo_ref, bo_ref,        # fused (D,3D) QKV + (D,D) out-proj
    g1_ref, be1_ref,                            # layernorm 1
    w1_ref, b1_ref, w2_ref, b2_ref,             # feed-forward
    g2_ref, be2_ref,                            # layernorm 2
    cls_out_ref,                                # (bm, D) output (cls rows only)
    tok_ref, ctx_ref,                           # VMEM scratch
    *, num_heads, cls_row, bm, s_pad, dim,
):
    # grid = (batch_tiles, depth); tokens stay resident in VMEM across depth.
    d_idx = pl.program_id(1)

    @pl.when(d_idx == 0)
    def _():
        tok_ref[...] = x_ref[...]

    x = tok_ref[...]                                  # (bm, S_pad, D) f32
    rows = bm * s_pad
    x2 = x.reshape(rows, dim)
    xb = x2.astype(jnp.bfloat16)

    hd = dim // num_heads
    scale = 1.0 / math.sqrt(hd)

    # ---- fused QKV projection: one (rows, D) @ (D, 3D) MXU pass ----
    qkv = jnp.dot(xb, wqkv_ref[0], preferred_element_type=jnp.float32) + bqkv_ref[0]
    qkv3 = qkv.reshape(bm, s_pad, 3 * dim)
    q = qkv3[:, :, 0 * dim:1 * dim]
    k = qkv3[:, :, 1 * dim:2 * dim]
    v = qkv3[:, :, 2 * dim:3 * dim]

    # additive key mask: 0 for valid key columns, -1e30 for padded columns
    bias = mask_ref[...].reshape(1, 1, s_pad)

    # ---- attention: per-head loop, batched over the bm images per dot ----
    for h in range(num_heads):
        sl = slice(h * hd, (h + 1) * hd)
        qh = q[:, :, sl].astype(jnp.bfloat16)        # (bm, S_pad, hd)
        kh = k[:, :, sl].astype(jnp.bfloat16)
        vh = v[:, :, sl].astype(jnp.bfloat16)
        s = jax.lax.dot_general(
            qh, kh, (((2,), (2,)), ((0,), (0,))),
            preferred_element_type=jnp.float32) * scale           # (bm, Sq, Sk)
        s = s + bias
        m = jnp.max(s, axis=-1, keepdims=True)
        e = jnp.exp(s - m)
        p = e * pl.reciprocal(jnp.sum(e, axis=-1, keepdims=True), approx=True)
        ctx_h = jax.lax.dot_general(
            p.astype(jnp.bfloat16), vh, (((2,), (1,)), ((0,), (0,))),
            preferred_element_type=jnp.float32)                    # (bm, Sq, hd)
        ctx_ref[:, :, sl] = ctx_h                     # concat-free head writeback

    # ---- full-width output projection ----
    ctx2 = ctx_ref[...].reshape(rows, dim).astype(jnp.bfloat16)
    attn = jnp.dot(ctx2, wo_ref[0], preferred_element_type=jnp.float32) + bo_ref[0]

    # ---- post-norm transformer encoder layer ----
    x1 = _layernorm(x2 + attn, g1_ref[0], be1_ref[0])

    h_mid = jnp.dot(x1.astype(jnp.bfloat16), w1_ref[0],
                    preferred_element_type=jnp.float32) + b1_ref[0]
    h_mid = _gelu_exact(h_mid)
    ff = jnp.dot(h_mid.astype(jnp.bfloat16), w2_ref[0],
                 preferred_element_type=jnp.float32) + b2_ref[0]

    x_new = _layernorm(x1 + ff, g2_ref[0], be2_ref[0]).reshape(bm, s_pad, dim)
    tok_ref[...] = x_new

    # cheap per-step write of the cls rows; the last depth step's value is the
    # one that lands in HBM (only (B, D) ever leaves the kernel).
    cls_out_ref[...] = x_new[:, cls_row, :].astype(cls_out_ref.dtype)


def _mlp_head_kernel(x_ref, w1_ref, b1_ref, w2_ref, b2_ref, o_ref):
    h = jnp.tanh(
        jnp.dot(x_ref[...].astype(jnp.bfloat16), w1_ref[...],
                preferred_element_type=jnp.float32) + b1_ref[...]
    )
    o_ref[...] = (
        jnp.dot(h.astype(jnp.bfloat16), w2_ref[...],
                preferred_element_type=jnp.float32) + b2_ref[...]
    ).astype(o_ref.dtype)


# ----------------------------------------------------------------------------
# pallas_call wrappers
# ----------------------------------------------------------------------------
def _embed_tokens(patches, w_t, bvec, cls, pos_pad, *, s_pad, bm):
    B, num_patches, patch_dim = patches.shape
    D = w_t.shape[1]
    kern = functools.partial(
        _embed_kernel, num_patches=num_patches, bm=bm,
        pad=s_pad - num_patches - 1,
    )
    return pl.pallas_call(
        kern,
        out_shape=jax.ShapeDtypeStruct((B, s_pad, D), jnp.float32),
        grid=(B // bm,),
        in_specs=[
            pl.BlockSpec((bm, num_patches, patch_dim), lambda i: (i, 0, 0)),
            pl.BlockSpec(w_t.shape, lambda i: (0, 0)),
            pl.BlockSpec(bvec.shape, lambda i: (0, 0)),
            pl.BlockSpec(cls.shape, lambda i: (0, 0)),
            pl.BlockSpec(pos_pad.shape, lambda i: (0, 0)),
        ],
        out_specs=pl.BlockSpec((bm, s_pad, D), lambda i: (i, 0, 0)),
        compiler_params=pltpu.CompilerParams(dimension_semantics=("parallel",)),
    )(patches, w_t, bvec, cls, pos_pad)


def _encoder(tokens, mask, lp, *, num_heads, s_pad, cls_row, bm):
    B, _, D = tokens.shape
    depth = lp["wqkv"].shape[0]
    names = ["wqkv", "bqkv", "wo", "bo", "g1", "be1",
             "w1", "b1", "w2", "b2", "g2", "be2"]
    weights = [lp[n] for n in names]
    w_specs = [pl.BlockSpec((1,) + w.shape[1:], lambda i, d: (d, 0, 0))
               for w in weights]
    kern = functools.partial(
        _encoder_kernel, num_heads=num_heads, cls_row=cls_row,
        bm=bm, s_pad=s_pad, dim=D,
    )
    return pl.pallas_call(
        kern,
        out_shape=jax.ShapeDtypeStruct((B, D), jnp.float32),
        grid=(B // bm, depth),
        in_specs=[
            pl.BlockSpec(mask.shape, lambda i, d: (0, 0)),            # key mask
            pl.BlockSpec((bm, s_pad, D), lambda i, d: (i, 0, 0)),     # tokens in
        ] + w_specs,
        out_specs=pl.BlockSpec((bm, D), lambda i, d: (i, 0)),
        scratch_shapes=[
            pltpu.VMEM((bm, s_pad, D), jnp.float32),   # resident token tensor
            pltpu.VMEM((bm, s_pad, D), jnp.float32),   # per-head attention context
        ],
        compiler_params=pltpu.CompilerParams(
            dimension_semantics=("parallel", "arbitrary"),
            vmem_limit_bytes=_vmem_limit_bytes(),
        ),
    )(mask, tokens, *weights)


def _mlp_head(cls_tok, hp):
    B, D = cls_tok.shape
    Mh = hp["w1"].shape[1]
    C = hp["w2"].shape[1]
    return pl.pallas_call(
        _mlp_head_kernel,
        out_shape=jax.ShapeDtypeStruct((B, C), jnp.float32),
        grid=(1,),
        in_specs=[
            pl.BlockSpec((B, D), lambda i: (0, 0)),
            pl.BlockSpec((D, Mh), lambda i: (0, 0)),
            pl.BlockSpec((1, Mh), lambda i: (0, 0)),
            pl.BlockSpec((Mh, C), lambda i: (0, 0)),
            pl.BlockSpec((1, C), lambda i: (0, 0)),
        ],
        out_specs=pl.BlockSpec((B, C), lambda i: (0, 0)),
    )(cls_tok, hp["w1"], hp["b1"], hp["w2"], hp["b2"])


# ----------------------------------------------------------------------------
# Parameters (matmul weights stored bf16, pre-transposed for x @ W form)
# ----------------------------------------------------------------------------
def make_params(key, *, image_size, patch_size, num_classes, dim, depth, heads, mlp_dim):
    assert dim % heads == 0
    num_patches = (image_size // patch_size) ** 2
    patch_dim = 3 * patch_size ** 2

    def nrm(k, shape, scale=0.02):
        return scale * jax.random.normal(k, shape, jnp.float32)

    keys = iter(jax.random.split(key, 8 + depth * 8))
    params = {
        "patch_w_t": nrm(next(keys), (patch_dim, dim)).astype(jnp.bfloat16),
        "patch_b": nrm(next(keys), (1, dim)),
        "cls": jax.random.normal(next(keys), (1, dim), jnp.float32),
        "pos": jax.random.normal(next(keys), (num_patches + 1, dim), jnp.float32),
    }

    wqkv, bqkv, wo, bo, w1, b1, w2, b2 = ([] for _ in range(8))
    for _ in range(depth):
        ipw = nrm(next(keys), (3 * dim, dim))     # torch in_proj_weight (3D, D)
        ipb = nrm(next(keys), (3 * dim,))
        wo_l = nrm(next(keys), (dim, dim))        # torch out_proj.weight
        bo_l = nrm(next(keys), (dim,))
        w1_l = nrm(next(keys), (mlp_dim, dim))    # torch linear1.weight
        b1_l = nrm(next(keys), (mlp_dim,))
        w2_l = nrm(next(keys), (dim, mlp_dim))    # torch linear2.weight
        b2_l = nrm(next(keys), (dim,))
        # fused QKV: [q|k|v] = x @ in_proj_weight.T + in_proj_bias
        wqkv.append(ipw.T.astype(jnp.bfloat16))
        bqkv.append(ipb.reshape(1, 3 * dim))
        wo.append(wo_l.T.astype(jnp.bfloat16))
        bo.append(bo_l.reshape(1, dim))
        w1.append(w1_l.T.astype(jnp.bfloat16))
        b1.append(b1_l.reshape(1, mlp_dim))
        w2.append(w2_l.T.astype(jnp.bfloat16))
        b2.append(b2_l.reshape(1, dim))

    params["layers"] = {
        "wqkv": jnp.stack(wqkv), "bqkv": jnp.stack(bqkv),
        "wo": jnp.stack(wo), "bo": jnp.stack(bo),
        "g1": jnp.ones((depth, 1, dim), jnp.float32),
        "be1": jnp.zeros((depth, 1, dim), jnp.float32),
        "w1": jnp.stack(w1), "b1": jnp.stack(b1),
        "w2": jnp.stack(w2), "b2": jnp.stack(b2),
        "g2": jnp.ones((depth, 1, dim), jnp.float32),
        "be2": jnp.zeros((depth, 1, dim), jnp.float32),
    }
    params["head"] = {
        "w1": nrm(next(keys), (dim, mlp_dim)).astype(jnp.bfloat16),
        "b1": nrm(next(keys), (1, mlp_dim)),
        "w2": nrm(next(keys), (mlp_dim, num_classes)).astype(jnp.bfloat16),
        "b2": nrm(next(keys), (1, num_classes)),
    }
    return params


# ----------------------------------------------------------------------------
# Forward
# ----------------------------------------------------------------------------
@functools.partial(jax.jit, static_argnames=("image_size", "patch_size", "num_heads"))
def vit_forward(x, params, *, image_size, patch_size, num_heads):
    b, c, w, h = x.shape
    assert h == image_size and w == image_size
    npr = image_size // patch_size
    num_patches = npr * npr
    patch_dim = c * patch_size ** 2
    dim = params["patch_w_t"].shape[1]
    seq_len = num_patches + 1
    s_pad = ((seq_len + 7) // 8) * 8        # sublane-align the sequence dim
    cls_row = num_patches                    # cls token lives after the patches

    bm = b if b <= 8 else 8                  # images per grid step
    assert b % bm == 0

    # chop_to_patches: exact reproduction of the reference (pure reshapes)
    chopped = x.reshape(b, c, npr, patch_size, npr, patch_size)
    chopped = chopped.reshape(b, npr, npr, c, patch_size, patch_size)
    patches = chopped.reshape(b, num_patches, patch_dim)

    # positional embedding permuted to the internal token order
    # (patch rows first, cls row at num_patches) and padded to S_pad
    pos = params["pos"]
    pos_perm = jnp.concatenate([pos[1:seq_len], pos[0:1]], axis=0)
    pos_pad = jnp.pad(pos_perm, ((0, s_pad - seq_len), (0, 0)))

    # patch embedding + cls token + positional embedding (one Pallas kernel)
    tokens = _embed_tokens(
        patches, params["patch_w_t"], params["patch_b"], params["cls"], pos_pad,
        s_pad=s_pad, bm=bm,
    )

    # additive key mask: 0 for valid positions, -1e30 for sublane padding
    mask = jnp.where(jnp.arange(s_pad)[None, :] < seq_len, 0.0, -1e30
                     ).astype(jnp.float32)

    # full encoder stack in one pallas_call; returns only the cls rows (B, D)
    cls_tok = _encoder(tokens, mask, params["layers"], num_heads=num_heads,
                       s_pad=s_pad, cls_row=cls_row, bm=bm)

    # classification head on the cls token
    return _mlp_head(cls_tok, params["head"])


if __name__ == "__main__":
    image_size, patch_size = 16, 4
    num_classes, dim, depth, heads, mlp_dim = 10, 32, 2, 4, 64
    key = jax.random.PRNGKey(0)
    k_param, k_x = jax.random.split(key)

    params = make_params(
        k_param, image_size=image_size, patch_size=patch_size,
        num_classes=num_classes, dim=dim, depth=depth, heads=heads, mlp_dim=mlp_dim,
    )
    x = jax.random.normal(k_x, (2, 3, image_size, image_size), jnp.float32)

    out = vit_forward(
        x, params, image_size=image_size, patch_size=patch_size, num_heads=heads
    )
    jax.block_until_ready(out)
    assert out.shape == (2, num_classes)
    assert bool(jnp.all(jnp.isfinite(out)))
    print("KERNEL_OK")
</pallas_src>

<mosaic_0001>
module attributes {stable_mosaic.version = 11 : i64} {
  func.func @_embed_kernel(%arg0: i32, %arg1: memref<2x16x48xf32, #tpu.memory_space<vmem>>, %arg2: memref<48x32xbf16, #tpu.memory_space<vmem>>, %arg3: memref<1x32xf32, #tpu.memory_space<vmem>>, %arg4: memref<1x32xf32, #tpu.memory_space<vmem>>, %arg5: memref<24x32xf32, #tpu.memory_space<vmem>>, %arg6: memref<2x24x32xf32, #tpu.memory_space<vmem>>) attributes {dimension_semantics = [#tpu.dimension_semantics<parallel>], iteration_bounds = array<i64: 1>, scalar_prefetch = 0 : i64, scratch_operands = 0 : i64, tpu.core_type = #tpu.core_type<tc>, window_params = [{transform_indices = @transform_0, window_bounds = array<i64: 2, 16, 48>}, {pipeline_mode = #tpu.pipeline_mode<synchronous>, transform_indices = @transform_1, window_bounds = array<i64: 48, 32>}, {pipeline_mode = #tpu.pipeline_mode<synchronous>, transform_indices = @transform_2, window_bounds = array<i64: 1, 32>}, {pipeline_mode = #tpu.pipeline_mode<synchronous>, transform_indices = @transform_3, window_bounds = array<i64: 1, 32>}, {pipeline_mode = #tpu.pipeline_mode<synchronous>, transform_indices = @transform_4, window_bounds = array<i64: 24, 32>}, {transform_indices = @transform_5, window_bounds = array<i64: 2, 24, 32>}]} {
    %c0 = arith.constant 0 : index
    %c0_0 = arith.constant 0 : index
    %c0_1 = arith.constant 0 : index
    %0 = vector.load %arg1[%c0, %c0_0, %c0_1] : memref<2x16x48xf32, #tpu.memory_space<vmem>>, vector<2x16x48xf32>
    %1 = vector.shape_cast %0 : vector<2x16x48xf32> to vector<32x48xf32>
    %2 = arith.truncf %1 : vector<32x48xf32> to vector<32x48xbf16>
    %c0_2 = arith.constant 0 : index
    %c0_3 = arith.constant 0 : index
    %3 = vector.load %arg2[%c0_2, %c0_3] : memref<48x32xbf16, #tpu.memory_space<vmem>>, vector<48x32xbf16>
    %cst = arith.constant dense<0.000000e+00> : vector<32x32xf32>
    %4 = tpu.matmul %2, %3, %cst {dimension_numbers = #tpu.dot_dimension_numbers<[1], [0], [0], [1], [0, 0, 1, 1], [], []>} : vector<32x48xbf16>, vector<48x32xbf16>, vector<32x32xf32> -> vector<32x32xf32>
    %c0_4 = arith.constant 0 : index
    %c0_5 = arith.constant 0 : index
    %5 = vector.load %arg3[%c0_4, %c0_5] : memref<1x32xf32, #tpu.memory_space<vmem>>, vector<1x32xf32>
    %6 = vector.broadcast %5 : vector<1x32xf32> to vector<32x32xf32>
    %7 = arith.addf %4, %6 : vector<32x32xf32>
    %8 = vector.shape_cast %7 : vector<32x32xf32> to vector<2x16x32xf32>
    %c0_6 = arith.constant 0 : index
    %c0_7 = arith.constant 0 : index
    %9 = vector.load %arg5[%c0_6, %c0_7] : memref<24x32xf32, #tpu.memory_space<vmem>>, vector<16x32xf32>
    %10 = vector.shape_cast %9 : vector<16x32xf32> to vector<1x16x32xf32>
    %11 = vector.broadcast %10 : vector<1x16x32xf32> to vector<2x16x32xf32>
    %12 = arith.addf %8, %11 : vector<2x16x32xf32>
    %c0_8 = arith.constant 0 : index
    %c0_9 = arith.constant 0 : index
    %c0_10 = arith.constant 0 : index
    %13 = vector.load %arg6[%c0_8, %c0_9, %c0_10] : memref<2x24x32xf32, #tpu.memory_space<vmem>>, vector<2x16x32xf32>
    tpu.vector_store %arg6[%c0_8, %c0_9, %c0_10], %12 {strides = array<i32>} : memref<2x24x32xf32, #tpu.memory_space<vmem>>, vector<2x16x32xf32>,
    %c0_11 = arith.constant 0 : index
    %c0_12 = arith.constant 0 : index
    %14 = vector.load %arg4[%c0_11, %c0_12] : memref<1x32xf32, #tpu.memory_space<vmem>>, vector<1x32xf32>
    %c16 = arith.constant 16 : index
    %c0_13 = arith.constant 0 : index
    %15 = vector.load %arg5[%c16, %c0_13] : memref<24x32xf32, #tpu.memory_space<vmem>>, vector<1x32xf32>
    %16 = arith.addf %14, %15 : vector<1x32xf32>
    %17 = vector.shape_cast %16 : vector<1x32xf32> to vector<1x1x32xf32>
    %18 = vector.shape_cast %17 : vector<1x1x32xf32> to vector<1x1x32xf32>
    %19 = vector.broadcast %18 : vector<1x1x32xf32> to vector<2x1x32xf32>
    %c0_14 = arith.constant 0 : index
    %c16_15 = arith.constant 16 : index
    %c0_16 = arith.constant 0 : index
    %20 = vector.load %arg6[%c0_14, %c16_15, %c0_16] : memref<2x24x32xf32, #tpu.memory_space<vmem>>, vector<2x1x32xf32>
    tpu.vector_store %arg6[%c0_14, %c16_15, %c0_16], %19 {strides = array<i32>} : memref<2x24x32xf32, #tpu.memory_space<vmem>>, vector<2x1x32xf32>,
    %cst_17 = arith.constant 0.000000e+00 : f32
    %21 = vector.broadcast %cst_17 : f32 to vector<2x7x32xf32>
    %c0_18 = arith.constant 0 : index
    %c17 = arith.constant 17 : index
    %c0_19 = arith.constant 0 : index
    %22 = vector.load %arg6[%c0_18, %c17, %c0_19] : memref<2x24x32xf32, #tpu.memory_space<vmem>>, vector<2x7x32xf32>
    tpu.vector_store %arg6[%c0_18, %c17, %c0_19], %21 {strides = array<i32>} : memref<2x24x32xf32, #tpu.memory_space<vmem>>, vector<2x7x32xf32>,
    return
  }
  func.func @transform_0(%arg0: i32) -> (i32, i32, i32) {
    %c0_i32 = arith.constant 0 : i32
    %c0_i32_0 = arith.constant 0 : i32
    %c0_i32_1 = arith.constant 0 : i32
    return %arg0, %c0_i32, %c0_i32_0 : i32, i32, i32
  }
  func.func @transform_1(%arg0: i32) -> (i32, i32) {
    %c0_i32 = arith.constant 0 : i32
    %c0_i32_0 = arith.constant 0 : i32
    %c0_i32_1 = arith.constant 0 : i32
    return %c0_i32, %c0_i32_0 : i32, i32
  }
  func.func @transform_2(%arg0: i32) -> (i32, i32) {
    %c0_i32 = arith.constant 0 : i32
    %c0_i32_0 = arith.constant 0 : i32
    %c0_i32_1 = arith.constant 0 : i32
    return %c0_i32, %c0_i32_0 : i32, i32
  }
  func.func @transform_3(%arg0: i32) -> (i32, i32) {
    %c0_i32 = arith.constant 0 : i32
    %c0_i32_0 = arith.constant 0 : i32
    %c0_i32_1 = arith.constant 0 : i32
    return %c0_i32, %c0_i32_0 : i32, i32
  }
  func.func @transform_4(%arg0: i32) -> (i32, i32) {
    %c0_i32 = arith.constant 0 : i32
    %c0_i32_0 = arith.constant 0 : i32
    %c0_i32_1 = arith.constant 0 : i32
    return %c0_i32, %c0_i32_0 : i32, i32
  }
  func.func @transform_5(%arg0: i32) -> (i32, i32, i32) {
    %c0_i32 = arith.constant 0 : i32
    %c0_i32_0 = arith.constant 0 : i32
    %c0_i32_1 = arith.constant 0 : i32
    return %arg0, %c0_i32, %c0_i32_0 : i32, i32, i32
  }
}

module attributes {stable_mosaic.version = 11 : i64} {
  func.func @_mlp_head_kernel(%arg0: i32, %arg1: memref<2x32xf32, #tpu.memory_space<vmem>>, %arg2: memref<32x64xbf16, #tpu.memory_space<vmem>>, %arg3: memref<1x64xf32, #tpu.memory_space<vmem>>, %arg4: memref<64x10xbf16, #tpu.memory_space<vmem>>, %arg5: memref<1x10xf32, #tpu.memory_space<vmem>>, %arg6: memref<2x10xf32, #tpu.memory_space<vmem>>) attributes {dimension_semantics = [#tpu.dimension_semantics<arbitrary>], iteration_bounds = array<i64: 1>, scalar_prefetch = 0 : i64, scratch_operands = 0 : i64, tpu.core_type = #tpu.core_type<tc>, window_params = [{pipeline_mode = #tpu.pipeline_mode<synchronous>, transform_indices = @transform_0, window_bounds = array<i64: 2, 32>}, {pipeline_mode = #tpu.pipeline_mode<synchronous>, transform_indices = @transform_1, window_bounds = array<i64: 32, 64>}, {pipeline_mode = #tpu.pipeline_mode<synchronous>, transform_indices = @transform_2, window_bounds = array<i64: 1, 64>}, {pipeline_mode = #tpu.pipeline_mode<synchronous>, transform_indices = @transform_3, window_bounds = array<i64: 64, 10>}, {pipeline_mode = #tpu.pipeline_mode<synchronous>, transform_indices = @transform_4, window_bounds = array<i64: 1, 10>}, {pipeline_mode = #tpu.pipeline_mode<synchronous>, transform_indices = @transform_5, window_bounds = array<i64: 2, 10>}]} {
    %c0 = arith.constant 0 : index
    %c0_0 = arith.constant 0 : index
    %0 = vector.load %arg1[%c0, %c0_0] : memref<2x32xf32, #tpu.memory_space<vmem>>, vector<2x32xf32>
    %1 = arith.truncf %0 : vector<2x32xf32> to vector<2x32xbf16>
    %c0_1 = arith.constant 0 : index
    %c0_2 = arith.constant 0 : index
    %2 = vector.load %arg2[%c0_1, %c0_2] : memref<32x64xbf16, #tpu.memory_space<vmem>>, vector<32x64xbf16>
    %cst = arith.constant dense<0.000000e+00> : vector<2x64xf32>
    %3 = tpu.matmul %1, %2, %cst {dimension_numbers = #tpu.dot_dimension_numbers<[1], [0], [0], [1], [0, 0, 1, 1], [], []>} : vector<2x32xbf16>, vector<32x64xbf16>, vector<2x64xf32> -> vector<2x64xf32>
    %c0_3 = arith.constant 0 : index
    %c0_4 = arith.constant 0 : index
    %4 = vector.load %arg3[%c0_3, %c0_4] : memref<1x64xf32, #tpu.memory_space<vmem>>, vector<1x64xf32>
    %5 = vector.broadcast %4 : vector<1x64xf32> to vector<2x64xf32>
    %6 = arith.addf %3, %5 : vector<2x64xf32>
    %7 = math.tanh %6 : vector<2x64xf32>
    %8 = arith.truncf %7 : vector<2x64xf32> to vector<2x64xbf16>
    %c0_5 = arith.constant 0 : index
    %c0_6 = arith.constant 0 : index
    %9 = vector.load %arg4[%c0_5, %c0_6] : memref<64x10xbf16, #tpu.memory_space<vmem>>, vector<64x10xbf16>
    %cst_7 = arith.constant dense<0.000000e+00> : vector<2x10xf32>
    %10 = tpu.matmul %8, %9, %cst_7 {dimension_numbers = #tpu.dot_dimension_numbers<[1], [0], [0], [1], [0, 0, 1, 1], [], []>} : vector<2x64xbf16>, vector<64x10xbf16>, vector<2x10xf32> -> vector<2x10xf32>
    %c0_8 = arith.constant 0 : index
    %c0_9 = arith.constant 0 : index
    %11 = vector.load %arg5[%c0_8, %c0_9] : memref<1x10xf32, #tpu.memory_space<vmem>>, vector<1x10xf32>
    %12 = vector.broadcast %11 : vector<1x10xf32> to vector<2x10xf32>
    %13 = arith.addf %10, %12 : vector<2x10xf32>
    %c0_10 = arith.constant 0 : index
    %c0_11 = arith.constant 0 : index
    %14 = vector.load %arg6[%c0_10, %c0_11] : memref<2x10xf32, #tpu.memory_space<vmem>>, vector<2x10xf32>
    tpu.vector_store %arg6[%c0_10, %c0_11], %13 {strides = array<i32>} : memref<2x10xf32, #tpu.memory_space<vmem>>, vector<2x10xf32>,
    return
  }
  func.func @transform_0(%arg0: i32) -> (i32, i32) {
    %c0_i32 = arith.constant 0 : i32
    %c0_i32_0 = arith.constant 0 : i32
    %c0_i32_1 = arith.constant 0 : i32
    return %c0_i32, %c0_i32_0 : i32, i32
  }
  func.func @transform_1(%arg0: i32) -> (i32, i32) {
    %c0_i32 = arith.constant 0 : i32
    %c0_i32_0 = arith.constant 0 : i32
    %c0_i32_1 = arith.constant 0 : i32
    return %c0_i32, %c0_i32_0 : i32, i32
  }
  func.func @transform_2(%arg0: i32) -> (i32, i32) {
    %c0_i32 = arith.constant 0 : i32
    %c0_i32_0 = arith.constant 0 : i32
    %c0_i32_1 = arith.constant 0 : i32
    return %c0_i32, %c0_i32_0 : i32, i32
  }
  func.func @transform_3(%arg0: i32) -> (i32, i32) {
    %c0_i32 = arith.constant 0 : i32
    %c0_i32_0 = arith.constant 0 : i32
    %c0_i32_1 = arith.constant 0 : i32
    return %c0_i32, %c0_i32_0 : i32, i32
  }
  func.func @transform_4(%arg0: i32) -> (i32, i32) {
    %c0_i32 = arith.constant 0 : i32
    %c0_i32_0 = arith.constant 0 : i32
    %c0_i32_1 = arith.constant 0 : i32
    return %c0_i32, %c0_i32_0 : i32, i32
  }
  func.func @transform_5(%arg0: i32) -> (i32, i32) {
    %c0_i32 = arith.constant 0 : i32
    %c0_i32_0 = arith.constant 0 : i32
    %c0_i32_1 = arith.constant 0 : i32
    return %c0_i32, %c0_i32_0 : i32, i32
  }
}

module attributes {stable_mosaic.version = 11 : i64} {
  func.func @_encoder_kernel(%arg0: i32, %arg1: i32, %arg2: memref<1x24xf32, #tpu.memory_space<vmem>>, %arg3: memref<2x24x32xf32, #tpu.memory_space<vmem>>, %arg4: memref<1x32x96xbf16, #tpu.memory_space<vmem>>, %arg5: memref<1x1x96xf32, #tpu.memory_space<vmem>>, %arg6: memref<1x32x32xbf16, #tpu.memory_space<vmem>>, %arg7: memref<1x1x32xf32, #tpu.memory_space<vmem>>, %arg8: memref<1x1x32xf32, #tpu.memory_space<vmem>>, %arg9: memref<1x1x32xf32, #tpu.memory_space<vmem>>, %arg10: memref<1x32x64xbf16, #tpu.memory_space<vmem>>, %arg11: memref<1x1x64xf32, #tpu.memory_space<vmem>>, %arg12: memref<1x64x32xbf16, #tpu.memory_space<vmem>>, %arg13: memref<1x1x32xf32, #tpu.memory_space<vmem>>, %arg14: memref<1x1x32xf32, #tpu.memory_space<vmem>>, %arg15: memref<1x1x32xf32, #tpu.memory_space<vmem>>, %arg16: memref<2x32xf32, #tpu.memory_space<vmem>>, %arg17: memref<2x24x32xf32, #tpu.memory_space<vmem>>, %arg18: memref<2x24x32xf32, #tpu.memory_space<vmem>>) attributes {dimension_semantics = [#tpu.dimension_semantics<parallel>, #tpu.dimension_semantics<arbitrary>], iteration_bounds = array<i64: 1, 2>, scalar_prefetch = 0 : i64, scratch_operands = 2 : i64, tpu.core_type = #tpu.core_type<tc>, window_params = [{pipeline_mode = #tpu.pipeline_mode<synchronous>, transform_indices = @transform_0, window_bounds = array<i64: 1, 24>}, {transform_indices = @transform_1, window_bounds = array<i64: 2, 24, 32>}, {transform_indices = @transform_2, window_bounds = array<i64: 1, 32, 96>}, {transform_indices = @transform_3, window_bounds = array<i64: 1, 1, 96>}, {transform_indices = @transform_4, window_bounds = array<i64: 1, 32, 32>}, {transform_indices = @transform_5, window_bounds = array<i64: 1, 1, 32>}, {transform_indices = @transform_6, window_bounds = array<i64: 1, 1, 32>}, {transform_indices = @transform_7, window_bounds = array<i64: 1, 1, 32>}, {transform_indices = @transform_8, window_bounds = array<i64: 1, 32, 64>}, {transform_indices = @transform_9, window_bounds = array<i64: 1, 1, 64>}, {transform_indices = @transform_10, window_bounds = array<i64: 1, 64, 32>}, {transform_indices = @transform_11, window_bounds = array<i64: 1, 1, 32>}, {transform_indices = @transform_12, window_bounds = array<i64: 1, 1, 32>}, {transform_indices = @transform_13, window_bounds = array<i64: 1, 1, 32>}, {transform_indices = @transform_14, window_bounds = array<i64: 2, 32>}]} {
    %c0_i32 = arith.constant 0 : i32
    %0 = arith.cmpi eq, %arg1, %c0_i32 : i32
    %1 = arith.extui %0 : i1 to i32
    %c0_i32_0 = arith.constant 0 : i32
    %2 = arith.cmpi ne, %1, %c0_i32_0 : i32
    scf.if %2 {
      %c0_107 = arith.constant 0 : index
      %c0_108 = arith.constant 0 : index
      %c0_109 = arith.constant 0 : index
      %245 = vector.load %arg3[%c0_107, %c0_108, %c0_109] : memref<2x24x32xf32, #tpu.memory_space<vmem>>, vector<2x24x32xf32>
      %c0_110 = arith.constant 0 : index
      %c0_111 = arith.constant 0 : index
      %c0_112 = arith.constant 0 : index
      %246 = vector.load %arg17[%c0_110, %c0_111, %c0_112] : memref<2x24x32xf32, #tpu.memory_space<vmem>>, vector<2x24x32xf32>
      tpu.vector_store %arg17[%c0_110, %c0_111, %c0_112], %245 {strides = array<i32>} : memref<2x24x32xf32, #tpu.memory_space<vmem>>, vector<2x24x32xf32>,
    } else {
    }
    %c0 = arith.constant 0 : index
    %c0_1 = arith.constant 0 : index
    %c0_2 = arith.constant 0 : index
    %3 = vector.load %arg17[%c0, %c0_1, %c0_2] : memref<2x24x32xf32, #tpu.memory_space<vmem>>, vector<2x24x32xf32>
    %4 = vector.shape_cast %3 : vector<2x24x32xf32> to vector<48x32xf32>
    %5 = arith.truncf %4 : vector<48x32xf32> to vector<48x32xbf16>
    %c0_3 = arith.constant 0 : index
    %c0_4 = arith.constant 0 : index
    %c0_5 = arith.constant 0 : index
    %6 = vector.load %arg4[%c0_3, %c0_4, %c0_5] : memref<1x32x96xbf16, #tpu.memory_space<vmem>>, vector<1x32x96xbf16>
    %7 = vector.shape_cast %6 : vector<1x32x96xbf16> to vector<32x96xbf16>
    %cst = arith.constant dense<0.000000e+00> : vector<48x96xf32>
    %8 = tpu.matmul %5, %7, %cst {dimension_numbers = #tpu.dot_dimension_numbers<[1], [0], [0], [1], [0, 0, 1, 1], [], []>} : vector<48x32xbf16>, vector<32x96xbf16>, vector<48x96xf32> -> vector<48x96xf32>
    %c0_6 = arith.constant 0 : index
    %c0_7 = arith.constant 0 : index
    %c0_8 = arith.constant 0 : index
    %9 = vector.load %arg5[%c0_6, %c0_7, %c0_8] : memref<1x1x96xf32, #tpu.memory_space<vmem>>, vector<1x1x96xf32>
    %10 = vector.shape_cast %9 : vector<1x1x96xf32> to vector<1x96xf32>
    %11 = vector.broadcast %10 : vector<1x96xf32> to vector<48x96xf32>
    %12 = arith.addf %8, %11 : vector<48x96xf32>
    %13 = vector.shape_cast %12 : vector<48x96xf32> to vector<2x24x96xf32>
    %14 = vector.extract_strided_slice %13 {offsets = [0, 0, 0], sizes = [2, 24, 32], strides = [1, 1, 1]} : vector<2x24x96xf32> to vector<2x24x32xf32>
    %15 = vector.extract_strided_slice %13 {offsets = [0, 0, 32], sizes = [2, 24, 32], strides = [1, 1, 1]} : vector<2x24x96xf32> to vector<2x24x32xf32>
    %16 = vector.extract_strided_slice %13 {offsets = [0, 0, 64], sizes = [2, 24, 32], strides = [1, 1, 1]} : vector<2x24x96xf32> to vector<2x24x32xf32>
    %c0_9 = arith.constant 0 : index
    %c0_10 = arith.constant 0 : index
    %17 = vector.load %arg2[%c0_9, %c0_10] : memref<1x24xf32, #tpu.memory_space<vmem>>, vector<1x24xf32>
    %18 = vector.shape_cast %17 : vector<1x24xf32> to vector<1x1x24xf32>
    %19 = vector.extract_strided_slice %14 {offsets = [0, 0, 0], sizes = [2, 24, 8], strides = [1, 1, 1]} : vector<2x24x32xf32> to vector<2x24x8xf32>
    %20 = arith.truncf %19 : vector<2x24x8xf32> to vector<2x24x8xbf16>
    %21 = vector.extract_strided_slice %15 {offsets = [0, 0, 0], sizes = [2, 24, 8], strides = [1, 1, 1]} : vector<2x24x32xf32> to vector<2x24x8xf32>
    %22 = arith.truncf %21 : vector<2x24x8xf32> to vector<2x24x8xbf16>
    %23 = vector.extract_strided_slice %16 {offsets = [0, 0, 0], sizes = [2, 24, 8], strides = [1, 1, 1]} : vector<2x24x32xf32> to vector<2x24x8xf32>
    %24 = arith.truncf %23 : vector<2x24x8xf32> to vector<2x24x8xbf16>
    %cst_11 = arith.constant dense<0.000000e+00> : vector<2x24x24xf32>
    %25 = tpu.matmul %20, %22, %cst_11 {dimension_numbers = #tpu.dot_dimension_numbers<[2], [2], [1], [1], [0, 0, 0, 1, 1, 1], [0], [0]>} : vector<2x24x8xbf16>, vector<2x24x8xbf16>, vector<2x24x24xf32> -> vector<2x24x24xf32>
    %cst_12 = arith.constant 0.353553385 : f32
    %26 = vector.broadcast %cst_12 : f32 to vector<2x24x24xf32>
    %27 = arith.mulf %25, %26 : vector<2x24x24xf32>
    %28 = vector.broadcast %18 : vector<1x1x24xf32> to vector<2x24x24xf32>
    %29 = arith.addf %27, %28 : vector<2x24x24xf32>
    %cst_13 = arith.constant dense<0xFF800000> : vector<2x24xf32>
    %30 = vector.multi_reduction <maximumf>, %29, %cst_13 [2] : vector<2x24x24xf32> to vector<2x24xf32>
    %31 = vector.shape_cast %30 : vector<2x24xf32> to vector<2x24x1xf32>
    %32 = vector.broadcast %31 : vector<2x24x1xf32> to vector<2x24x24xf32>
    %33 = arith.subf %29, %32 : vector<2x24x24xf32>
    %34 = math.exp %33 : vector<2x24x24xf32>
    %cst_14 = arith.constant dense<0.000000e+00> : vector<2x24xf32>
    %35 = vector.multi_reduction <add>, %34, %cst_14 [2] : vector<2x24x24xf32> to vector<2x24xf32>
    %36 = vector.shape_cast %35 : vector<2x24xf32> to vector<2x24x1xf32>
    %37 = tpu.reciprocal %36 {approx = true} : vector<2x24x1xf32> -> vector<2x24x1xf32>
    %38 = vector.broadcast %37 : vector<2x24x1xf32> to vector<2x24x24xf32>
    %39 = arith.mulf %34, %38 : vector<2x24x24xf32>
    %40 = arith.truncf %39 : vector<2x24x24xf32> to vector<2x24x24xbf16>
    %cst_15 = arith.constant dense<0.000000e+00> : vector<2x24x8xf32>
    %41 = tpu.matmul %40, %24, %cst_15 {dimension_numbers = #tpu.dot_dimension_numbers<[2], [1], [1], [2], [0, 0, 0, 1, 1, 2], [0], [0]>} : vector<2x24x24xbf16>, vector<2x24x8xbf16>, vector<2x24x8xf32> -> vector<2x24x8xf32>
    %c0_16 = arith.constant 0 : index
    %c0_17 = arith.constant 0 : index
    %c0_18 = arith.constant 0 : index
    %42 = vector.load %arg18[%c0_16, %c0_17, %c0_18] : memref<2x24x32xf32, #tpu.memory_space<vmem>>, vector<2x24x8xf32>
    tpu.vector_store %arg18[%c0_16, %c0_17, %c0_18], %41 {strides = array<i32>} : memref<2x24x32xf32, #tpu.memory_space<vmem>>, vector<2x24x8xf32>,
    %43 = vector.extract_strided_slice %14 {offsets = [0, 0, 8], sizes = [2, 24, 8], strides = [1, 1, 1]} : vector<2x24x32xf32> to vector<2x24x8xf32>
    %44 = arith.truncf %43 : vector<2x24x8xf32> to vector<2x24x8xbf16>
    %45 = vector.extract_strided_slice %15 {offsets = [0, 0, 8], sizes = [2, 24, 8], strides = [1, 1, 1]} : vector<2x24x32xf32> to vector<2x24x8xf32>
    %46 = arith.truncf %45 : vector<2x24x8xf32> to vector<2x24x8xbf16>
    %47 = vector.extract_strided_slice %16 {offsets = [0, 0, 8], sizes = [2, 24, 8], strides = [1, 1, 1]} : vector<2x24x32xf32> to vector<2x24x8xf32>
    %48 = arith.truncf %47 : vector<2x24x8xf32> to vector<2x24x8xbf16>
    %cst_19 = arith.constant dense<0.000000e+00> : vector<2x24x24xf32>
    %49 = tpu.matmul %44, %46, %cst_19 {dimension_numbers = #tpu.dot_dimension_numbers<[2], [2], [1], [1], [0, 0, 0, 1, 1, 1], [0], [0]>} : vector<2x24x8xbf16>, vector<2x24x8xbf16>, vector<2x24x24xf32> -> vector<2x24x24xf32>
    %cst_20 = arith.constant 0.353553385 : f32
    %50 = vector.broadcast %cst_20 : f32 to vector<2x24x24xf32>
    %51 = arith.mulf %49, %50 : vector<2x24x24xf32>
    %52 = vector.broadcast %18 : vector<1x1x24xf32> to vector<2x24x24xf32>
    %53 = arith.addf %51, %52 : vector<2x24x24xf32>
    %cst_21 = arith.constant dense<0xFF800000> : vector<2x24xf32>
    %54 = vector.multi_reduction <maximumf>, %53, %cst_21 [2] : vector<2x24x24xf32> to vector<2x24xf32>
    %55 = vector.shape_cast %54 : vector<2x24xf32> to vector<2x24x1xf32>
    %56 = vector.broadcast %55 : vector<2x24x1xf32> to vector<2x24x24xf32>
    %57 = arith.subf %53, %56 : vector<2x24x24xf32>
    %58 = math.exp %57 : vector<2x24x24xf32>
    %cst_22 = arith.constant dense<0.000000e+00> : vector<2x24xf32>
    %59 = vector.multi_reduction <add>, %58, %cst_22 [2] : vector<2x24x24xf32> to vector<2x24xf32>
    %60 = vector.shape_cast %59 : vector<2x24xf32> to vector<2x24x1xf32>
    %61 = tpu.reciprocal %60 {approx = true} : vector<2x24x1xf32> -> vector<2x24x1xf32>
    %62 = vector.broadcast %61 : vector<2x24x1xf32> to vector<2x24x24xf32>
    %63 = arith.mulf %58, %62 : vector<2x24x24xf32>
    %64 = arith.truncf %63 : vector<2x24x24xf32> to vector<2x24x24xbf16>
    %cst_23 = arith.constant dense<0.000000e+00> : vector<2x24x8xf32>
    %65 = tpu.matmul %64, %48, %cst_23 {dimension_numbers = #tpu.dot_dimension_numbers<[2], [1], [1], [2], [0, 0, 0, 1, 1, 2], [0], [0]>} : vector<2x24x24xbf16>, vector<2x24x8xbf16>, vector<2x24x8xf32> -> vector<2x24x8xf32>
    %c0_24 = arith.constant 0 : index
    %c0_25 = arith.constant 0 : index
    %c8 = arith.constant 8 : index
    %66 = vector.load %arg18[%c0_24, %c0_25, %c8] : memref<2x24x32xf32, #tpu.memory_space<vmem>>, vector<2x24x8xf32>
    tpu.vector_store %arg18[%c0_24, %c0_25, %c8], %65 {strides = array<i32>} : memref<2x24x32xf32, #tpu.memory_space<vmem>>, vector<2x24x8xf32>,
    %67 = vector.extract_strided_slice %14 {offsets = [0, 0, 16], sizes = [2, 24, 8], strides = [1, 1, 1]} : vector<2x24x32xf32> to vector<2x24x8xf32>
    %68 = arith.truncf %67 : vector<2x24x8xf32> to vector<2x24x8xbf16>
    %69 = vector.extract_strided_slice %15 {offsets = [0, 0, 16], sizes = [2, 24, 8], strides = [1, 1, 1]} : vector<2x24x32xf32> to vector<2x24x8xf32>
    %70 = arith.truncf %69 : vector<2x24x8xf32> to vector<2x24x8xbf16>
    %71 = vector.extract_strided_slice %16 {offsets = [0, 0, 16], sizes = [2, 24, 8], strides = [1, 1, 1]} : vector<2x24x32xf32> to vector<2x24x8xf32>
    %72 = arith.truncf %71 : vector<2x24x8xf32> to vector<2x24x8xbf16>
    %cst_26 = arith.constant dense<0.000000e+00> : vector<2x24x24xf32>
    %73 = tpu.matmul %68, %70, %cst_26 {dimension_numbers = #tpu.dot_dimension_numbers<[2], [2], [1], [1], [0, 0, 0, 1, 1, 1], [0], [0]>} : vector<2x24x8xbf16>, vector<2x24x8xbf16>, vector<2x24x24xf32> -> vector<2x24x24xf32>
    %cst_27 = arith.constant 0.353553385 : f32
    %74 = vector.broadcast %cst_27 : f32 to vector<2x24x24xf32>
    %75 = arith.mulf %73, %74 : vector<2x24x24xf32>
    %76 = vector.broadcast %18 : vector<1x1x24xf32> to vector<2x24x24xf32>
    %77 = arith.addf %75, %76 : vector<2x24x24xf32>
    %cst_28 = arith.constant dense<0xFF800000> : vector<2x24xf32>
    %78 = vector.multi_reduction <maximumf>, %77, %cst_28 [2] : vector<2x24x24xf32> to vector<2x24xf32>
    %79 = vector.shape_cast %78 : vector<2x24xf32> to vector<2x24x1xf32>
    %80 = vector.broadcast %79 : vector<2x24x1xf32> to vector<2x24x24xf32>
    %81 = arith.subf %77, %80 : vector<2x24x24xf32>
    %82 = math.exp %81 : vector<2x24x24xf32>
    %cst_29 = arith.constant dense<0.000000e+00> : vector<2x24xf32>
    %83 = vector.multi_reduction <add>, %82, %cst_29 [2] : vector<2x24x24xf32> to vector<2x24xf32>
    %84 = vector.shape_cast %83 : vector<2x24xf32> to vector<2x24x1xf32>
    %85 = tpu.reciprocal %84 {approx = true} : vector<2x24x1xf32> -> vector<2x24x1xf32>
    %86 = vector.broadcast %85 : vector<2x24x1xf32> to vector<2x24x24xf32>
    %87 = arith.mulf %82, %86 : vector<2x24x24xf32>
    %88 = arith.truncf %87 : vector<2x24x24xf32> to vector<2x24x24xbf16>
    %cst_30 = arith.constant dense<0.000000e+00> : vector<2x24x8xf32>
    %89 = tpu.matmul %88, %72, %cst_30 {dimension_numbers = #tpu.dot_dimension_numbers<[2], [1], [1], [2], [0, 0, 0, 1, 1, 2], [0], [0]>} : vector<2x24x24xbf16>, vector<2x24x8xbf16>, vector<2x24x8xf32> -> vector<2x24x8xf32>
    %c0_31 = arith.constant 0 : index
    %c0_32 = arith.constant 0 : index
    %c16 = arith.constant 16 : index
    %90 = vector.load %arg18[%c0_31, %c0_32, %c16] : memref<2x24x32xf32, #tpu.memory_space<vmem>>, vector<2x24x8xf32>
    tpu.vector_store %arg18[%c0_31, %c0_32, %c16], %89 {strides = array<i32>} : memref<2x24x32xf32, #tpu.memory_space<vmem>>, vector<2x24x8xf32>,
    %91 = vector.extract_strided_slice %14 {offsets = [0, 0, 24], sizes = [2, 24, 8], strides = [1, 1, 1]} : vector<2x24x32xf32> to vector<2x24x8xf32>
    %92 = arith.truncf %91 : vector<2x24x8xf32> to vector<2x24x8xbf16>
    %93 = vector.extract_strided_slice %15 {offsets = [0, 0, 24], sizes = [2, 24, 8], strides = [1, 1, 1]} : vector<2x24x32xf32> to vector<2x24x8xf32>
    %94 = arith.truncf %93 : vector<2x24x8xf32> to vector<2x24x8xbf16>
    %95 = vector.extract_strided_slice %16 {offsets = [0, 0, 24], sizes = [2, 24, 8], strides = [1, 1, 1]} : vector<2x24x32xf32> to vector<2x24x8xf32>
    %96 = arith.truncf %95 : vector<2x24x8xf32> to vector<2x24x8xbf16>
    %cst_33 = arith.constant dense<0.000000e+00> : vector<2x24x24xf32>
    %97 = tpu.matmul %92, %94, %cst_33 {dimension_numbers = #tpu.dot_dimension_numbers<[2], [2], [1], [1], [0, 0, 0, 1, 1, 1], [0], [0]>} : vector<2x24x8xbf16>, vector<2x24x8xbf16>, vector<2x24x24xf32> -> vector<2x24x24xf32>
    %cst_34 = arith.constant 0.353553385 : f32
    %98 = vector.broadcast %cst_34 : f32 to vector<2x24x24xf32>
    %99 = arith.mulf %97, %98 : vector<2x24x24xf32>
    %100 = vector.broadcast %18 : vector<1x1x24xf32> to vector<2x24x24xf32>
    %101 = arith.addf %99, %100 : vector<2x24x24xf32>
    %cst_35 = arith.constant dense<0xFF800000> : vector<2x24xf32>
    %102 = vector.multi_reduction <maximumf>, %101, %cst_35 [2] : vector<2x24x24xf32> to vector<2x24xf32>
    %103 = vector.shape_cast %102 : vector<2x24xf32> to vector<2x24x1xf32>
    %104 = vector.broadcast %103 : vector<2x24x1xf32> to vector<2x24x24xf32>
    %105 = arith.subf %101, %104 : vector<2x24x24xf32>
    %106 = math.exp %105 : vector<2x24x24xf32>
    %cst_36 = arith.constant dense<0.000000e+00> : vector<2x24xf32>
    %107 = vector.multi_reduction <add>, %106, %cst_36 [2] : vector<2x24x24xf32> to vector<2x24xf32>
    %108 = vector.shape_cast %107 : vector<2x24xf32> to vector<2x24x1xf32>
    %109 = tpu.reciprocal %108 {approx = true} : vector<2x24x1xf32> -> vector<2x24x1xf32>
    %110 = vector.broadcast %109 : vector<2x24x1xf32> to vector<2x24x24xf32>
    %111 = arith.mulf %106, %110 : vector<2x24x24xf32>
    %112 = arith.truncf %111 : vector<2x24x24xf32> to vector<2x24x24xbf16>
    %cst_37 = arith.constant dense<0.000000e+00> : vector<2x24x8xf32>
    %113 = tpu.matmul %112, %96, %cst_37 {dimension_numbers = #tpu.dot_dimension_numbers<[2], [1], [1], [2], [0, 0, 0, 1, 1, 2], [0], [0]>} : vector<2x24x24xbf16>, vector<2x24x8xbf16>, vector<2x24x8xf32> -> vector<2x24x8xf32>
    %c0_38 = arith.constant 0 : index
    %c0_39 = arith.constant 0 : index
    %c24 = arith.constant 24 : index
    %114 = vector.load %arg18[%c0_38, %c0_39, %c24] : memref<2x24x32xf32, #tpu.memory_space<vmem>>, vector<2x24x8xf32>
    tpu.vector_store %arg18[%c0_38, %c0_39, %c24], %113 {strides = array<i32>} : memref<2x24x32xf32, #tpu.memory_space<vmem>>, vector<2x24x8xf32>,
    %c0_40 = arith.constant 0 : index
    %c0_41 = arith.constant 0 : index
    %c0_42 = arith.constant 0 : index
    %115 = vector.load %arg18[%c0_40, %c0_41, %c0_42] : memref<2x24x32xf32, #tpu.memory_space<vmem>>, vector<2x24x32xf32>
    %116 = vector.shape_cast %115 : vector<2x24x32xf32> to vector<48x32xf32>
    %117 = arith.truncf %116 : vector<48x32xf32> to vector<48x32xbf16>
    %c0_43 = arith.constant 0 : index
    %c0_44 = arith.constant 0 : index
    %c0_45 = arith.constant 0 : index
    %118 = vector.load %arg6[%c0_43, %c0_44, %c0_45] : memref<1x32x32xbf16, #tpu.memory_space<vmem>>, vector<1x32x32xbf16>
    %119 = vector.shape_cast %118 : vector<1x32x32xbf16> to vector<32x32xbf16>
    %cst_46 = arith.constant dense<0.000000e+00> : vector<48x32xf32>
    %120 = tpu.matmul %117, %119, %cst_46 {dimension_numbers = #tpu.dot_dimension_numbers<[1], [0], [0], [1], [0, 0, 1, 1], [], []>} : vector<48x32xbf16>, vector<32x32xbf16>, vector<48x32xf32> -> vector<48x32xf32>
    %c0_47 = arith.constant 0 : index
    %c0_48 = arith.constant 0 : index
    %c0_49 = arith.constant 0 : index
    %121 = vector.load %arg7[%c0_47, %c0_48, %c0_49] : memref<1x1x32xf32, #tpu.memory_space<vmem>>, vector<1x1x32xf32>
    %122 = vector.shape_cast %121 : vector<1x1x32xf32> to vector<1x32xf32>
    %123 = vector.broadcast %122 : vector<1x32xf32> to vector<48x32xf32>
    %124 = arith.addf %120, %123 : vector<48x32xf32>
    %125 = arith.addf %4, %124 : vector<48x32xf32>
    %c0_50 = arith.constant 0 : index
    %c0_51 = arith.constant 0 : index
    %c0_52 = arith.constant 0 : index
    %126 = vector.load %arg8[%c0_50, %c0_51, %c0_52] : memref<1x1x32xf32, #tpu.memory_space<vmem>>, vector<1x1x32xf32>
    %127 = vector.shape_cast %126 : vector<1x1x32xf32> to vector<1x32xf32>
    %c0_53 = arith.constant 0 : index
    %c0_54 = arith.constant 0 : index
    %c0_55 = arith.constant 0 : index
    %128 = vector.load %arg9[%c0_53, %c0_54, %c0_55] : memref<1x1x32xf32, #tpu.memory_space<vmem>>, vector<1x1x32xf32>
    %129 = vector.shape_cast %128 : vector<1x1x32xf32> to vector<1x32xf32>
    %cst_56 = arith.constant dense<0.000000e+00> : vector<48xf32>
    %130 = vector.multi_reduction <add>, %125, %cst_56 [1] : vector<48x32xf32> to vector<48xf32>
    %131 = vector.shape_cast %130 : vector<48xf32> to vector<48x1xf32>
    %cst_57 = arith.constant 3.200000e+01 : f32
    %132 = vector.broadcast %cst_57 : f32 to vector<48x1xf32>
    %133 = arith.divf %131, %132 : vector<48x1xf32>
    %134 = vector.broadcast %133 : vector<48x1xf32> to vector<48x32xf32>
    %135 = arith.subf %125, %134 : vector<48x32xf32>
    %136 = vector.broadcast %133 : vector<48x1xf32> to vector<48x32xf32>
    %137 = arith.subf %125, %136 : vector<48x32xf32>
    %138 = arith.mulf %135, %137 : vector<48x32xf32>
    %cst_58 = arith.constant dense<0.000000e+00> : vector<48xf32>
    %139 = vector.multi_reduction <add>, %138, %cst_58 [1] : vector<48x32xf32> to vector<48xf32>
    %140 = vector.shape_cast %139 : vector<48xf32> to vector<48x1xf32>
    %cst_59 = arith.constant 3.200000e+01 : f32
    %141 = vector.broadcast %cst_59 : f32 to vector<48x1xf32>
    %142 = arith.divf %140, %141 : vector<48x1xf32>
    %143 = vector.broadcast %133 : vector<48x1xf32> to vector<48x32xf32>
    %144 = arith.subf %125, %143 : vector<48x32xf32>
    %cst_60 = arith.constant 9.99999974E-6 : f32
    %145 = vector.broadcast %cst_60 : f32 to vector<48x1xf32>
    %146 = arith.addf %142, %145 : vector<48x1xf32>
    %147 = math.rsqrt %146 : vector<48x1xf32>
    %148 = vector.broadcast %147 : vector<48x1xf32> to vector<48x32xf32>
    %149 = arith.mulf %144, %148 : vector<48x32xf32>
    %150 = vector.broadcast %127 : vector<1x32xf32> to vector<48x32xf32>
    %151 = arith.mulf %149, %150 : vector<48x32xf32>
    %152 = vector.broadcast %129 : vector<1x32xf32> to vector<48x32xf32>
    %153 = arith.addf %151, %152 : vector<48x32xf32>
    %154 = arith.truncf %153 : vector<48x32xf32> to vector<48x32xbf16>
    %c0_61 = arith.constant 0 : index
    %c0_62 = arith.constant 0 : index
    %c0_63 = arith.constant 0 : index
    %155 = vector.load %arg10[%c0_61, %c0_62, %c0_63] : memref<1x32x64xbf16, #tpu.memory_space<vmem>>, vector<1x32x64xbf16>
    %156 = vector.shape_cast %155 : vector<1x32x64xbf16> to vector<32x64xbf16>
    %cst_64 = arith.constant dense<0.000000e+00> : vector<48x64xf32>
    %157 = tpu.matmul %154, %156, %cst_64 {dimension_numbers = #tpu.dot_dimension_numbers<[1], [0], [0], [1], [0, 0, 1, 1], [], []>} : vector<48x32xbf16>, vector<32x64xbf16>, vector<48x64xf32> -> vector<48x64xf32>
    %c0_65 = arith.constant 0 : index
    %c0_66 = arith.constant 0 : index
    %c0_67 = arith.constant 0 : index
    %158 = vector.load %arg11[%c0_65, %c0_66, %c0_67] : memref<1x1x64xf32, #tpu.memory_space<vmem>>, vector<1x1x64xf32>
    %159 = vector.shape_cast %158 : vector<1x1x64xf32> to vector<1x64xf32>
    %160 = vector.broadcast %159 : vector<1x64xf32> to vector<48x64xf32>
    %161 = arith.addf %157, %160 : vector<48x64xf32>
    %cst_68 = arith.constant 5.000000e-01 : f32
    %162 = vector.broadcast %cst_68 : f32 to vector<48x64xf32>
    %163 = arith.mulf %162, %161 : vector<48x64xf32>
    %cst_69 = arith.constant 0.707106769 : f32
    %164 = vector.broadcast %cst_69 : f32 to vector<48x64xf32>
    %165 = arith.mulf %161, %164 : vector<48x64xf32>
    %cst_70 = arith.constant 0.000000e+00 : f32
    %166 = vector.broadcast %cst_70 : f32 to vector<48x64xf32>
    %167 = arith.cmpf oge, %165, %166 : vector<48x64xf32>
    %cst_71 = arith.constant 1.000000e+00 : f32
    %cst_72 = arith.constant -1.000000e+00 : f32
    %168 = vector.broadcast %cst_71 : f32 to vector<48x64xf32>
    %169 = vector.broadcast %cst_72 : f32 to vector<48x64xf32>
    %170 = arith.select %167, %168, %169 : vector<48x64xi1>, vector<48x64xf32>
    %171 = math.absf %165 : vector<48x64xf32>
    %cst_73 = arith.constant 0.327591091 : f32
    %172 = vector.broadcast %cst_73 : f32 to vector<48x64xf32>
    %173 = arith.mulf %172, %171 : vector<48x64xf32>
    %cst_74 = arith.constant 1.000000e+00 : f32
    %174 = vector.broadcast %cst_74 : f32 to vector<48x64xf32>
    %175 = arith.addf %174, %173 : vector<48x64xf32>
    %cst_75 = arith.constant 1.000000e+00 : f32
    %176 = vector.broadcast %cst_75 : f32 to vector<48x64xf32>
    %177 = arith.divf %176, %175 : vector<48x64xf32>
    %cst_76 = arith.constant 1.06140542 : f32
    %178 = vector.broadcast %cst_76 : f32 to vector<48x64xf32>
    %179 = arith.mulf %178, %177 : vector<48x64xf32>
    %cst_77 = arith.constant -1.45315206 : f32
    %180 = vector.broadcast %cst_77 : f32 to vector<48x64xf32>
    %181 = arith.addf %179, %180 : vector<48x64xf32>
    %182 = arith.mulf %181, %177 : vector<48x64xf32>
    %cst_78 = arith.constant 1.42141378 : f32
    %183 = vector.broadcast %cst_78 : f32 to vector<48x64xf32>
    %184 = arith.addf %182, %183 : vector<48x64xf32>
    %185 = arith.mulf %184, %177 : vector<48x64xf32>
    %cst_79 = arith.constant -0.284496725 : f32
    %186 = vector.broadcast %cst_79 : f32 to vector<48x64xf32>
    %187 = arith.addf %185, %186 : vector<48x64xf32>
    %188 = arith.mulf %187, %177 : vector<48x64xf32>
    %cst_80 = arith.constant 0.254829586 : f32
    %189 = vector.broadcast %cst_80 : f32 to vector<48x64xf32>
    %190 = arith.addf %188, %189 : vector<48x64xf32>
    %191 = arith.mulf %190, %177 : vector<48x64xf32>
    %cst_81 = arith.constant 0.000000e+00 : f32
    %192 = vector.broadcast %cst_81 : f32 to vector<48x64xf32>
    %193 = arith.subf %192, %171 : vector<48x64xf32>
    %194 = arith.mulf %193, %171 : vector<48x64xf32>
    %195 = math.exp %194 : vector<48x64xf32>
    %196 = arith.mulf %191, %195 : vector<48x64xf32>
    %cst_82 = arith.constant 1.000000e+00 : f32
    %197 = vector.broadcast %cst_82 : f32 to vector<48x64xf32>
    %198 = arith.subf %197, %196 : vector<48x64xf32>
    %199 = arith.mulf %170, %198 : vector<48x64xf32>
    %cst_83 = arith.constant 1.000000e+00 : f32
    %200 = vector.broadcast %cst_83 : f32 to vector<48x64xf32>
    %201 = arith.addf %200, %199 : vector<48x64xf32>
    %202 = arith.mulf %163, %201 : vector<48x64xf32>
    %203 = arith.truncf %202 : vector<48x64xf32> to vector<48x64xbf16>
    %c0_84 = arith.constant 0 : index
    %c0_85 = arith.constant 0 : index
    %c0_86 = arith.constant 0 : index
    %204 = vector.load %arg12[%c0_84, %c0_85, %c0_86] : memref<1x64x32xbf16, #tpu.memory_space<vmem>>, vector<1x64x32xbf16>
    %205 = vector.shape_cast %204 : vector<1x64x32xbf16> to vector<64x32xbf16>
    %cst_87 = arith.constant dense<0.000000e+00> : vector<48x32xf32>
    %206 = tpu.matmul %203, %205, %cst_87 {dimension_numbers = #tpu.dot_dimension_numbers<[1], [0], [0], [1], [0, 0, 1, 1], [], []>} : vector<48x64xbf16>, vector<64x32xbf16>, vector<48x32xf32> -> vector<48x32xf32>
    %c0_88 = arith.constant 0 : index
    %c0_89 = arith.constant 0 : index
    %c0_90 = arith.constant 0 : index
    %207 = vector.load %arg13[%c0_88, %c0_89, %c0_90] : memref<1x1x32xf32, #tpu.memory_space<vmem>>, vector<1x1x32xf32>
    %208 = vector.shape_cast %207 : vector<1x1x32xf32> to vector<1x32xf32>
    %209 = vector.broadcast %208 : vector<1x32xf32> to vector<48x32xf32>
    %210 = arith.addf %206, %209 : vector<48x32xf32>
    %211 = arith.addf %153, %210 : vector<48x32xf32>
    %c0_91 = arith.constant 0 : index
    %c0_92 = arith.constant 0 : index
    %c0_93 = arith.constant 0 : index
    %212 = vector.load %arg14[%c0_91, %c0_92, %c0_93] : memref<1x1x32xf32, #tpu.memory_space<vmem>>, vector<1x1x32xf32>
    %213 = vector.shape_cast %212 : vector<1x1x32xf32> to vector<1x32xf32>
    %c0_94 = arith.constant 0 : index
    %c0_95 = arith.constant 0 : index
    %c0_96 = arith.constant 0 : index
    %214 = vector.load %arg15[%c0_94, %c0_95, %c0_96] : memref<1x1x32xf32, #tpu.memory_space<vmem>>, vector<1x1x32xf32>
    %215 = vector.shape_cast %214 : vector<1x1x32xf32> to vector<1x32xf32>
    %cst_97 = arith.constant dense<0.000000e+00> : vector<48xf32>
    %216 = vector.multi_reduction <add>, %211, %cst_97 [1] : vector<48x32xf32> to vector<48xf32>
    %217 = vector.shape_cast %216 : vector<48xf32> to vector<48x1xf32>
    %cst_98 = arith.constant 3.200000e+01 : f32
    %218 = vector.broadcast %cst_98 : f32 to vector<48x1xf32>
    %219 = arith.divf %217, %218 : vector<48x1xf32>
    %220 = vector.broadcast %219 : vector<48x1xf32> to vector<48x32xf32>
    %221 = arith.subf %211, %220 : vector<48x32xf32>
    %222 = vector.broadcast %219 : vector<48x1xf32> to vector<48x32xf32>
    %223 = arith.subf %211, %222 : vector<48x32xf32>
    %224 = arith.mulf %221, %223 : vector<48x32xf32>
    %cst_99 = arith.constant dense<0.000000e+00> : vector<48xf32>
    %225 = vector.multi_reduction <add>, %224, %cst_99 [1] : vector<48x32xf32> to vector<48xf32>
    %226 = vector.shape_cast %225 : vector<48xf32> to vector<48x1xf32>
    %cst_100 = arith.constant 3.200000e+01 : f32
    %227 = vector.broadcast %cst_100 : f32 to vector<48x1xf32>
    %228 = arith.divf %226, %227 : vector<48x1xf32>
    %229 = vector.broadcast %219 : vector<48x1xf32> to vector<48x32xf32>
    %230 = arith.subf %211, %229 : vector<48x32xf32>
    %cst_101 = arith.constant 9.99999974E-6 : f32
    %231 = vector.broadcast %cst_101 : f32 to vector<48x1xf32>
    %232 = arith.addf %228, %231 : vector<48x1xf32>
    %233 = math.rsqrt %232 : vector<48x1xf32>
    %234 = vector.broadcast %233 : vector<48x1xf32> to vector<48x32xf32>
    %235 = arith.mulf %230, %234 : vector<48x32xf32>
    %236 = vector.broadcast %213 : vector<1x32xf32> to vector<48x32xf32>
    %237 = arith.mulf %235, %236 : vector<48x32xf32>
    %238 = vector.broadcast %215 : vector<1x32xf32> to vector<48x32xf32>
    %239 = arith.addf %237, %238 : vector<48x32xf32>
    %240 = vector.shape_cast %239 : vector<48x32xf32> to vector<2x24x32xf32>
    %c0_102 = arith.constant 0 : index
    %c0_103 = arith.constant 0 : index
    %c0_104 = arith.constant 0 : index
    %241 = vector.load %arg17[%c0_102, %c0_103, %c0_104] : memref<2x24x32xf32, #tpu.memory_space<vmem>>, vector<2x24x32xf32>
    tpu.vector_store %arg17[%c0_102, %c0_103, %c0_104], %240 {strides = array<i32>} : memref<2x24x32xf32, #tpu.memory_space<vmem>>, vector<2x24x32xf32>,
    %242 = vector.extract_strided_slice %240 {offsets = [0, 16, 0], sizes = [2, 1, 32], strides = [1, 1, 1]} : vector<2x24x32xf32> to vector<2x1x32xf32>
    %243 = vector.shape_cast %242 : vector<2x1x32xf32> to vector<2x32xf32>
    %c0_105 = arith.constant 0 : index
    %c0_106 = arith.constant 0 : index
    %244 = vector.load %arg16[%c0_105, %c0_106] : memref<2x32xf32, #tpu.memory_space<vmem>>, vector<2x32xf32>
    tpu.vector_store %arg16[%c0_105, %c0_106], %243 {strides = array<i32>} : memref<2x32xf32, #tpu.memory_space<vmem>>, vector<2x32xf32>,
    return
  }
  func.func @transform_0(%arg0: i32, %arg1: i32) -> (i32, i32) {
    %c0_i32 = arith.constant 0 : i32
    %c0_i32_0 = arith.constant 0 : i32
    %c0_i32_1 = arith.constant 0 : i32
    return %c0_i32, %c0_i32_0 : i32, i32
  }
  func.func @transform_1(%arg0: i32, %arg1: i32) -> (i32, i32, i32) {
    %c0_i32 = arith.constant 0 : i32
    %c0_i32_0 = arith.constant 0 : i32
    %c0_i32_1 = arith.constant 0 : i32
    return %arg0, %c0_i32, %c0_i32_0 : i32, i32, i32
  }
  func.func @transform_2(%arg0: i32, %arg1: i32) -> (i32, i32, i32) {
    %c0_i32 = arith.constant 0 : i32
    %c0_i32_0 = arith.constant 0 : i32
    %c0_i32_1 = arith.constant 0 : i32
    return %arg1, %c0_i32, %c0_i32_0 : i32, i32, i32
  }
  func.func @transform_3(%arg0: i32, %arg1: i32) -> (i32, i32, i32) {
    %c0_i32 = arith.constant 0 : i32
    %c0_i32_0 = arith.constant 0 : i32
    %c0_i32_1 = arith.constant 0 : i32
    return %arg1, %c0_i32, %c0_i32_0 : i32, i32, i32
  }
  func.func @transform_4(%arg0: i32, %arg1: i32) -> (i32, i32, i32) {
    %c0_i32 = arith.constant 0 : i32
    %c0_i32_0 = arith.constant 0 : i32
    %c0_i32_1 = arith.constant 0 : i32
    return %arg1, %c0_i32, %c0_i32_0 : i32, i32, i32
  }
  func.func @transform_5(%arg0: i32, %arg1: i32) -> (i32, i32, i32) {
    %c0_i32 = arith.constant 0 : i32
    %c0_i32_0 = arith.constant 0 : i32
    %c0_i32_1 = arith.constant 0 : i32
    return %arg1, %c0_i32, %c0_i32_0 : i32, i32, i32
  }
  func.func @transform_6(%arg0: i32, %arg1: i32) -> (i32, i32, i32) {
    %c0_i32 = arith.constant 0 : i32
    %c0_i32_0 = arith.constant 0 : i32
    %c0_i32_1 = arith.constant 0 : i32
    return %arg1, %c0_i32, %c0_i32_0 : i32, i32, i32
  }
  func.func @transform_7(%arg0: i32, %arg1: i32) -> (i32, i32, i32) {
    %c0_i32 = arith.constant 0 : i32
    %c0_i32_0 = arith.constant 0 : i32
    %c0_i32_1 = arith.constant 0 : i32
    return %arg1, %c0_i32, %c0_i32_0 : i32, i32, i32
  }
  func.func @transform_8(%arg0: i32, %arg1: i32) -> (i32, i32, i32) {
    %c0_i32 = arith.constant 0 : i32
    %c0_i32_0 = arith.constant 0 : i32
    %c0_i32_1 = arith.constant 0 : i32
    return %arg1, %c0_i32, %c0_i32_0 : i32, i32, i32
  }
  func.func @transform_9(%arg0: i32, %arg1: i32) -> (i32, i32, i32) {
    %c0_i32 = arith.constant 0 : i32
    %c0_i32_0 = arith.constant 0 : i32
    %c0_i32_1 = arith.constant 0 : i32
    return %arg1, %c0_i32, %c0_i32_0 : i32, i32, i32
  }
  func.func @transform_10(%arg0: i32, %arg1: i32) -> (i32, i32, i32) {
    %c0_i32 = arith.constant 0 : i32
    %c0_i32_0 = arith.constant 0 : i32
    %c0_i32_1 = arith.constant 0 : i32
    return %arg1, %c0_i32, %c0_i32_0 : i32, i32, i32
  }
  func.func @transform_11(%arg0: i32, %arg1: i32) -> (i32, i32, i32) {
    %c0_i32 = arith.constant 0 : i32
    %c0_i32_0 = arith.constant 0 : i32
    %c0_i32_1 = arith.constant 0 : i32
    return %arg1, %c0_i32, %c0_i32_0 : i32, i32, i32
  }
  func.func @transform_12(%arg0: i32, %arg1: i32) -> (i32, i32, i32) {
    %c0_i32 = arith.constant 0 : i32
    %c0_i32_0 = arith.constant 0 : i32
    %c0_i32_1 = arith.constant 0 : i32
    return %arg1, %c0_i32, %c0_i32_0 : i32, i32, i32
  }
  func.func @transform_13(%arg0: i32, %arg1: i32) -> (i32, i32, i32) {
    %c0_i32 = arith.constant 0 : i32
    %c0_i32_0 = arith.constant 0 : i32
    %c0_i32_1 = arith.constant 0 : i32
    return %arg1, %c0_i32, %c0_i32_0 : i32, i32, i32
  }
  func.func @transform_14(%arg0: i32, %arg1: i32) -> (i32, i32) {
    %c0_i32 = arith.constant 0 : i32
    %c0_i32_0 = arith.constant 0 : i32
    return %arg0, %c0_i32 : i32, i32
  }
}

</mosaic_0001>

<bundles_post_ra>
// kernel: vit_forward.5
= control target key start
LH: loop header
LB: loop body
LE: loop exit
PB: predicated region body
PF: predicated region fallthrough
CT: control target
= control target key end

     0   :  { %s258_s0 = inlined_call_operand.vmem [shape: f32[2,32], index: 0, kind: input, shape index: {}]   ;;  %s259_s1 = inlined_call_operand.vmem [shape: bf16[32,64], index: 1, kind: input, shape index: {}]   ;;  %s260_s2 = inlined_call_operand.vmem [shape: f32[1,64], index: 2, kind: input, shape index: {}]   ;;  %s261_s3 = inlined_call_operand.vmem [shape: bf16[64,10], index: 3, kind: input, shape index: {}]   ;;  %s262_s4 = inlined_call_operand.vmem [shape: f32[1,10], index: 4, kind: input, shape index: {}]   ;;  %s263_s5 = inlined_call_operand.hbm [shape: f32[2,10], index: 5, kind: output, shape index: {}]  }
   0x1   :  { %v161_v0 = vld [vmem:[%s259_s1 + $0x8] sm:$0xff]  ;;  %v160_v1 = vld [vmem:[%s259_s1] sm:$0xff]  ;;  %v165_v2 = vld [vmem:[%s261_s3 + $0x18] sm:$0xff] }
   0x2   :  { %54 = vmatpush.bf16.msra.mxu0 %v161_v0  ;;  %v22_v3 = vld [vmem:[%s258_s0] sm:$0x3] }
   0x3   :  { %10 = vsyncpa [#allocation3], 0  ;;  %107 = vmatpush.bf16.msra.mxu1 %v165_v2  ;;  %v23_v4 = vpack.c.bf16 %v22_v3, %v22_v3  ;;  %vm44_vm0 = vcmask 261120   ;;  %v164_v5 = vld [vmem:[%s261_s3 + $0x10] sm:$0xff]  ;;  %v163_v6 = vld [vmem:[%s261_s3 + $0x8] sm:$0xff]  ;;  %vm99_vm1 = vcmask 523264  }
   0x4   :  { %v162_v7 = vld [vmem:[%s261_s3] sm:$0xff]  ;;  %s197_s9 = smov [#allocation2]   ;;  %s125_s12 = sshll.u32 %s263_s5, 4  ;;  %vm116_vm2 = vcmask 74752   ;;  %s126_s12 = int_to_ptr.hbm [resolvable:$true] %s125_s12 }
   0x5   :  { %v167_v8 = vld [vmem:[%s260_s2] ss:$0 sm:$0xff]  ;;  %s123_s10 = sshll.u32 %s197_s9, 4  ;;  %s124_s10 = int_to_ptr.vmem [resolvable:$true] %s123_s10 }
   0x6   :  { %55 = vmatpush.bf16.msra.mxu0 %v160_v1  ;;  %v168_v14 = vld [vmem:[%s262_s4] ss:$0 sm:$0xff] }
   0x7   :  { %108 = vmatpush.bf16.msra.mxu1 %v164_v5 }
   0x9   :  { %142 = vmatmul.msk.bf16.vlgmr.msra.gmra.mxu0 %vm44_vm0, %v23_v4 }
   0xb   :  { %109 = vmatpush.bf16.msra.mxu1 %v163_v6 }
   0xf   :  { %110 = vmatpush.bf16.msra.mxu1 %v162_v7 }
  0x86   :  { %v57_v9 = vpop.f32.mrf.mxu0 }
  0x87   :  { %v58_v10 = vadd.f32 %v167_v8, %v57_v9 }
  0x89   :  { %169 = vtanh.f32 %v58_v10 }
  0x8e   :  { %v59_v11 = vpop.f32.mrf.mxu0 }
  0x8f   :  { %v170_v12 = vpop.eup %169 }
  0x90   :  { %v62_v13 = vpack.c.bf16 %v170_v12, %v170_v12 }
  0x92   :  { %159 = vmatmul.msk.bf16.vlgmr.msra.gmra.mxu1 %vm99_vm1, %v62_v13 }
 0x10f   :  { %v112_v15 = vpop.f32.mrf.mxu1 }
 0x110   :  { %v113_v16 = vadd.f32 %v168_v14, %v112_v15 }
 0x112   :  { %117 = vst.msk [vmem:[#allocation2] sm:$0x3] %vm116_vm2, %v113_v16 }
 0x113   :  { %128 = dma.vmem_to_hbm [thread:$0]  %s124_s10, 32, %s126_s12, [#allocation3]  }
 0x117   :  { %v114_v17 = vpop.f32.mrf.mxu1 }
 0x118   :  { %195 = dma.done.wait [#allocation3], 32  }
 0x119   :  { %196 = vsyncadd [#allocation3], 4294967264 }
 0x11a   :  { %133 = vsyncpa [#allocation3], 1 }

// kernel: vit_forward.3
= control target key start
LH: loop header
LB: loop body
LE: loop exit
PB: predicated region body
PF: predicated region fallthrough
CT: control target
= control target key end

     0   :  { %vm55_vm0 = vcmask 392192   ;;  %vm95_vm1 = vcmask 253952   ;;  %vm98_vm2 = vcmask 260096   ;;  %v127_v12 = vmov 0.0   ;;  %s218_s1 = inlined_call_operand.vmem [shape: bf16[48,32], index: 1, kind: input, shape index: {}]   ;;  %s219_s2 = inlined_call_operand.vmem [shape: f32[1,32], index: 2, kind: input, shape index: {}]   ;;  %s220_s0 = inlined_call_operand.vmem [shape: f32[2,16,48], index: 0, kind: input, shape index: {}]   ;;  %s221_s3 = inlined_call_operand.vmem [shape: f32[1,32], index: 3, kind: input, shape index: {}]   ;;  %s222_s4 = inlined_call_operand.vmem [shape: f32[24,32], index: 4, kind: input, shape index: {}]   ;;  %s223_s5 = inlined_call_operand.vmem [shape: f32[2,24,32], index: 5, kind: output, shape index: {}]  }
   0x1   :  { %v121_v0 = vld [vmem:[%s218_s1 + $0x10] sm:$0xff]  ;;  %v120_v1 = vld [vmem:[%s218_s1 + $0x8] sm:$0xff]  ;;  %v119_v2 = vld [vmem:[%s218_s1] sm:$0xff]  ;;  %99 = vst.msk [vmem:[%s223_s5 + $0x11] sm:$0x7f] %vm98_vm2, %v127_v12  ;;  %vm87_vm3 = vcmask 261120  }
   0x2   :  { %67 = vmatpush.bf16.msra.mxu0 %v121_v0  ;;  %122 = vmatpush.bf16.msra.mxu1 %v121_v0  ;;  %v21_v3 = vld [vmem:[%s220_s0] sm:$0xff]  ;;  %v22_v4 = vld [vmem:[%s220_s0 + $0x8] sm:$0xff]  ;;  %v23_v5 = vld [vmem:[%s220_s0 + $0x10] sm:$0xff]  ;;  %100 = vst.msk [vmem:[%s223_s5 + $0x29] sm:$0x7f] %vm98_vm2, %v127_v12 }
   0x3   :  { %v24_v6 = vld [vmem:[%s220_s0 + $0x18] sm:$0xff]  ;;  %v25_v7 = vpack.c.bf16 %v22_v4, %v21_v3  ;;  %v92_v9 = vld [vmem:[%s221_s3] sm:$0x1]  ;;  %v93_v10 = vld [vmem:[%s222_s4 + $0x10] sm:$0x1] }
   0x4   :  { %v26_v8 = vpack.c.bf16 %v24_v6, %v23_v5  ;;  %v94_v11 = vadd.f32 %v93_v10, %v92_v9  ;;  %v126_v13 = vld [vmem:[%s219_s2] ss:$0 sm:$0xff]  ;;  %v82_v22 = vld [vmem:[%s222_s4 + $0x8] sm:$0xff] }
   0x5   :  { %v81_v15 = vld [vmem:[%s222_s4] sm:$0xff] }
   0x6   :  { %68 = vmatpush.bf16.msra.mxu0 %v120_v1  ;;  %123 = vmatpush.bf16.msra.mxu1 %v120_v1  ;;  %96 = vst.msk [vmem:[%s223_s5 + $0x10] sm:$0x1] %vm95_vm1, %v94_v11 }
   0x7   :  { %97 = vst.msk [vmem:[%s223_s5 + $0x28] sm:$0x1] %vm95_vm1, %v94_v11 }
   0xa   :  { %69 = vmatpush.bf16.msra.mxu0 %v119_v2  ;;  %124 = vmatpush.bf16.msra.mxu1 %v119_v2 }
   0xd   :  { %117 = vmatmul.msk.bf16.vlgmr.msra.gmra.mxu0 %vm55_vm0, %v25_v7  ;;  %118 = vmatmul.msk.bf16.vlgmr.msra.gmra.mxu1 %vm55_vm0, %v26_v8 }
  0x8a   :  { %v71_v14 = vpop.f32.mrf.mxu0  ;;  %v76_v16 = vpop.f32.mrf.mxu1 }
  0x8b   :  { %v72_v17 = vadd.f32 %v126_v13, %v71_v14  ;;  %v77_v18 = vadd.f32 %v126_v13, %v76_v16 }
  0x8d   :  { %v83_v19 = vadd.f32 %v81_v15, %v72_v17  ;;  %v85_v20 = vadd.f32 %v81_v15, %v77_v18 }
  0x8f   :  { %88 = vst.msk [vmem:[%s223_s5] sm:$0xff] %vm87_vm3, %v83_v19 }
  0x90   :  { %90 = vst.msk [vmem:[%s223_s5 + $0x18] sm:$0xff] %vm87_vm3, %v85_v20 }
  0x92   :  { %v73_v21 = vpop.f32.mrf.mxu0  ;;  %v78_v23 = vpop.f32.mrf.mxu1 }
  0x93   :  { %v74_v24 = vadd.f32 %v126_v13, %v73_v21  ;;  %v79_v25 = vadd.f32 %v126_v13, %v78_v23 }
  0x95   :  { %v84_v26 = vadd.f32 %v82_v22, %v74_v24  ;;  %v86_v27 = vadd.f32 %v82_v22, %v79_v25 }
  0x97   :  { %89 = vst.msk [vmem:[%s223_s5 + $0x8] sm:$0xff] %vm87_vm3, %v84_v26 }
  0x98   :  { %91 = vst.msk [vmem:[%s223_s5 + $0x20] sm:$0xff] %vm87_vm3, %v86_v27 }

// kernel: vit_forward.4
= control target key start
LH: loop header
LB: loop body
LE: loop exit
PB: predicated region body
PF: predicated region fallthrough
CT: control target
= control target key end

     0   :  { %s3219_s29 = smov 0   ;;  %s3221_s30 = smov 0   ;;  %s4118_s0 = inlined_call_operand.vmem [shape: f32[1,24], index: 0, kind: input, shape index: {}]   ;;  %s4119_s1 = inlined_call_operand.vmem [shape: f32[2,24,32], index: 1, kind: input, shape index: {}]   ;;  %s4120_s2 = inlined_call_operand.vmem [shape: bf16[2,32,96], index: 2, kind: input, shape index: {}]   ;;  %s4121_s3 = inlined_call_operand.vmem [shape: f32[2,1,96], index: 3, kind: input, shape index: {}]   ;;  %s4122_s4 = inlined_call_operand.vmem [shape: bf16[2,32,32], index: 4, kind: input, shape index: {}]   ;;  %s4123_s5 = inlined_call_operand.vmem [shape: f32[2,1,32], index: 5, kind: input, shape index: {}]   ;;  %s4124_s6 = inlined_call_operand.vmem [shape: f32[2,1,32], index: 6, kind: input, shape index: {}]   ;;  %s4125_s7 = inlined_call_operand.vmem [shape: f32[2,1,32], index: 7, kind: input, shape index: {}]   ;;  %s4126_s8 = inlined_call_operand.vmem [shape: bf16[2,32,64], index: 8, kind: input, shape index: {}]   ;;  %s4127_s9 = inlined_call_operand.vmem [shape: f32[2,1,64], index: 9, kind: input, shape index: {}]   ;;  %s4128_s10 = inlined_call_operand.vmem [shape: bf16[2,64,32], index: 10, kind: input, shape index: {}]   ;;  %s4129_s11 = inlined_call_operand.vmem [shape: f32[2,1,32], index: 11, kind: input, shape index: {}]   ;;  %s4130_s12 = inlined_call_operand.vmem [shape: f32[2,1,32], index: 12, kind: input, shape index: {}]   ;;  %s4131_s13 = inlined_call_operand.vmem [shape: f32[2,1,32], index: 13, kind: input, shape index: {}]   ;;  %s4132_s14 = inlined_call_operand.vmem [shape: f32[2,32], index: 14, kind: output, shape index: {}]  }
   0x1   :  { %4136 = sst [smem:[#allocation7_spill]] %s4118_s0  ;;  %s3223_s15 = smov 0  }
   0x2   :  { %4137 = sst [smem:[#allocation8_spill]] %s4119_s1 }
   0x3   :  { %4138 = sst [smem:[#allocation9_spill]] %s4120_s2 }
   0x4   :  { %4139 = sst [smem:[#allocation10_spill]] %s4122_s4 }
   0x5   :  { %4140 = sst [smem:[#allocation11_spill]] %s4132_s14 }
   0x6 LB: > { %4141 = sst [smem:[#allocation4_spill]] %s3122_s30  ;;  %s33_s16 = sadd.s32 1, %s3122_s30  ;;  %s3126_s15 = sphi %s3223_s15, %s24_s15   ;;  %s3122_s30 = sphi %s3221_s30, %s4156_s30   ;;  %s3118_s29 = sphi %s3219_s29, %s4155_s29  }
   0x7   : > { %4142 = sst [smem:[#allocation5_spill]] %s3126_s15  ;;  %p2790_p0 = scmp.ge.s32.totalorder %s3126_s15, 1 }
   0x8   : > { %p34_p1 = scmp.ge.s32.totalorder %s33_s16, 2  ;;  %p530_p2 = scmp.lt.s32.totalorder %s3126_s15, 3 }
   0xa   : > { %s4158_s16 = smov (%p34_p1, %s33_s16), 0  ;;  %p531_p3 = pnand %p2790_p0, %p530_p2 }
   0xb   : > { %4143 = sst [smem:[#allocation6_spill]] %s4158_s16  ;;  %p627_p4 = scmp.lt.s32.totalorder (!%p531_p3), %s3118_s29, 1 }
   0xc   : > { %534 = sbr.rel (%p531_p3) target bundleno = 2257 (0x8d1), region = 76  ;;  %s4144_s2 = sld [smem:[#allocation9_spill]] (!%p531_p3) }
   0xd   : > { %s4145_s4 = sld [smem:[#allocation10_spill]] (!%p531_p3)  ;;  %p2799_p5 = scmp.ne.s32.totalorder (!%p531_p3), %s3118_s29, 0 }
  0x11   : > { %s3237_s17 = scalar_select %p627_p4, %s3118_s29, 1 }
  0x13   : > { %s2887_s18 = sshll.u32 %s3237_s17, 4  ;;  %s664_s1 = scalar_lea.vmem %s4129_s11, %s3237_s17 }
  0x14   : > { %s631_s24 = scalar_lea.vmem %s4144_s2, %s2887_s18  ;;  %s3250_s27 = scalar_lea.vmem %s4145_s4, %s2887_s18 }
  0x15   : > { %s3267_s23 = scalar_lea.vmem %s4126_s8, %s2887_s18  ;;  %s2890_s4 = sshll.u32 %s3237_s17, 5 }
  0x16   : > { %s3277_s30 = scalar_lea.vmem %s4128_s10, %s2890_s4  ;;  %s667_s21 = scalar_lea.vmem %s4130_s12, %s3237_s17 }
  0x17   : > { %s670_s0 = scalar_lea.vmem %s4131_s13, %s3237_s17  ;;  %679 = sbr.rel (%p2799_p5) target bundleno = 37 (0x25), region = 80 }
  0x18   : > { %s4146_s2 = sld [smem:[#allocation8_spill]] (!%p2799_p5) }
  0x1c   : > { %vm686_vm0 = vcmask 261120  }
  0x1e   : > { %v680_v0 = vld [vmem:[%s4146_s2] sm:$0xff]  ;;  %v681_v1 = vld [vmem:[%s4146_s2 + $0x8] sm:$0xff]  ;;  %v682_v2 = vld [vmem:[%s4146_s2 + $0x10] sm:$0xff] }
  0x1f   : > { %687 = vst.msk [vmem:[#allocation2] sm:$0xff] %vm686_vm0, %v680_v0  ;;  %v683_v3 = vld [vmem:[%s4146_s2 + $0x18] sm:$0xff]  ;;  %v684_v4 = vld [vmem:[%s4146_s2 + $0x20] sm:$0xff]  ;;  %v685_v5 = vld [vmem:[%s4146_s2 + $0x28] sm:$0xff] }
  0x20   : > { %688 = vst.msk [vmem:[#allocation2 + $0x8] sm:$0xff] %vm686_vm0, %v681_v1 }
  0x21   : > { %689 = vst.msk [vmem:[#allocation2 + $0x10] sm:$0xff] %vm686_vm0, %v682_v2 }
  0x22   : > { %690 = vst.msk [vmem:[#allocation2 + $0x18] sm:$0xff] %vm686_vm0, %v683_v3 }
  0x23   : > { %691 = vst.msk [vmem:[#allocation2 + $0x20] sm:$0xff] %vm686_vm0, %v684_v4 }
  0x24   : > { %692 = vst.msk [vmem:[#allocation2 + $0x28] sm:$0xff] %vm686_vm0, %v685_v5 }
  0x25 PF: > { %v2892_v6 = vld [vmem:[%s631_s24 + $0x8] sm:$0xff]  ;;  %v2891_v7 = vld [vmem:[%s631_s24] sm:$0xff]  ;;  %vm722_vm1 = vcmask 261120   ;;  %s4147_s26 = scalar_lea.vmem %s4121_s3, %s3237_s17  ;;  %s3128_s4 = smov 96   ;;  %vm775_vm2 = vcmask 64512   ;;  %vm955_vm3 = vcmask 1043456  }
  0x26   : > { %738 = vmatpush.bf16.msra.mxu0 %v2892_v6  ;;  %v693_v8 = vld [vmem:[#allocation2] sm:$0xff]  ;;  %s3129_s16 = smov 88   ;;  %s3130_s28 = smov 120   ;;  %vm863_vm4 = vcmask 195584   ;;  %vm1287_vm5 = vcmask 130112   ;;  %vm1558_vm6 = vcmask 195712  }
  0x27   : > { %v694_v9 = vld [vmem:[#allocation2 + $0x8] sm:$0xff]  ;;  %v2943_v18 = vld [vmem:[%s4147_s26] ss:$0 sm:$0xff]  ;;  %s3131_s14 = smov 80   ;;  %s3132_s20 = smov 112   ;;  %vm1829_vm7 = vcmask 261312  }
  0x28   : > { %v699_v10 = vpack.c.bf16 %v694_v9, %v693_v8  ;;  %v695_v11 = vld [vmem:[#allocation2 + $0x10] sm:$0xff]  ;;  %s3133_s15 = smov 72   ;;  %s3134_s29 = smov 104  }
  0x29   : > { %v696_v12 = vld [vmem:[#allocation2 + $0x18] sm:$0xff]  ;;  %s3135_s19 = smov 56   ;;  %s3136_s18 = smov 64  }
  0x2a   : > { %739 = vmatpush.bf16.msra.mxu0 %v2891_v7  ;;  %v700_v13 = vpack.c.bf16 %v696_v12, %v695_v11  ;;  %v697_v14 = vld [vmem:[#allocation2 + $0x20] sm:$0xff]  ;;  %s4148_s25 = sld [smem:[#allocation7_spill]]  ;;  %s3137_s26 = smov 48  }
  0x2b   : > { %v698_v15 = vld [vmem:[#allocation2 + $0x28] sm:$0xff]  ;;  %s4151_s24 = scalar_lea.vmem %s4125_s7, %s3237_s17 }
  0x2c   : > { %v701_v16 = vpack.c.bf16 %v698_v15, %v697_v14 }
  0x2d   : > { %2808 = vmatmul.msk.bf16.vlgmr.msra.gmra.mxu0 %vm722_vm1, %v699_v10 }
  0x3d   : > { %2809 = vmatmul.msk.bf16.gmra.mxu0 %vm722_vm1, %v700_v13 }
  0x4d   : > { %2810 = vmatmul.msk.bf16.gmra.mxu0 %vm722_vm1, %v701_v16 }
  0xaa   : > { %v741_v17 = vpop.f32.mrf.mxu0 }
  0xab   : > { %v742_v19 = vadd.f32 %v2943_v18, %v741_v17 }
  0xad   : > { %v757_v21 = vpack.c.bf16 %v742_v19, %v742_v19 }
  0xaf   : > { %v766_v24 = vunpack.c.l.b16 %v757_v21 }
  0xb2   : > { %v743_v20 = vpop.f32.mrf.mxu0 }
  0xb3   : > { %v744_v22 = vadd.f32 %v2943_v18, %v743_v20 }
  0xb5   : > { %v758_v23 = vpack.c.bf16 %v744_v22, %v744_v22 }
  0xb7   : > { %v767_v25 = vunpack.c.l.b16 %v758_v23 }
  0xb9   : > { %v3317_v26 = vpack.c.b16 %v767_v25, %v766_v24 }
  0xba   : > { %v746_v27 = vpop.f32.mrf.mxu0 }
  0xbb   : > { %v747_v28 = vadd.f32 %v2943_v18, %v746_v27  ;;  %771 = vrot.lane.b32.xlu0 %v3317_v26, %s3128_s4 }
  0xbd   : > { %v759_v29 = vpack.c.bf16 %v747_v28, %v747_v28 }
  0xbf   : > { %v768_v30 = vunpack.c.l.b16 %v759_v29 }
  0xc1   : > { %v3321_v31 = vpack.c.b16 %v768_v30, %v768_v30 }
  0xc2   : > { %v748_v32 = vpop.f32.mrf.mxu0 }
  0xc3   : > { %1029 = vrot.lane.b32.xlu2 %v3321_v31, %s3129_s16  ;;  %773 = vrot.lane.b32.xlu0 %v3321_v31, %s3128_s4  ;;  %v749_v33 = vadd.f32 %v2943_v18, %v748_v32 }
  0xc5   : > { %v760_v35 = vpack.c.bf16 %v749_v33, %v749_v33 }
  0xc7   : > { %v809_v38 = vunpack.c.l.b16 %v760_v35 }
  0xca   : > { %v751_v34 = vpop.f32.mrf.mxu0 }
  0xcb   : > { %v752_v36 = vadd.f32 %v2943_v18, %v751_v34  ;;  %1027 = vrot.lane.b32.xlu2 %v3317_v26, %s3129_s16  ;;  %1023 = vrot.lane.b32.xlu0 %v3317_v26, %s3130_s28 }
  0xcd   : > { %v761_v37 = vpack.c.bf16 %v752_v36, %v752_v36 }
  0xcf   : > { %v810_v39 = vunpack.c.l.b16 %v761_v37 }
  0xd1   : > { %v3331_v40 = vpack.c.b16 %v810_v39, %v809_v38  ;;  %v3425_v38 = vld [vmem:[%s4148_s25] ss:$0 sm:$0xff] }
  0xd2   : > { %v753_v41 = vpop.f32.mrf.mxu0 }
  0xd3   : > { %v754_v42 = vadd.f32 %v2943_v18, %v753_v41  ;;  %1065 = vrot.lane.b32.xlu2 %v3331_v40, %s3129_s16  ;;  %1025 = vrot.lane.b32.xlu0 %v3321_v31, %s3130_s28 }
  0xd5   : > { %v762_v43 = vpack.c.bf16 %v754_v42, %v754_v42 }
  0xd7   : > { %v811_v44 = vunpack.c.l.b16 %v762_v43 }
  0xd9   : > { %v3337_v45 = vpack.c.b16 %v811_v44, %v811_v44 }
  0xdb   : > { %816 = vrot.lane.b32.xlu1 %v3337_v45, %s3128_s4  ;;  %1300 = vrot.lane.b32.xlu2 %v3321_v31, %s3131_s14 }
  0xdc   : > { %1298 = vrot.lane.b32.xlu0 %v3317_v26, %s3131_s14 }
  0xe3   : > { %814 = vrot.lane.b32.xlu1 %v3331_v40, %s3128_s4  ;;  %1332 = vrot.lane.b32.xlu2 %v3331_v40, %s3132_s20  ;;  %s3138_s4 = smov 40  }
  0xe4   : > { %1294 = vrot.lane.b32.xlu0 %v3317_v26, %s3132_s20 }
  0xeb   : > { %1061 = vrot.lane.b32.xlu1 %v3331_v40, %s3130_s28  ;;  %1338 = vrot.lane.b32.xlu2 %v3337_v45, %s3131_s14 }
  0xec   : > { %1296 = vrot.lane.b32.xlu0 %v3321_v31, %s3132_s20 }
  0xf3   : > { %1336 = vrot.lane.b32.xlu1 %v3331_v40, %s3131_s14  ;;  %1569 = vrot.lane.b32.xlu2 %v3317_v26, %s3133_s15  ;;  %s3141_s14 = smov 24  }
  0xf4   : > { %1607 = vrot.lane.b32.xlu0 %v3331_v40, %s3133_s15 }
  0xfb   : > { %1067 = vrot.lane.b32.xlu1 %v3337_v45, %s3129_s16  ;;  %1565 = vrot.lane.b32.xlu2 %v3317_v26, %s3134_s29  ;;  %s3139_s16 = smov 8  }
  0xfc   : > { %1231 = vrot.lane.b32.xlu0 %v3331_v40, %s3135_s19 }
 0x103   : > { %1571 = vrot.lane.b32.xlu1 %v3321_v31, %s3133_s15  ;;  %1567 = vrot.lane.b32.xlu2 %v3321_v31, %s3134_s29 }
 0x104   : > { %1334 = vrot.lane.b32.xlu0 %v3337_v45, %s3132_s20 }
 0x10b   : > { %1063 = vrot.lane.b32.xlu1 %v3337_v45, %s3130_s28  ;;  %946 = vrot.lane.b32.xlu2 %v3321_v31, %s3136_s18  ;;  %s3140_s28 = smov 16  }
 0x10c   : > { %1605 = vrot.lane.b32.xlu0 %v3337_v45, %s3134_s29 }
 0x113   : > { %1603 = vrot.lane.b32.xlu1 %v3331_v40, %s3134_s29  ;;  %985 = vrot.lane.b32.xlu2 %v3331_v40, %s3136_s18 }
 0x114   : > { %987 = vrot.lane.b32.xlu0 %v3337_v45, %s3136_s18 }
 0x11b   : > { %944 = vrot.lane.b32.xlu1 %v3317_v26, %s3136_s18  ;;  %1233 = vrot.lane.b32.xlu2 %v3337_v45, %s3135_s19 }
 0x11d   : > { %v1030_v46 = vpop.permute.xlu2 %1029 }
 0x11e   : > { %v1041_v56 = vsel %vm775_vm2, %v1030_v46, 0 }
 0x123   : > { %1193 = vrot.lane.b32.xlu1 %v3321_v31, %s3135_s19 }
 0x125   : > { %v1028_v47 = vpop.permute.xlu2 %1027 }
 0x126   : > { %v1038_v59 = vsel %vm775_vm2, %v1028_v47, 0 }
 0x12b   : > { %1191 = vrot.lane.b32.xlu1 %v3317_v26, %s3135_s19  ;;  %s4150_s19 = scalar_lea.vmem %s4124_s6, %s3237_s17 }
 0x12d   : > { %v1066_v48 = vpop.permute.xlu2 %1065  ;;  %v772_v49 = vpop.permute.xlu0 %771 }
 0x12e   : > { %v783_v55 = vsel %vm775_vm2, %v772_v49, 0  ;;  %v1076_v18 = vsel %vm775_vm2, %v1066_v48, 0 }
 0x133   : > { %1609 = vrot.lane.b32.xlu1 %v3337_v45, %s3133_s15  ;;  %s4149_s15 = scalar_lea.vmem %s4123_s5, %s3237_s17 }
 0x135   : > { %v1301_v50 = vpop.permute.xlu2 %1300  ;;  %v774_v51 = vpop.permute.xlu0 %773 }
 0x136   : > { %v786_v52 = vsel %vm775_vm2, %v774_v51, 0  ;;  %v1312_v60 = vsel %vm775_vm2, %v1301_v50, 0 }
 0x137   : > { %794 = vmatpush.bf16.xpose.msra.mxu1 %v786_v52 }
 0x13d   : > { %v3374_v53 = vpop.permute.xlu2 %1332  ;;  %v1024_v54 = vpop.permute.xlu0 %1023 }
 0x13f   : > { %795 = vmatpush.bf16.xpose.msra.mxu1 %v783_v55 }
 0x145   : > { %v1339_v57 = vpop.permute.xlu2 %1338  ;;  %v1026_v58 = vpop.permute.xlu0 %1025 }
 0x146   : > { %2811 = vmatmul.msk.bf16.vlgmr.msra.gmra.mxu1 %vm775_vm2, %v3317_v26  ;;  %v1350_v19 = vsel %vm775_vm2, %v1339_v57, 0 }
 0x147   : > { %1049 = vmatpush.bf16.xpose.msrb.mxu1 %v1041_v56 }
 0x14d   : > { %v817_v61 = vpop.permute.xlu1 %816  ;;  %v1570_v62 = vpop.permute.xlu2 %1569 }
 0x14e   : > { %v1299_v63 = vpop.permute.xlu0 %1298  ;;  %v828_v0 = vsel %vm775_vm2, %v817_v61, 0  ;;  %v1580_v22 = vsel %vm775_vm2, %v1570_v62, 0 }
 0x14f   : > { %1050 = vmatpush.bf16.xpose.msrb.mxu1 %v1038_v59  ;;  %836 = vmatpush.bf16.xpose.msra.mxu2 %v828_v0  ;;  %v1309_v1 = vsel %vm775_vm2, %v1299_v63, 0 }
 0x155   : > { %v815_v2 = vpop.permute.xlu1 %814  ;;  %v1566_v3 = vpop.permute.xlu2 %1565 }
 0x156   : > { %v1295_v4 = vpop.permute.xlu0 %1294  ;;  %2812 = vmatmul.msk.bf16.gmra.mxu1 %vm775_vm2, %v3321_v31  ;;  %v825_v5 = vsel %vm775_vm2, %v815_v2, 0 }
 0x157   : > { %1320 = vmatpush.bf16.xpose.msra.mxu1 %v1312_v60  ;;  %837 = vmatpush.bf16.xpose.msra.mxu2 %v825_v5 }
 0x15d   : > { %v1062_v6 = vpop.permute.xlu1 %1061  ;;  %v1568_v7 = vpop.permute.xlu2 %1567 }
 0x15e   : > { %v1297_v8 = vpop.permute.xlu0 %1296  ;;  %2813 = vmatmul.msk.bf16.vlgmr.msra.gmra.mxu2 %vm775_vm2, %v3331_v40 }
 0x15f   : > { %1321 = vmatpush.bf16.xpose.msra.mxu1 %v1309_v1 }
 0x165   : > { %v1337_v9 = vpop.permute.xlu1 %1336  ;;  %v947_v10 = vpop.permute.xlu2 %946 }
 0x166   : > { %v1608_v11 = vpop.permute.xlu0 %1607  ;;  %2819 = vmatmul.msk.bf16.vlgmr.msrb.gmra.mxu1 %vm775_vm2, %v1024_v54  ;;  %v957_v12 = vsel %vm955_vm3, %v947_v10, 0  ;;  %v1347_v23 = vsel %vm775_vm2, %v1337_v9, 0 }
 0x167   : > { %965 = vmatpush.bf16.msra.mxu3 %v957_v12  ;;  %v1618_v37 = vsel %vm775_vm2, %v1608_v11, 0 }
 0x16d   : > { %v1068_v13 = vpop.permute.xlu1 %1067  ;;  %v986_v30 = vpop.permute.xlu2 %985 }
 0x16e   : > { %v3391_v14 = vpop.permute.xlu0 %1231  ;;  %2814 = vmatmul.msk.bf16.gmra.mxu2 %vm775_vm2, %v3337_v45  ;;  %v1079_v15 = vsel %vm775_vm2, %v1068_v13, 0 }
 0x16f   : > { %1087 = vmatpush.bf16.xpose.msrb.mxu2 %v1079_v15 }
 0x175   : > { %v1572_v16 = vpop.permute.xlu1 %1571 }
 0x176   : > { %v1583_v17 = vsel %vm775_vm2, %v1572_v16, 0  ;;  %2820 = vmatmul.msk.bf16.gmra.mxu1 %vm775_vm2, %v1026_v58  ;;  %v1335_v20 = vpop.permute.xlu0 %1334 }
 0x177   : > { %1088 = vmatpush.bf16.xpose.msrb.mxu2 %v1076_v18  ;;  %1591 = vmatpush.bf16.xpose.msrb.mxu1 %v1583_v17 }
 0x17d   : > { %v1064_v21 = vpop.permute.xlu1 %1063 }
 0x17e   : > { %2821 = vmatmul.msk.bf16.vlgmr.msrb.gmra.mxu2 %vm775_vm2, %v1062_v6  ;;  %v1606_v24 = vpop.permute.xlu0 %1605 }
 0x17f   : > { %1358 = vmatpush.bf16.xpose.msra.mxu2 %v1350_v19  ;;  %1592 = vmatpush.bf16.xpose.msrb.mxu1 %v1580_v22 }
 0x185   : > { %v1604_v25 = vpop.permute.xlu1 %1603 }
 0x186   : > { %2827 = vmatmul.msk.bf16.vlgmr.msra.gmra.mxu1 %vm775_vm2, %v1295_v4  ;;  %v988_v27 = vpop.permute.xlu0 %987 }
 0x187   : > { %1359 = vmatpush.bf16.xpose.msra.mxu2 %v1347_v23  ;;  %v997_v29 = vsel %vm955_vm3, %v988_v27, 0 }
 0x18d   : > { %v945_v28 = vpop.permute.xlu1 %944 }
 0x18e   : > { %966 = vmatpush.bf16.msra.mxu3 %v945_v28  ;;  %2822 = vmatmul.msk.bf16.gmra.mxu2 %vm775_vm2, %v1064_v21 }
 0x192   : > { %1005 = vmatpush.bf16.msrb.mxu3 %v997_v29 }
 0x195   : > { %v1194_v32 = vpop.permute.xlu1 %1193 }
 0x196   : > { %1006 = vmatpush.bf16.msrb.mxu3 %v986_v30  ;;  %2828 = vmatmul.msk.bf16.gmra.mxu1 %vm775_vm2, %v1297_v8  ;;  %v3408_v33 = vsel %vm955_vm3, %v1194_v32, 0 }
 0x197   : > { %1211 = vmatpush.bf16.msrb.mxu0 %v3408_v33 }
 0x19d   : > { %v3411_v34 = vpop.permute.xlu1 %1191 }
 0x19e   : > { %1212 = vmatpush.bf16.msrb.mxu0 %v3411_v34  ;;  %2829 = vmatmul.msk.bf16.vlgmr.msra.gmra.mxu2 %vm775_vm2, %v3374_v53 }
 0x1a5   : > { %v1610_v35 = vpop.permute.xlu1 %1609 }
 0x1a6   : > { %v1621_v36 = vsel %vm775_vm2, %v1610_v35, 0  ;;  %2835 = vmatmul.msk.bf16.vlgmr.msrb.gmra.mxu1 %vm775_vm2, %v1566_v3 }
 0x1a7   : > { %1629 = vmatpush.bf16.xpose.msrb.mxu2 %v1621_v36 }
 0x1ae   : > { %2830 = vmatmul.msk.bf16.gmra.mxu2 %vm775_vm2, %v1335_v20 }
 0x1af   : > { %1630 = vmatpush.bf16.xpose.msrb.mxu2 %v1618_v37 }
 0x1b6   : > { %2836 = vmatmul.msk.bf16.gmra.mxu1 %vm775_vm2, %v1568_v7 }
 0x1be   : > { %2837 = vmatmul.msk.bf16.vlgmr.msrb.gmra.mxu2 %vm775_vm2, %v1604_v25 }
 0x1c3   : > { %v797_v39 = vpop.f32.mrf.mxu1 }
 0x1c4   : > { %v848_v41 = vmul.f32 0.35355338, %v797_v39 }
 0x1c6   : > { %v3428_v42 = vadd.f32 %v3425_v38, %v848_v41 }
 0x1c8   : > { %v864_v43 = vsel %vm863_vm4, %v3428_v42, -inf }
 0x1c9   : > { %865 = vmax.xlane.f32.xlu1 %v864_v43 }
 0x1cb   : > { %v799_v44 = vpop.f32.mrf.mxu1 }
 0x1cc   : > { %v849_v46 = vmul.f32 0.35355338, %v799_v44 }
 0x1ce   : > { %2838 = vmatmul.msk.bf16.gmra.mxu2 %vm775_vm2, %v1606_v24  ;;  %v3434_v47 = vadd.f32 %v3425_v38, %v849_v46 }
 0x1d0   : > { %v867_v48 = vsel %vm863_vm4, %v3434_v47, -inf }
 0x1d1   : > { %868 = vmax.xlane.f32.xlu2 %v867_v48 }
 0x1d3   : > { %v802_v49 = vpop.f32.mrf.mxu1 }
 0x1d4   : > { %v850_v50 = vmul.f32 0.35355338, %v802_v49 }
 0x1d6   : > { %v3439_v51 = vadd.f32 %v3425_v38, %v850_v50 }
 0x1d8   : > { %v870_v52 = vsel %vm863_vm4, %v3439_v51, -inf }
 0x1d9   : > { %871 = vmax.xlane.f32.xlu0 %v870_v52 }
 0x1db   : > { %v804_v53 = vpop.f32.mrf.mxu1 }
 0x1e1   : > { %v839_v54 = vpop.f32.mrf.mxu2 }
 0x1e2   : > { %v851_v55 = vmul.f32 0.35355338, %v839_v54 }
 0x1e3   : > { %v1052_v56 = vpop.f32.mrf.mxu1 }
 0x1e4   : > { %v1099_v57 = vmul.f32 0.35355338, %v1052_v56  ;;  %v3444_v58 = vadd.f32 %v3425_v38, %v851_v55 }
 0x1e6   : > { %v873_v59 = vsel %vm863_vm4, %v3444_v58, -inf  ;;  %v3449_v60 = vadd.f32 %v3425_v38, %v1099_v57 }
 0x1e7   : > { %874 = vmax.xlane.f32.xlu2 %v873_v59 }
 0x1e8   : > { %v1111_v61 = vsel %vm863_vm4, %v3449_v60, -inf }
 0x1e9   : > { %v841_v62 = vpop.f32.mrf.mxu2  ;;  %1112 = vmax.xlane.f32.xlu0 %v1111_v61 }
 0x1ea   : > { %v852_v63 = vmul.f32 0.35355338, %v841_v62 }
 0x1eb   : > { %v1054_v0 = vpop.f32.mrf.mxu1 }
 0x1ec   : > { %v1100_v1 = vmul.f32 0.35355338, %v1054_v0  ;;  %v3454_v2 = vadd.f32 %v3425_v38, %v852_v63 }
 0x1ee   : > { %v876_v3 = vsel %vm863_vm4, %v3454_v2, -inf  ;;  %v3459_v4 = vadd.f32 %v3425_v38, %v1100_v1 }
 0x1ef   : > { %877 = vmax.xlane.f32.xlu1 %v876_v3 }
 0x1f0   : > { %v1114_v5 = vsel %vm863_vm4, %v3459_v4, -inf }
 0x1f1   : > { %v844_v6 = vpop.f32.mrf.mxu2  ;;  %1115 = vmax.xlane.f32.xlu2 %v1114_v5 }
 0x1f2   : > { %v853_v7 = vmul.f32 0.35355338, %v844_v6 }
 0x1f3   : > { %v1057_v8 = vpop.f32.mrf.mxu1 }
 0x1f4   : > { %v1101_v9 = vmul.f32 0.35355338, %v1057_v8  ;;  %v3464_v10 = vadd.f32 %v3425_v38, %v853_v7 }
 0x1f6   : > { %v3467_v11 = vadd.f32 %v3425_v38, %v1101_v9  ;;  %v879_v12 = vsel %vm863_vm4, %v3464_v10, -inf }
 0x1f8   : > { %v1117_v13 = vsel %vm863_vm4, %v3467_v11, -inf }
 0x1f9   : > { %v846_v15 = vpop.f32.mrf.mxu2  ;;  %880 = vmax.xlane.f32.xlu2 %v879_v12  ;;  %1118 = vmax.xlane.f32.xlu0 %v1117_v13 }
 0x1fb   : > { %v1059_v16 = vpop.f32.mrf.mxu1 }
 0x201   : > { %v1090_v17 = vpop.f32.mrf.mxu2 }
 0x202   : > { %v1102_v18 = vmul.f32 0.35355338, %v1090_v17 }
 0x203   : > { %v1323_v19 = vpop.f32.mrf.mxu1 }
 0x204   : > { %v1370_v20 = vmul.f32 0.35355338, %v1323_v19  ;;  %v3474_v21 = vadd.f32 %v3425_v38, %v1102_v18 }
 0x206   : > { %v1120_v22 = vsel %vm863_vm4, %v3474_v21, -inf  ;;  %v3479_v23 = vadd.f32 %v3425_v38, %v1370_v20 }
 0x207   : > { %1121 = vmax.xlane.f32.xlu0 %v1120_v22 }
 0x208   : > { %v1382_v24 = vsel %vm863_vm4, %v3479_v23, -inf }
 0x209   : > { %v1092_v25 = vpop.f32.mrf.mxu2  ;;  %1383 = vmax.xlane.f32.xlu2 %v1382_v24  ;;  %v3533_v24 = vpop.permute.xlu2 %1233 }
 0x20a   : > { %v1103_v27 = vmul.f32 0.35355338, %v1092_v25 }
 0x20b   : > { %v1325_v28 = vpop.f32.mrf.mxu1 }
 0x20c   : > { %v3484_v29 = vadd.f32 %v3425_v38, %v1103_v27  ;;  %v1371_v30 = vmul.f32 0.35355338, %v1325_v28 }
 0x20e   : > { %v1123_v32 = vsel %vm863_vm4, %v3484_v29, -inf  ;;  %v3489_v37 = vadd.f32 %v3425_v38, %v1371_v30 }
 0x20f   : > { %1124 = vmax.xlane.f32.xlu1 %v1123_v32 }
 0x210   : > { %v1385_v46 = vsel %vm863_vm4, %v3489_v37, -inf }
 0x211   : > { %v1095_v35 = vpop.f32.mrf.mxu2 }
 0x212   : > { %v1104_v36 = vmul.f32 0.35355338, %v1095_v35 }
 0x213   : > { %v1328_v39 = vpop.f32.mrf.mxu1 }
 0x214   : > { %v3492_v41 = vadd.f32 %v3425_v38, %v1104_v36  ;;  %v1372_v43 = vmul.f32 0.35355338, %v1328_v39 }
 0x216   : > { %v1126_v44 = vsel %vm863_vm4, %v3492_v41, -inf  ;;  %v3499_v49 = vadd.f32 %v3425_v38, %v1372_v43 }
 0x217   : > { %1127 = vmax.xlane.f32.xlu0 %v1126_v44  ;;  %1386 = vmax.xlane.f32.xlu1 %v1385_v46 }
 0x218   : > { %v1388_v52 = vsel %vm863_vm4, %v3499_v49, -inf }
 0x219   : > { %v1097_v48 = vpop.f32.mrf.mxu2 }
 0x21b   : > { %v1330_v50 = vpop.f32.mrf.mxu1 }
 0x21f   : > { %1389 = vmax.xlane.f32.xlu1 %v1388_v52 }
 0x221   : > { %v1361_v53 = vpop.f32.mrf.mxu2 }
 0x222   : > { %v1373_v54 = vmul.f32 0.35355338, %v1361_v53 }
 0x223   : > { %v1594_v55 = vpop.f32.mrf.mxu1 }
 0x224   : > { %v1641_v56 = vmul.f32 0.35355338, %v1594_v55  ;;  %v3504_v57 = vadd.f32 %v3425_v38, %v1373_v54 }
 0x226   : > { %v1391_v59 = vsel %vm863_vm4, %v3504_v57, -inf  ;;  %v3509_v61 = vadd.f32 %v3425_v38, %v1641_v56 }
 0x227   : > { %1392 = vmax.xlane.f32.xlu1 %v1391_v59 }
 0x228   : > { %v1653_v62 = vsel %vm863_vm4, %v3509_v61, -inf }
 0x229   : > { %v1363_v63 = vpop.f32.mrf.mxu2  ;;  %1654 = vmax.xlane.f32.xlu0 %v1653_v62 }
 0x22a   : > { %v1374_v0 = vmul.f32 0.35355338, %v1363_v63 }
 0x22b   : > { %v1596_v1 = vpop.f32.mrf.mxu1 }
 0x22c   : > { %v1642_v3 = vmul.f32 0.35355338, %v1596_v1  ;;  %v3514_v5 = vadd.f32 %v3425_v38, %v1374_v0 }
 0x22e   : > { %v1394_v6 = vsel %vm863_vm4, %v3514_v5, -inf  ;;  %v3519_v7 = vadd.f32 %v3425_v38, %v1642_v3 }
 0x22f   : > { %1395 = vmax.xlane.f32.xlu2 %v1394_v6 }
 0x230   : > { %v1656_v8 = vsel %vm863_vm4, %v3519_v7, -inf }
 0x231   : > { %1657 = vmax.xlane.f32.xlu0 %v1656_v8  ;;  %v1366_v9 = vpop.f32.mrf.mxu2 }
 0x232   : > { %v1375_v12 = vmul.f32 0.35355338, %v1366_v9 }
 0x233   : > { %v1599_v13 = vpop.f32.mrf.mxu1 }
 0x234   : > { %v1643_v15 = vmul.f32 0.35355338, %v1599_v13  ;;  %v3524_v16 = vadd.f32 %v3425_v38, %v1375_v12 }
 0x236   : > { %v3527_v17 = vadd.f32 %v3425_v38, %v1643_v15  ;;  %v1397_v19 = vsel %vm863_vm4, %v3524_v16, -inf }
 0x238   : > { %v1659_v18 = vsel %vm863_vm4, %v3527_v17, -inf }
 0x239   : > { %1660 = vmax.xlane.f32.xlu1 %v1659_v18  ;;  %1398 = vmax.xlane.f32.xlu0 %v1397_v19  ;;  %v1368_v20 = vpop.f32.mrf.mxu2 }
 0x23b   : > { %v1601_v22 = vpop.f32.mrf.mxu1 }
 0x23c   : > { %v866_v25 = vpop.xlane.xlu1 %865 }
 0x23d   : > { %v882_v27 = vsub.f32 %v3428_v42, %v866_v25 }
 0x23f   : > { %v888_v28 = vmul.f32 1.442695, %v882_v27 }
 0x241   : > { %v1632_v30 = vpop.f32.mrf.mxu2  ;;  %2952 = vpow2.f32 %v888_v28 }
 0x242   : > { %v1644_v32 = vmul.f32 0.35355338, %v1632_v30 }
 0x244   : > { %v869_v35 = vpop.xlane.xlu2 %868  ;;  %v3537_v36 = vadd.f32 %v3425_v38, %v1644_v32 }
 0x245   : > { %v883_v39 = vsub.f32 %v3434_v47, %v869_v35 }
 0x246   : > { %v1662_v43 = vsel %vm863_vm4, %v3537_v36, -inf }
 0x247   : > { %v890_v44 = vmul.f32 1.442695, %v883_v39  ;;  %1462 = vrot.lane.b32.xlu2 %v3317_v26, %s3137_s26  ;;  %1663 = vmax.xlane.f32.xlu0 %v1662_v43  ;;  %v3544_v46 = vpop.eup %2952 }
 0x248   : > { %v900_v50 = vsel %vm863_vm4, %v3544_v46, 0.0 }
 0x249   : > { %2954 = vpow2.f32 %v890_v44  ;;  %v1634_v42 = vpop.f32.mrf.mxu2 }
 0x24a   : > { %v1645_v48 = vmul.f32 0.35355338, %v1634_v42 }
 0x24c   : > { %v3553_v54 = vadd.f32 %v3425_v38, %v1645_v48  ;;  %v872_v6 = vpop.xlane.xlu0 %871 }
 0x24d   : > { %v884_v15 = vsub.f32 %v3439_v51, %v872_v6 }
 0x24e   : > { %v1665_v55 = vsel %vm863_vm4, %v3553_v54, -inf }
 0x24f   : > { %v3548_v52 = vpop.eup %2954  ;;  %901 = vadd.xlane.f32.xlu0 %v900_v50  ;;  %v892_v20 = vmul.f32 1.442695, %v884_v15 }
 0x250   : > { %v903_v47 = vsel %vm863_vm4, %v3548_v52, 0.0 }
 0x251   : > { %904 = vadd.xlane.f32.xlu1 %v903_v47  ;;  %v1637_v53 = vpop.f32.mrf.mxu2 }
 0x252   : > { %v1646_v27 = vmul.f32 0.35355338, %v1637_v53 }
 0x254   : > { %v3575_v51 = vadd.f32 %v3425_v38, %v1646_v27 }
 0x257   : > { %1666 = vmax.xlane.f32.xlu0 %v1665_v55 }
 0x259   : > { %v1639_v56 = vpop.f32.mrf.mxu2 }
 0x25a   : > { %v875_v59 = vpop.xlane.xlu2 %874 }
 0x25b   : > { %v885_v28 = vsub.f32 %v3444_v58, %v875_v59 }
 0x25c   : > { %v1113_v9 = vpop.xlane.xlu0 %1112 }
 0x25d   : > { %v894_v35 = vmul.f32 1.442695, %v885_v28  ;;  %v1129_v44 = vsub.f32 %v3449_v60, %v1113_v9 }
 0x25f   : > { %v1135_v50 = vmul.f32 1.442695, %v1129_v44 }
 0x264   : > { %v1116_v62 = vpop.xlane.xlu2 %1115 }
 0x265   : > { %v1130_v63 = vsub.f32 %v3459_v4, %v1116_v62 }
 0x267   : > { %v1137_v0 = vmul.f32 1.442695, %v1130_v63 }
 0x269   : > { %2956 = vpow2.f32 %v1137_v0 }
 0x26a   : > { %1464 = vrot.lane.b32.xlu1 %v3321_v31, %s3137_s26 }
 0x26b   : > { %1504 = vrot.lane.b32.xlu0 %v3337_v45, %s3137_s26 }
 0x26c   : > { %v881_v8 = vpop.xlane.xlu2 %880  ;;  %v1119_v18 = vpop.xlane.xlu0 %1118 }
 0x26d   : > { %v887_v25 = vsub.f32 %v3464_v10, %v881_v8  ;;  %v1131_v43 = vsub.f32 %v3467_v11, %v1119_v18  ;;  %v1668_v10 = vsel %vm863_vm4, %v3575_v51, -inf }
 0x26f   : > { %v3562_v1 = vpop.eup %2956  ;;  %v898_v32 = vmul.f32 1.442695, %v887_v25  ;;  %v1139_v38 = vmul.f32 1.442695, %v1131_v43 }
 0x270   : > { %v1150_v3 = vsel %vm863_vm4, %v3562_v1, 0.0 }
 0x271   : > { %1151 = vadd.xlane.f32.xlu2 %v1150_v3 }
 0x27a   : > { %v1122_v30 = vpop.xlane.xlu0 %1121 }
 0x27b   : > { %v1132_v60 = vsub.f32 %v3474_v21, %v1122_v30 }
 0x27c   : > { %v1384_v12 = vpop.xlane.xlu2 %1383 }
 0x27d   : > { %v1400_v4 = vsub.f32 %v3479_v23, %v1384_v12  ;;  %v878_v23 = vpop.xlane.xlu1 %877  ;;  %v1141_v62 = vmul.f32 1.442695, %v1132_v60 }
 0x27e   : > { %v886_v53 = vsub.f32 %v3454_v2, %v878_v23 }
 0x27f   : > { %v1406_v13 = vmul.f32 1.442695, %v1400_v4 }
 0x280   : > { %v896_v63 = vmul.f32 1.442695, %v886_v53 }
 0x281   : > { %2958 = vpow2.f32 %v1406_v13 }
 0x282   : > { %2960 = vpow2.f32 %v892_v20 }
 0x283   : > { %2962 = vpow2.f32 %v898_v32 }
 0x284   : > { %2964 = vpow2.f32 %v894_v35 }
 0x285   : > { %v3587_v48 = vpop.xlane.xlu1 %1124  ;;  %2966 = vpow2.f32 %v1139_v38 }
 0x286   : > { %2968 = vpow2.f32 %v1135_v50 }
 0x287   : > { %v3568_v19 = vpop.eup %2958  ;;  %2970 = vpow2.f32 %v1141_v62 }
 0x288   : > { %v1418_v22 = vsel %vm863_vm4, %v3568_v19, 0.0  ;;  %v3577_v39 = vpop.eup %2960  ;;  %2972 = vpow2.f32 %v896_v63 }
 0x289   : > { %1419 = vadd.xlane.f32.xlu2 %v1418_v22  ;;  %v906_v58 = vsel %vm863_vm4, %v3577_v39, 0.0  ;;  %v3589_v47 = vpop.eup %2962 }
 0x28a   : > { %v3583_v42 = vpop.xlane.xlu0 %1127  ;;  %v3591_v11 = vpop.eup %2964  ;;  %v915_v55 = vsel %vm863_vm4, %v3589_v47, 0.0 }
 0x28b   : > { %v909_v59 = vsel %vm863_vm4, %v3591_v11, 0.0  ;;  %v3599_v3 = vpop.eup %2966 }
 0x28c   : > { %v3601_v6 = vpop.eup %2968  ;;  %v1153_v21 = vsel %vm863_vm4, %v3599_v3, 0.0 }
 0x28d   : > { %v1387_v0 = vpop.xlane.xlu1 %1386  ;;  %v1147_v8 = vsel %vm863_vm4, %v3601_v6, 0.0  ;;  %v3612_v4 = vpop.eup %2970 }
 0x28e   : > { %v1401_v2 = vsub.f32 %v3489_v37, %v1387_v0  ;;  %v3614_v13 = vpop.eup %2972  ;;  %v1156_v15 = vsel %vm863_vm4, %v3612_v4, 0.0 }
 0x28f   : > { %v912_v18 = vsel %vm863_vm4, %v3614_v13, 0.0 }
 0x290   : > { %v1408_v12 = vmul.f32 1.442695, %v1401_v2 }
 0x292   : > { %2974 = vpow2.f32 %v1408_v12 }
 0x294   : > { %1669 = vmax.xlane.f32.xlu1 %v1668_v10 }
 0x295   : > { %907 = vadd.xlane.f32.xlu0 %v906_v58 }
 0x298   : > { %v3623_v25 = vpop.eup %2974 }
 0x299   : > { %v1421_v28 = vsel %vm863_vm4, %v3623_v25, 0.0 }
 0x29c   : > { %916 = vadd.xlane.f32.xlu1 %v915_v55  ;;  %v1655_v56 = vpop.xlane.xlu0 %1654 }
 0x29d   : > { %910 = vadd.xlane.f32.xlu0 %v909_v59  ;;  %v1671_v37 = vsub.f32 %v3509_v61, %v1655_v56 }
 0x29f   : > { %v1677_v20 = vmul.f32 1.442695, %v1671_v37 }
 0x2a1   : > { %1735 = vrot.lane.b32.xlu2 %v3321_v31, %s3138_s4  ;;  %v3616_v31 = vpop.xlane.xlu1 %1389  ;;  %2976 = vpow2.f32 %v1677_v20 }
 0x2a4   : > { %1154 = vadd.xlane.f32.xlu1 %v1153_v21  ;;  %v3610_v9 = vpop.xlane.xlu0 %1657 }
 0x2a5   : > { %1148 = vadd.xlane.f32.xlu0 %v1147_v8 }
 0x2a7   : > { %v3628_v23 = vpop.eup %2976 }
 0x2a8   : > { %v1689_v43 = vsel %vm863_vm4, %v3628_v23, 0.0 }
 0x2a9   : > { %v1393_v30 = vpop.xlane.xlu1 %1392 }
 0x2aa   : > { %v1403_v32 = vsub.f32 %v3504_v57, %v1393_v30 }
 0x2ac   : > { %1157 = vadd.xlane.f32.xlu1 %v1156_v15  ;;  %v1399_v22 = vpop.xlane.xlu0 %1398  ;;  %v1412_v44 = vmul.f32 1.442695, %v1403_v32  ;;  %v1396_v15 = vpop.xlane.xlu2 %1395 }
 0x2ad   : > { %913 = vadd.xlane.f32.xlu0 %v912_v18  ;;  %v1405_v27 = vsub.f32 %v3524_v16, %v1399_v22  ;;  %v1134_v22 = vsub.f32 %v3492_v41, %v3583_v42  ;;  %v1404_v41 = vsub.f32 %v3514_v5, %v1396_v15 }
 0x2af   : > { %v1416_v61 = vmul.f32 1.442695, %v1405_v27 }
 0x2b1   : > { %2978 = vpow2.f32 %v1416_v61  ;;  %v3633_v10 = vpop.xlane.xlu1 %1660  ;;  %v1414_v61 = vmul.f32 1.442695, %v1404_v41 }
 0x2b2   : > { %2980 = vpow2.f32 %v1412_v44  ;;  %v1673_v44 = vsub.f32 %v3527_v17, %v3633_v10 }
 0x2b4   : > { %1422 = vadd.xlane.f32.xlu1 %v1421_v28  ;;  %v1463_v27 = vpop.permute.xlu2 %1462 }
 0x2b7   : > { %v3635_v16 = vpop.eup %2978 }
 0x2b8   : > { %v1433_v57 = vsel %vm863_vm4, %v3635_v16, 0.0  ;;  %v3642_v53 = vpop.eup %2980 }
 0x2b9   : > { %v1427_v56 = vsel %vm863_vm4, %v3642_v53, 0.0 }
 0x2ba   : > { %v1664_v35 = vpop.xlane.xlu0 %1663 }
 0x2bb   : > { %v1674_v58 = vsub.f32 %v3537_v36, %v1664_v35 }
 0x2bc   : > { %1690 = vadd.xlane.f32.xlu1 %v1689_v43 }
 0x2bd   : > { %v1683_v50 = vmul.f32 1.442695, %v1674_v58 }
 0x2c1   : > { %1502 = vrot.lane.b32.xlu0 %v3331_v40, %s3137_s26 }
 0x2c2   : > { %v902_v38 = vpop.xlane.xlu0 %901 }
 0x2c3   : > { %2982 = vrcp.f32 %v902_v38 }
 0x2c4   : > { %v905_v60 = vpop.xlane.xlu1 %904  ;;  %1434 = vadd.xlane.f32.xlu1 %v1433_v57 }
 0x2c5   : > { %2984 = vrcp.f32 %v905_v60 }
 0x2c6   : > { %2986 = vpow2.f32 %v1683_v50 }
 0x2c9   : > { %v2983_v55 = vpop.eup %2982 }
 0x2ca   : > { %1428 = vadd.xlane.f32.xlu2 %v1427_v56  ;;  %v924_v36 = vmul.f32 %v2983_v55, %v3544_v46  ;;  %v1133_v46 = vsub.f32 %v3484_v29, %v3587_v48  ;;  %v1667_v42 = vpop.xlane.xlu0 %1666 }
 0x2cb   : > { %v2985_v59 = vpop.eup %2984 }
 0x2cc   : > { %v925_v62 = vmul.f32 %v2985_v59, %v3548_v52  ;;  %v930_v63 = vpack.c.bf16 %v924_v36, %v924_v36  ;;  %v3648_v0 = vpop.eup %2986  ;;  %v1143_v18 = vmul.f32 1.442695, %v1133_v46 }
 0x2cd   : > { %v1698_v12 = vsel %vm863_vm4, %v3648_v0, 0.0 }
 0x2ce   : > { %v931_v2 = vpack.c.bf16 %v925_v62, %v925_v62  ;;  %v939_v21 = vunpack.c.l.b16 %v930_v63  ;;  %2988 = vpow2.f32 %v1143_v18 }
 0x2d0   : > { %v940_v8 = vunpack.c.l.b16 %v931_v2 }
 0x2d2   : > { %1699 = vadd.xlane.f32.xlu2 %v1698_v12  ;;  %v942_v37 = vpack.c.b16 %v940_v8, %v939_v21 }
 0x2d4   : > { %2815 = vmatmul.msk.bf16.vlgmr.msra.gmra.mxu3 %vm863_vm4, %v942_v37  ;;  %v3662_v28 = vpop.eup %2988 }
 0x2d5   : > { %2901 = vmatpush.bf16.msra.mxu3 %v3408_v33  ;;  %v1145_v33 = vmul.f32 1.442695, %v1134_v22 }
 0x2d7   : > { %2990 = vpow2.f32 %v1145_v33 }
 0x2d9   : > { %2902 = vmatpush.bf16.msra.mxu3 %v3411_v34  ;;  %v1402_v34 = vsub.f32 %v3499_v49, %v3616_v31  ;;  %v1675_v49 = vsub.f32 %v3553_v54, %v1667_v42 }
 0x2db   : > { %v1410_v29 = vmul.f32 1.442695, %v1402_v34  ;;  %v1685_v32 = vmul.f32 1.442695, %v1675_v49 }
 0x2dc   : > { %v1465_v52 = vpop.permute.xlu1 %1464 }
 0x2dd   : > { %v1474_v20 = vsel %vm955_vm3, %v1465_v52, 0  ;;  %1733 = vrot.lane.b32.xlu1 %v3317_v26, %s3138_s4  ;;  %v1159_v26 = vsel %vm863_vm4, %v3662_v28, 0.0  ;;  %v3670_v48 = vpop.eup %2990  ;;  %2992 = vpow2.f32 %v1410_v29  ;;  %v3686_v58 = vpop.permute.xlu0 %1504 }
 0x2de   : > { %1482 = vmatpush.bf16.msra.mxu0 %v1474_v20  ;;  %v1162_v30 = vsel %vm863_vm4, %v3670_v48, 0.0  ;;  %2994 = vpow2.f32 %v1414_v61 }
 0x2df   : > { %2996 = vpow2.f32 %v1685_v32 }
 0x2e2   : > { %1483 = vmatpush.bf16.msra.mxu0 %v1463_v27 }
 0x2e3   : > { %v3676_v31 = vpop.eup %2992 }
 0x2e4   : > { %v1424_v35 = vsel %vm863_vm4, %v3676_v31, 0.0  ;;  %v3682_v43 = vpop.eup %2994  ;;  %v1152_v36 = vpop.xlane.xlu2 %1151 }
 0x2e5   : > { %v1430_v54 = vsel %vm863_vm4, %v3682_v43, 0.0  ;;  %v3690_v38 = vpop.eup %2996 }
 0x2ea   : > { %1773 = vrot.lane.b32.xlu2 %v3331_v40, %s3138_s4  ;;  %v1672_v40 = vsub.f32 %v3519_v7, %v3610_v9  ;;  %v1681_v7 = vmul.f32 1.442695, %v1673_v44  ;;  %v1701_v9 = vsel %vm863_vm4, %v3690_v38, 0.0 }
 0x2eb   : > { %1160 = vadd.xlane.f32.xlu0 %v1159_v26 }
 0x2ec   : > { %v1679_v5 = vmul.f32 1.442695, %v1672_v40 }
 0x2ee   : > { %2998 = vpow2.f32 %v1679_v5 }
 0x2ef   : > { %3000 = vpow2.f32 %v1681_v7 }
 0x2f3   : > { %1163 = vadd.xlane.f32.xlu0 %v1162_v30 }
 0x2f4   : > { %v3694_v57 = vpop.eup %2998 }
 0x2f5   : > { %v1692_v10 = vsel %vm863_vm4, %v3694_v57, 0.0  ;;  %v3700_v60 = vpop.eup %3000 }
 0x2f6   : > { %v1695_v63 = vsel %vm863_vm4, %v3700_v60, 0.0 }
 0x2fb   : > { %1425 = vadd.xlane.f32.xlu0 %v1424_v35 }
 0x2fc   : > { %v1420_v46 = vpop.xlane.xlu2 %1419 }
 0x303   : > { %1431 = vadd.xlane.f32.xlu0 %v1430_v54 }
 0x304   : > { %v1736_v42 = vpop.permute.xlu2 %1735 }
 0x305   : > { %v1745_v40 = vsel %vm955_vm3, %v1736_v42, 0 }
 0x307   : > { %v3696_v50 = vpop.xlane.xlu1 %1669  ;;  %1702 = vadd.xlane.f32.xlu1 %v1701_v9 }
 0x308   : > { %v908_v17 = vpop.xlane.xlu0 %907 }
 0x309   : > { %3002 = vrcp.f32 %v908_v17 }
 0x30a   : > { %3004 = vrcp.f32 %v1152_v36 }
 0x30b   : > { %1693 = vadd.xlane.f32.xlu0 %v1692_v10  ;;  %v1243_v10 = vsel %vm955_vm3, %v3533_v24, 0  ;;  %v1676_v24 = vsub.f32 %v3575_v51, %v3696_v50 }
 0x30f   : > { %v3003_v55 = vpop.eup %3002  ;;  %v917_v56 = vpop.xlane.xlu1 %916 }
 0x310   : > { %v911_v59 = vpop.xlane.xlu0 %910  ;;  %v926_v62 = vmul.f32 %v3003_v55, %v3577_v39  ;;  %v3005_v15 = vpop.eup %3004 }
 0x311   : > { %v1172_v52 = vmul.f32 %v3005_v15, %v3562_v1 }
 0x312   : > { %v932_v2 = vpack.c.bf16 %v926_v62, %v926_v62 }
 0x313   : > { %1696 = vadd.xlane.f32.xlu0 %v1695_v63  ;;  %v1178_v20 = vpack.c.bf16 %v1172_v52, %v1172_v52  ;;  %v1514_v52 = vsel %vm955_vm3, %v3686_v58, 0 }
 0x314   : > { %v941_v21 = vunpack.c.l.b16 %v932_v2 }
 0x315   : > { %v1187_v26 = vunpack.c.l.b16 %v1178_v20 }
 0x316   : > { %v943_v8 = vpack.c.b16 %v941_v21, %v941_v21  ;;  %v1687_v21 = vmul.f32 1.442695, %v1676_v24 }
 0x317   : > { %v1155_v12 = vpop.xlane.xlu1 %1154 }
 0x318   : > { %2816 = vmatmul.msk.bf16.gmra.mxu3 %vm863_vm4, %v943_v8  ;;  %v1149_v37 = vpop.xlane.xlu0 %1148 }
 0x319   : > { %3006 = vrcp.f32 %v1149_v37 }
 0x31a   : > { %3008 = vrcp.f32 %v911_v59 }
 0x31f   : > { %v3007_v18 = vpop.eup %3006  ;;  %v3707_v39 = vpop.xlane.xlu1 %1157 }
 0x320   : > { %v1171_v22 = vmul.f32 %v3007_v18, %v3601_v6  ;;  %v914_v27 = vpop.xlane.xlu0 %913  ;;  %v3009_v33 = vpop.eup %3008 }
 0x321   : > { %3010 = vrcp.f32 %v914_v27  ;;  %v927_v29 = vmul.f32 %v3009_v33, %v3591_v11 }
 0x322   : > { %3012 = vrcp.f32 %v1420_v46  ;;  %v1177_v34 = vpack.c.bf16 %v1171_v22, %v1171_v22 }
 0x323   : > { %v933_v6 = vpack.c.bf16 %v927_v29, %v927_v29 }
 0x324   : > { %v1186_v41 = vunpack.c.l.b16 %v1177_v34 }
 0x325   : > { %v980_v5 = vunpack.c.l.b16 %v933_v6 }
 0x326   : > { %v1189_v30 = vpack.c.b16 %v1187_v26, %v1186_v41 }
 0x327   : > { %v3011_v61 = vpop.eup %3010  ;;  %v1423_v49 = vpop.xlane.xlu1 %1422  ;;  %1775 = vrot.lane.b32.xlu0 %v3337_v45, %s3138_s4  ;;  %s4152_s4 = scalar_lea.vmem %s4127_s9, %s3237_s17 }
 0x328   : > { %v3013_v1 = vpop.eup %3012  ;;  %v928_v32 = vmul.f32 %v3011_v61, %v3614_v13  ;;  %3014 = vrcp.f32 %v1423_v49  ;;  %2823 = vmatmul.msk.bf16.vlgmr.msrb.gmra.mxu0 %vm863_vm4, %v1189_v30 }
 0x329   : > { %3016 = vrcp.f32 %v917_v56  ;;  %1753 = vmatpush.bf16.msrb.mxu0 %v1745_v40  ;;  %v1442_v35 = vmul.f32 %v3013_v1, %v3568_v19 }
 0x32a   : > { %v934_v11 = vpack.c.bf16 %v928_v32, %v928_v32  ;;  %3018 = vrcp.f32 %v1155_v12 }
 0x32b   : > { %v1448_v45 = vpack.c.bf16 %v1442_v35, %v1442_v35  ;;  %3020 = vpow2.f32 %v1687_v21 }
 0x32c   : > { %v981_v44 = vunpack.c.l.b16 %v934_v11  ;;  %3022 = vrcp.f32 %v3707_v39 }
 0x32d   : > { %v1457_v56 = vunpack.c.l.b16 %v1448_v45 }
 0x32e   : > { %v3015_v54 = vpop.eup %3014  ;;  %v983_v7 = vpack.c.b16 %v981_v44, %v980_v5 }
 0x32f   : > { %v3017_v9 = vpop.eup %3016  ;;  %v1443_v17 = vmul.f32 %v3015_v54, %v3623_v25  ;;  %v1691_v25 = vpop.xlane.xlu1 %1690 }
 0x330   : > { %2817 = vmatmul.msk.bf16.vlgmr.msrb.gmra.mxu3 %vm863_vm4, %v983_v7  ;;  %v929_v55 = vmul.f32 %v3017_v9, %v3589_v47  ;;  %v3019_v2 = vpop.eup %3018 }
 0x331   : > { %v1449_v13 = vpack.c.bf16 %v1443_v17, %v1443_v17  ;;  %1251 = vmatpush.bf16.msrb.mxu3 %v1243_v10  ;;  %v1173_v47 = vmul.f32 %v3019_v2, %v3599_v3  ;;  %v3728_v15 = vpop.eup %3020 }
 0x332   : > { %v935_v59 = vpack.c.bf16 %v929_v55, %v929_v55  ;;  %v1704_v51 = vsel %vm863_vm4, %v3728_v15, 0.0  ;;  %v3023_v20 = vpop.eup %3022 }
 0x333   : > { %v1458_v36 = vunpack.c.l.b16 %v1449_v13  ;;  %v1179_v8 = vpack.c.bf16 %v1173_v47, %v1173_v47  ;;  %v1503_v3 = vpop.permute.xlu0 %1502  ;;  %v1174_v58 = vmul.f32 %v3023_v20, %v3612_v4 }
 0x334   : > { %v982_v62 = vunpack.c.l.b16 %v935_v59 }
 0x335   : > { %v1460_v19 = vpack.c.b16 %v1458_v36, %v1457_v56  ;;  %1252 = vmatpush.bf16.msrb.mxu3 %v3391_v14  ;;  %v1188_v14 = vunpack.c.l.b16 %v1179_v8  ;;  %v1180_v33 = vpack.c.bf16 %v1174_v58, %v1174_v58 }
 0x336   : > { %v984_v63 = vpack.c.b16 %v982_v62, %v982_v62 }
 0x337   : > { %v1435_v37 = vpop.xlane.xlu1 %1434  ;;  %v1190_v46 = vpack.c.b16 %v1188_v14, %v1188_v14  ;;  %v1226_v41 = vunpack.c.l.b16 %v1180_v33 }
 0x338   : > { %2831 = vmatmul.msk.bf16.vlgmr.msra.gmra.mxu0 %vm863_vm4, %v1460_v19 }
 0x33d   : > { %v1429_v4 = vpop.xlane.xlu2 %1428 }
 0x340   : > { %2818 = vmatmul.msk.bf16.gmra.mxu3 %vm863_vm4, %v984_v63 }
 0x34f   : > { %v1734_v12 = vpop.permute.xlu1 %1733 }
 0x350   : > { %2824 = vmatmul.msk.bf16.vlgmr.msra.gmra.mxu3 %vm863_vm4, %v1190_v46  ;;  %1754 = vmatpush.bf16.msrb.mxu0 %v1734_v12 }
 0x351   : > { %1522 = vmatpush.bf16.msra.mxu3 %v1514_v52  ;;  %1705 = vadd.xlane.f32.xlu0 %v1704_v51 }
 0x355   : > { %1523 = vmatpush.bf16.msra.mxu3 %v1503_v3 }
 0x357   : > { %v968_v50 = vpop.f32.mrf.mxu3 }
 0x358   : > { %1017 = vst.msk [vmem:[#allocation3] sm:$0xff] %vm775_vm2, %v968_v50 }
 0x35e   : > { %v1161_v18 = vpop.xlane.xlu0 %1160 }
 0x35f   : > { %3024 = vrcp.f32 %v1161_v18  ;;  %v970_v22 = vpop.f32.mrf.mxu3 }
 0x360   : > { %1018 = vst.msk [vmem:[#allocation3 + $0x8] sm:$0xff] %vm775_vm2, %v970_v22 }
 0x365   : > { %v3025_v27 = vpop.eup %3024 }
 0x366   : > { %v1175_v34 = vmul.f32 %v3025_v27, %v3662_v28  ;;  %v1164_v26 = vpop.xlane.xlu0 %1163 }
 0x367   : > { %3026 = vrcp.f32 %v1164_v26 }
 0x368   : > { %v1181_v29 = vpack.c.bf16 %v1175_v34, %v1175_v34 }
 0x36a   : > { %v1227_v42 = vunpack.c.l.b16 %v1181_v29 }
 0x36c   : > { %v1229_v30 = vpack.c.b16 %v1227_v42, %v1226_v41 }
 0x36d   : > { %v3027_v61 = vpop.eup %3026 }
 0x36e   : > { %2825 = vmatmul.msk.bf16.vlgmr.msrb.gmra.mxu3 %vm863_vm4, %v1229_v30  ;;  %v1426_v39 = vpop.xlane.xlu0 %1425  ;;  %v1176_v49 = vmul.f32 %v3027_v61, %v3670_v48 }
 0x36f   : > { %3028 = vrcp.f32 %v1426_v39 }
 0x370   : > { %v1182_v1 = vpack.c.bf16 %v1176_v49, %v1176_v49 }
 0x372   : > { %v1228_v28 = vunpack.c.l.b16 %v1182_v1 }
 0x374   : > { %v1230_v5 = vpack.c.b16 %v1228_v28, %v1228_v28 }
 0x375   : > { %v3029_v40 = vpop.eup %3028 }
 0x376   : > { %v1432_v6 = vpop.xlane.xlu0 %1431  ;;  %v1444_v32 = vmul.f32 %v3029_v40, %v3676_v31 }
 0x377   : > { %3030 = vrcp.f32 %v1432_v6 }
 0x378   : > { %3032 = vrcp.f32 %v1691_v25  ;;  %v1450_v11 = vpack.c.bf16 %v1444_v32, %v1444_v32 }
 0x379   : > { %3034 = vrcp.f32 %v1429_v4 }
 0x37a   : > { %v1459_v35 = vunpack.c.l.b16 %v1450_v11  ;;  %v1703_v8 = vpop.xlane.xlu1 %1702 }
 0x37c   : > { %v1461_v44 = vpack.c.b16 %v1459_v35, %v1459_v35 }
 0x37d   : > { %v3031_v54 = vpop.eup %3030 }
 0x37e   : > { %v3033_v7 = vpop.eup %3032  ;;  %2826 = vmatmul.msk.bf16.gmra.mxu3 %vm863_vm4, %v1230_v5  ;;  %2832 = vmatmul.msk.bf16.gmra.mxu0 %vm863_vm4, %v1461_v44  ;;  %v1694_v48 = vpop.xlane.xlu0 %1693  ;;  %v1446_v45 = vmul.f32 %v3031_v54, %v3682_v43 }
 0x37f   : > { %v3035_v9 = vpop.eup %3034  ;;  %3036 = vrcp.f32 %v1694_v48  ;;  %v1713_v31 = vmul.f32 %v3033_v7, %v3628_v23 }
 0x380   : > { %v1445_v17 = vmul.f32 %v3035_v9, %v3642_v53  ;;  %v1452_v10 = vpack.c.bf16 %v1446_v45, %v1446_v45  ;;  %3038 = vrcp.f32 %v1435_v37 }
 0x381   : > { %v1719_v55 = vpack.c.bf16 %v1713_v31, %v1713_v31 }
 0x382   : > { %v1451_v56 = vpack.c.bf16 %v1445_v17, %v1445_v17  ;;  %v1498_v59 = vunpack.c.l.b16 %v1452_v10 }
 0x383   : > { %v1728_v25 = vunpack.c.l.b16 %v1719_v55 }
 0x384   : > { %v1497_v63 = vunpack.c.l.b16 %v1451_v56 }
 0x385   : > { %v3037_v13 = vpop.eup %3036 }
 0x386   : > { %v1714_v36 = vmul.f32 %v3037_v13, %v3694_v57  ;;  %v1697_v19 = vpop.xlane.xlu0 %1696  ;;  %v3039_v24 = vpop.eup %3038  ;;  %v1500_v43 = vpack.c.b16 %v1498_v59, %v1497_v63 }
 0x387   : > { %3040 = vrcp.f32 %v1697_v19  ;;  %v1447_v53 = vmul.f32 %v3039_v24, %v3635_v16  ;;  %v1700_v57 = vpop.xlane.xlu2 %1699 }
 0x388   : > { %v1720_v62 = vpack.c.bf16 %v1714_v36, %v1714_v36  ;;  %3042 = vrcp.f32 %v1703_v8 }
 0x389   : > { %v1453_v37 = vpack.c.bf16 %v1447_v53, %v1447_v53  ;;  %3044 = vrcp.f32 %v1700_v57  ;;  %v2894_v53 = vld [vmem:[%s3250_s27 + $0x8] sm:$0xff] }
 0x38a   : > { %v1729_v2 = vunpack.c.l.b16 %v1720_v62  ;;  %1880 = vmatpush.bf16.msra.mxu1 %v2894_v53 }
 0x38b   : > { %v1499_v46 = vunpack.c.l.b16 %v1453_v37 }
 0x38c   : > { %v1731_v47 = vpack.c.b16 %v1729_v2, %v1728_v25 }
 0x38d   : > { %v3041_v23 = vpop.eup %3040  ;;  %v1501_v50 = vpack.c.b16 %v1499_v46, %v1499_v46 }
 0x38e   : > { %2833 = vmatmul.msk.bf16.vlgmr.msra.gmra.mxu3 %vm863_vm4, %v1500_v43  ;;  %2839 = vmatmul.msk.bf16.vlgmr.msrb.gmra.mxu0 %vm863_vm4, %v1731_v47  ;;  %v1715_v21 = vmul.f32 %v3041_v23, %v3700_v60  ;;  %v3043_v16 = vpop.eup %3042 }
 0x38f   : > { %v1774_v20 = vpop.permute.xlu2 %1773  ;;  %v3045_v60 = vpop.eup %3044  ;;  %v1717_v22 = vmul.f32 %v3043_v16, %v3690_v38 }
 0x390   : > { %v1721_v14 = vpack.c.bf16 %v1715_v21, %v1715_v21  ;;  %v1716_v58 = vmul.f32 %v3045_v60, %v3648_v0  ;;  %v2893_v21 = vld [vmem:[%s3250_s27] sm:$0xff] }
 0x391   : > { %v1723_v33 = vpack.c.bf16 %v1717_v22, %v1717_v22  ;;  %1881 = vmatpush.bf16.msra.mxu1 %v2893_v21 }
 0x392   : > { %v1730_v12 = vunpack.c.l.b16 %v1721_v14  ;;  %v1722_v26 = vpack.c.bf16 %v1716_v58, %v1716_v58 }
 0x393   : > { %v1769_v29 = vunpack.c.l.b16 %v1723_v33 }
 0x394   : > { %v1732_v18 = vpack.c.b16 %v1730_v12, %v1730_v12  ;;  %v1768_v41 = vunpack.c.l.b16 %v1722_v26 }
 0x396   : > { %v1771_v42 = vpack.c.b16 %v1769_v29, %v1768_v41  ;;  %v2945_v41 = vld [vmem:[%s4149_s15] ss:$0 sm:$0xff] }
 0x399   : > { %v1776_v52 = vpop.permute.xlu0 %1775 }
 0x39a   : > { %v1785_v51 = vsel %vm955_vm3, %v1776_v52, 0 }
 0x39b   : > { %v973_v3 = vpop.f32.mrf.mxu3  ;;  %1793 = vmatpush.bf16.msrb.mxu3 %v1785_v51 }
 0x39c   : > { %1019 = vst.msk [vmem:[#allocation3 + $0x10] sm:$0xff] %vm775_vm2, %v973_v3 }
 0x39e   : > { %2834 = vmatmul.msk.bf16.gmra.mxu3 %vm863_vm4, %v1501_v50  ;;  %2840 = vmatmul.msk.bf16.gmra.mxu0 %vm863_vm4, %v1732_v18 }
 0x39f   : > { %1794 = vmatpush.bf16.msrb.mxu3 %v1774_v20 }
 0x3a3   : > { %v975_v27 = vpop.f32.mrf.mxu3 }
 0x3a5   : > { %v1214_v34 = vpop.f32.mrf.mxu0 }
 0x3a6   : > { %1269 = vrot.lane.b32.xlu1 %v1214_v34, %s3139_s16 }
 0x3ad   : > { %v1216_v30 = vpop.f32.mrf.mxu0 }
 0x3ae   : > { %1271 = vrot.lane.b32.xlu2 %v1216_v30, %s3139_s16  ;;  %2841 = vmatmul.msk.bf16.vlgmr.msrb.gmra.mxu3 %vm863_vm4, %v1771_v42 }
 0x3b3   : > { %v1008_v61 = vpop.f32.mrf.mxu3 }
 0x3b4   : > { %1020 = vst.msk [vmem:[#allocation3 + $0x18] sm:$0xff] %vm775_vm2, %v1008_v61  ;;  %v3098_v61 = vld [vmem:[#allocation2] sm:$0xff] }
 0x3b5   : > { %v1485_v38 = vpop.f32.mrf.mxu0 }
 0x3b6   : > { %1540 = vrot.lane.b32.xlu2 %v1485_v38, %s3140_s28 }
 0x3bb   : > { %v1010_v0 = vpop.f32.mrf.mxu3 }
 0x3bc   : > { %1021 = vst.msk [vmem:[#allocation3 + $0x20] sm:$0xff] %vm775_vm2, %v1010_v0 }
 0x3bd   : > { %v1487_v39 = vpop.f32.mrf.mxu0 }
 0x3be   : > { %1542 = vrot.lane.b32.xlu1 %v1487_v39, %s3140_s28 }
 0x3c3   : > { %v1013_v49 = vpop.f32.mrf.mxu3 }
 0x3c4   : > { %1022 = vst.msk [vmem:[#allocation3 + $0x28] sm:$0xff] %vm775_vm2, %v1013_v49  ;;  %v1706_v1 = vpop.xlane.xlu0 %1705 }
 0x3c5   : > { %3046 = vrcp.f32 %v1706_v1  ;;  %v3099_v1 = vld [vmem:[#allocation2 + $0x8] sm:$0xff] }
 0x3cb   : > { %v3047_v40 = vpop.eup %3046  ;;  %v1015_v4 = vpop.f32.mrf.mxu3 }
 0x3cc   : > { %v1718_v6 = vmul.f32 %v3047_v40, %v3728_v15 }
 0x3ce   : > { %v1724_v32 = vpack.c.bf16 %v1718_v6, %v1718_v6 }
 0x3d0   : > { %v1770_v28 = vunpack.c.l.b16 %v1724_v32 }
 0x3d2   : > { %v1772_v11 = vpack.c.b16 %v1770_v28, %v1770_v28  ;;  %v3100_v28 = vld [vmem:[#allocation2 + $0x10] sm:$0xff] }
 0x3d3   : > { %v1219_v35 = vpop.f32.mrf.mxu3 }
 0x3d4   : > { %1273 = vrot.lane.b32.xlu0 %v1219_v35, %s3139_s16  ;;  %2842 = vmatmul.msk.bf16.gmra.mxu3 %vm863_vm4, %v1772_v11 }
 0x3db   : > { %v1221_v5 = vpop.f32.mrf.mxu3 }
 0x3f1   : > { %v1254_v44 = vpop.f32.mrf.mxu3 }
 0x3f9   : > { %v1256_v54 = vpop.f32.mrf.mxu3 }
 0x3fb   : > { %v1490_v7 = vpop.f32.mrf.mxu0 }
 0x401   : > { %v1259_v48 = vpop.f32.mrf.mxu3 }
 0x403   : > { %v1492_v9 = vpop.f32.mrf.mxu0 }
 0x408   : > { %v1272_v45 = vpop.permute.xlu2 %1271 }
 0x409   : > { %1289 = vst.msk [vmem:[#allocation3 + $0x8] sm:$0xff] %vm1287_vm5, %v1272_v45  ;;  %v1261_v31 = vpop.f32.mrf.mxu3 }
 0x40a   : > { %v3102_v31 = vld [vmem:[#allocation2 + $0x20] sm:$0xff] }
 0x40b   : > { %v1756_v15 = vpop.f32.mrf.mxu0 }
 0x40c   : > { %1811 = vrot.lane.b32.xlu2 %v1756_v15, %s3141_s14 }
 0x410   : > { %v1541_v55 = vpop.permute.xlu2 %1540 }
 0x411   : > { %v1525_v17 = vpop.f32.mrf.mxu3 }
 0x413   : > { %v1758_v10 = vpop.f32.mrf.mxu0 }
 0x414   : > { %1275 = vrot.lane.b32.xlu2 %v1254_v44, %s3139_s16  ;;  %1813 = vrot.lane.b32.xlu1 %v1758_v10, %s3141_s14 }
 0x418   : > { %v1270_v13 = vpop.permute.xlu1 %1269 }
 0x419   : > { %1288 = vst.msk [vmem:[#allocation3] sm:$0xff] %vm1287_vm5, %v1270_v13  ;;  %v1527_v56 = vpop.f32.mrf.mxu3 }
 0x41a   : > { %1559 = vst.msk [vmem:[#allocation3] sm:$0xff] %vm1558_vm6, %v1541_v55  ;;  %v3103_v55 = vld [vmem:[#allocation2 + $0x28] sm:$0xff] }
 0x41b   : > { %v1761_v36 = vpop.f32.mrf.mxu0 }
 0x41c   : > { %1546 = vrot.lane.b32.xlu2 %v1525_v17, %s3140_s28  ;;  %1544 = vrot.lane.b32.xlu1 %v1490_v7, %s3140_s28 }
 0x421   : > { %v1530_v19 = vpop.f32.mrf.mxu3 }
 0x423   : > { %v1763_v59 = vpop.f32.mrf.mxu0 }
 0x424   : > { %1277 = vrot.lane.b32.xlu2 %v1256_v54, %s3139_s16  ;;  %1815 = vrot.lane.b32.xlu1 %v1761_v36, %s3141_s14  ;;  %v3101_v54 = vld [vmem:[#allocation2 + $0x18] sm:$0xff] }
 0x429   : > { %v1532_v62 = vpop.f32.mrf.mxu3 }
 0x42c   : > { %1550 = vrot.lane.b32.xlu2 %v1530_v19, %s3140_s28  ;;  %1279 = vrot.lane.b32.xlu1 %v1259_v48, %s3139_s16  ;;  %v3142_v19 = vmov 32.0  }
 0x42d   : > { %3048 = vrcp.f32 %v3142_v19 }
 0x430   : > { %v1543_v25 = vpop.permute.xlu1 %1542 }
 0x431   : > { %1560 = vst.msk [vmem:[#allocation3 + $0x8] sm:$0xff] %vm1558_vm6, %v1543_v25  ;;  %v1796_v63 = vpop.f32.mrf.mxu3 }
 0x432   : > { %1817 = vrot.lane.b32.xlu0 %v1796_v63, %s3141_s14 }
 0x433   : > { %v3049_v59 = vpop.eup %3048 }
 0x434   : > { %v1925_v62 = vmul.f32 32.0, %v3049_v59  ;;  %vm1929_vm8 = vweird.f32 %v3049_v59 }
 0x436   : > { %v1926_v25 = vsub.f32 1.0, %v1925_v62 }
 0x438   : > { %v1927_v63 = vmul.f32 %v3049_v59, %v1926_v25 }
 0x439   : > { %v1798_v2 = vpop.f32.mrf.mxu3 }
 0x43a   : > { %1548 = vrot.lane.b32.xlu0 %v1527_v56, %s3140_s28  ;;  %1819 = vrot.lane.b32.xlu1 %v1798_v2, %s3141_s14  ;;  %v1928_v2 = vadd.f32 %v3049_v59, %v1927_v63 }
 0x446   : > { %v1274_v24 = vpop.permute.xlu0 %1273 }
 0x447   : > { %1290 = vst.msk [vmem:[#allocation3 + $0x10] sm:$0xff] %vm1287_vm5, %v1274_v24  ;;  %v3817_v24 = vsel %vm1929_vm8, %v3049_v59, %v1928_v2 }
 0x457   : > { %v1801_v43 = vpop.f32.mrf.mxu3 }
 0x458   : > { %1821 = vrot.lane.b32.xlu0 %v1801_v43, %s3141_s14 }
 0x45f   : > { %v1803_v47 = vpop.f32.mrf.mxu3 }
 0x466   : > { %v1812_v23 = vpop.permute.xlu2 %1811 }
 0x467   : > { %1830 = vst.msk [vmem:[#allocation3] sm:$0xff] %vm1829_vm7, %v1812_v23 }
 0x46e   : > { %v1276_v57 = vpop.permute.xlu2 %1275  ;;  %v1836_v12 = vld [vmem:[#allocation3] sm:$0xff] }
 0x46f   : > { %1291 = vst.msk [vmem:[#allocation3 + $0x18] sm:$0xff] %vm1287_vm5, %v1276_v57 }
 0x476   : > { %v1547_v8 = vpop.permute.xlu2 %1546 }
 0x477   : > { %1562 = vst.msk [vmem:[#allocation3 + $0x18] sm:$0xff] %vm1558_vm6, %v1547_v8 }
 0x47e   : > { %v1278_v37 = vpop.permute.xlu2 %1277 }
 0x47f   : > { %1292 = vst.msk [vmem:[#allocation3 + $0x20] sm:$0xff] %vm1287_vm5, %v1278_v37 }
 0x486   : > { %v1814_v14 = vpop.permute.xlu1 %1813  ;;  %v1551_v18 = vpop.permute.xlu2 %1550 }
 0x487   : > { %1831 = vst.msk [vmem:[#allocation3 + $0x8] sm:$0xff] %vm1829_vm7, %v1814_v14 }
 0x48e   : > { %v1545_v46 = vpop.permute.xlu1 %1544  ;;  %v1837_v52 = vld [vmem:[#allocation3 + $0x8] sm:$0xff] }
 0x48f   : > { %1561 = vst.msk [vmem:[#allocation3 + $0x10] sm:$0xff] %vm1558_vm6, %v1545_v46  ;;  %v1842_v51 = vpack.c.bf16 %v1837_v52, %v1836_v12 }
 0x491   : > { %2851 = vmatmul.msk.bf16.vlgmr.msra.gmra.mxu1 %vm722_vm1, %v1842_v51 }
 0x496   : > { %v1816_v3 = vpop.permute.xlu1 %1815 }
 0x497   : > { %1832 = vst.msk [vmem:[#allocation3 + $0x10] sm:$0xff] %vm1829_vm7, %v1816_v3 }
 0x49e   : > { %v1280_v50 = vpop.permute.xlu1 %1279  ;;  %v1838_v22 = vld [vmem:[#allocation3 + $0x10] sm:$0xff] }
 0x49f   : > { %1293 = vst.msk [vmem:[#allocation3 + $0x28] sm:$0xff] %vm1287_vm5, %v1280_v50 }
 0x4a0   : > { %1564 = vst.msk [vmem:[#allocation3 + $0x28] sm:$0xff] %vm1558_vm6, %v1551_v18 }
 0x4a4   : > { %v1818_v16 = vpop.permute.xlu0 %1817 }
 0x4a5   : > { %1833 = vst.msk [vmem:[#allocation3 + $0x18] sm:$0xff] %vm1829_vm7, %v1818_v16 }
 0x4ac   : > { %v1820_v20 = vpop.permute.xlu1 %1819  ;;  %v1549_v60 = vpop.permute.xlu0 %1548  ;;  %v1839_v58 = vld [vmem:[#allocation3 + $0x18] sm:$0xff] }
 0x4ad   : > { %1563 = vst.msk [vmem:[#allocation3 + $0x20] sm:$0xff] %vm1558_vm6, %v1549_v60  ;;  %v1843_v27 = vpack.c.bf16 %v1839_v58, %v1838_v22 }
 0x4ae   : > { %1834 = vst.msk [vmem:[#allocation3 + $0x20] sm:$0xff] %vm1829_vm7, %v1820_v20 }
 0x4af   : > { %2852 = vmatmul.msk.bf16.gmra.mxu1 %vm722_vm1, %v1843_v27 }
 0x4b5   : > { %v1840_v34 = vld [vmem:[#allocation3 + $0x20] sm:$0xff] }
 0x4ca   : > { %v1822_v33 = vpop.permute.xlu0 %1821 }
 0x4cb   : > { %1835 = vst.msk [vmem:[#allocation3 + $0x28] sm:$0xff] %vm1829_vm7, %v1822_v33 }
 0x4d2   : > { %v1841_v26 = vld [vmem:[#allocation3 + $0x28] sm:$0xff] }
 0x4d3   : > { %v1844_v29 = vpack.c.bf16 %v1841_v26, %v1840_v34 }
 0x4d5   : > { %2853 = vmatmul.msk.bf16.gmra.mxu1 %vm722_vm1, %v1844_v29 }
 0x50e   : > { %v1883_v42 = vpop.f32.mrf.mxu1 }
 0x50f   : > { %v1884_v30 = vadd.f32 %v2945_v41, %v1883_v42 }
 0x511   : > { %v1898_v38 = vadd.f32 %v3098_v61, %v1884_v30 }
 0x513   : > { %v1906_v0 = vsel %vm722_vm1, %v1898_v38, 0.0 }
 0x514   : > { %1907 = vadd.xlane.f32.xlu2 %v1906_v0 }
 0x516   : > { %v1885_v39 = vpop.f32.mrf.mxu1 }
 0x517   : > { %v1886_v49 = vadd.f32 %v2945_v41, %v1885_v39 }
 0x519   : > { %v1899_v40 = vadd.f32 %v3099_v1, %v1886_v49  ;;  %v2895_v1 = vld [vmem:[%s3267_s23] sm:$0xff] }
 0x51b   : > { %v1909_v4 = vsel %vm722_vm1, %v1899_v40, 0.0 }
 0x51c   : > { %1910 = vadd.xlane.f32.xlu1 %v1909_v4 }
 0x52c   : > { %v1888_v6 = vpop.f32.mrf.mxu1 }
 0x52d   : > { %v1889_v32 = vadd.f32 %v2945_v41, %v1888_v6 }
 0x52f   : > { %v1900_v11 = vadd.f32 %v3100_v28, %v1889_v32 }
 0x531   : > { %v1912_v35 = vsel %vm722_vm1, %v1900_v11, 0.0 }
 0x532   : > { %1913 = vadd.xlane.f32.xlu0 %v1912_v35 }
 0x534   : > { %v1890_v5 = vpop.f32.mrf.mxu1 }
 0x535   : > { %v1891_v44 = vadd.f32 %v2945_v41, %v1890_v5 }
 0x537   : > { %v1901_v7 = vadd.f32 %v3101_v54, %v1891_v44 }
 0x539   : > { %v1915_v48 = vsel %vm722_vm1, %v1901_v7, 0.0 }
 0x53a   : > { %1916 = vadd.xlane.f32.xlu2 %v1915_v48 }
 0x552   : > { %v1893_v9 = vpop.f32.mrf.mxu1 }
 0x553   : > { %v1894_v45 = vadd.f32 %v2945_v41, %v1893_v9 }
 0x555   : > { %v1902_v15 = vadd.f32 %v3102_v31, %v1894_v45 }
 0x557   : > { %v1918_v17 = vsel %vm722_vm1, %v1902_v15, 0.0 }
 0x558   : > { %1919 = vadd.xlane.f32.xlu1 %v1918_v17 }
 0x55a   : > { %v1895_v10 = vpop.f32.mrf.mxu1 }
 0x55b   : > { %v1896_v13 = vadd.f32 %v2945_v41, %v1895_v10 }
 0x55d   : > { %v1903_v56 = vadd.f32 %v3103_v55, %v1896_v13 }
 0x55f   : > { %v1921_v36 = vsel %vm722_vm1, %v1903_v56, 0.0 }
 0x560   : > { %1922 = vadd.xlane.f32.xlu2 %v1921_v36 }
 0x587   : > { %v1908_v43 = vpop.xlane.xlu2 %1907 }
 0x588   : > { %v1931_v47 = vmul.f32 %v3817_v24, %v1908_v43 }
 0x58a   : > { %v3820_v23 = vsub.f32 %v1898_v38, %v1931_v47  ;;  %v2896_v38 = vld [vmem:[%s3267_s23 + $0x8] sm:$0xff] }
 0x58b   : > { %2101 = vmatpush.bf16.msra.mxu2 %v2896_v38 }
 0x58c   : > { %v1943_v53 = vmul.f32 %v3820_v23, %v3820_v23 }
 0x58e   : > { %v1949_v21 = vsel %vm722_vm1, %v1943_v53, 0.0 }
 0x58f   : > { %v1911_v57 = vpop.xlane.xlu1 %1910  ;;  %1950 = vadd.xlane.f32.xlu0 %v1949_v21  ;;  %2102 = vmatpush.bf16.msra.mxu2 %v2895_v1 }
 0x590   : > { %v1932_v8 = vmul.f32 %v3817_v24, %v1911_v57 }
 0x592   : > { %v3826_v37 = vsub.f32 %v1899_v40, %v1932_v8 }
 0x594   : > { %v1944_v14 = vmul.f32 %v3826_v37, %v3826_v37 }
 0x596   : > { %v1952_v46 = vsel %vm722_vm1, %v1944_v14, 0.0 }
 0x597   : > { %1953 = vadd.xlane.f32.xlu1 %v1952_v46 }
 0x5a5   : > { %v1914_v12 = vpop.xlane.xlu0 %1913 }
 0x5a6   : > { %v1933_v52 = vmul.f32 %v3817_v24, %v1914_v12 }
 0x5a8   : > { %v3832_v51 = vsub.f32 %v1900_v11, %v1933_v52 }
 0x5aa   : > { %v1945_v3 = vmul.f32 %v3832_v51, %v3832_v51 }
 0x5ac   : > { %v1955_v50 = vsel %vm722_vm1, %v1945_v3, 0.0 }
 0x5ad   : > { %v1917_v18 = vpop.xlane.xlu2 %1916  ;;  %1956 = vadd.xlane.f32.xlu2 %v1955_v50 }
 0x5ae   : > { %v1934_v16 = vmul.f32 %v3817_v24, %v1917_v18 }
 0x5b0   : > { %v3838_v20 = vsub.f32 %v1901_v7, %v1934_v16 }
 0x5b2   : > { %v1946_v60 = vmul.f32 %v3838_v20, %v3838_v20 }
 0x5b4   : > { %v1958_v22 = vsel %vm722_vm1, %v1946_v60, 0.0 }
 0x5b5   : > { %1959 = vadd.xlane.f32.xlu0 %v1958_v22 }
 0x5cb   : > { %v1920_v58 = vpop.xlane.xlu1 %1919 }
 0x5cc   : > { %v1935_v27 = vmul.f32 %v3817_v24, %v1920_v58 }
 0x5ce   : > { %v3844_v33 = vsub.f32 %v1902_v15, %v1935_v27  ;;  %v3864_v15 = vld [vmem:[%s4150_s19] ss:$0 sm:$0xff] }
 0x5d0   : > { %v1947_v34 = vmul.f32 %v3844_v33, %v3844_v33 }
 0x5d2   : > { %v1961_v26 = vsel %vm722_vm1, %v1947_v34, 0.0 }
 0x5d3   : > { %v1923_v29 = vpop.xlane.xlu2 %1922  ;;  %1962 = vadd.xlane.f32.xlu1 %v1961_v26 }
 0x5d4   : > { %v1936_v41 = vmul.f32 %v3817_v24, %v1923_v29 }
 0x5d6   : > { %v3850_v42 = vsub.f32 %v1903_v56, %v1936_v41  ;;  %v3872_v56 = vld [vmem:[%s4151_s24] ss:$0 sm:$0xff] }
 0x5d8   : > { %v1948_v30 = vmul.f32 %v3850_v42, %v3850_v42 }
 0x5da   : > { %v1964_v61 = vsel %vm722_vm1, %v1948_v30, 0.0 }
 0x5db   : > { %1965 = vadd.xlane.f32.xlu2 %v1964_v61 }
 0x602   : > { %v1951_v0 = vpop.xlane.xlu0 %1950 }
 0x603   : > { %v1967_v39 = vmul.f32 %v1951_v0, %v3817_v24 }
 0x605   : > { %v1973_v49 = vadd.f32 1e-05, %v1967_v39 }
 0x607   : > { %3050 = vrsqrt.f32 %v1973_v49  ;;  %vm1985_vm10 = vweird.f32 %v1973_v49 }
 0x60a   : > { %v1954_v40 = vpop.xlane.xlu1 %1953 }
 0x60b   : > { %v1968_v4 = vmul.f32 %v1954_v40, %v3817_v24 }
 0x60d   : > { %v3051_v6 = vpop.eup %3050  ;;  %v1974_v32 = vadd.f32 1e-05, %v1968_v4 }
 0x60e   : > { %v1980_v28 = vmul.f32 %v3051_v6, %v1973_v49  ;;  %vm1986_vm9 = vweird.f32 %v3051_v6 }
 0x60f   : > { %3052 = vrsqrt.f32 %v1974_v32  ;;  %vm1987_vm11 = vmor %vm1985_vm10, %vm1986_vm9  ;;  %vm1995_vm13 = vweird.f32 %v1974_v32 }
 0x610   : > { %v1981_v11 = vmul.f32 %v3051_v6, %v1980_v28 }
 0x612   : > { %v1982_v35 = vmul.f32 0.5, %v1981_v11 }
 0x614   : > { %v1983_v5 = vsub.f32 1.5, %v1982_v35 }
 0x615   : > { %v3053_v44 = vpop.eup %3052 }
 0x616   : > { %v1984_v54 = vmul.f32 %v3051_v6, %v1983_v5  ;;  %v1990_v7 = vmul.f32 %v3053_v44, %v1974_v32  ;;  %vm1996_vm12 = vweird.f32 %v3053_v44 }
 0x617   : > { %vm1997_vm14 = vmor %vm1995_vm13, %vm1996_vm12 }
 0x618   : > { %v1991_v48 = vmul.f32 %v3053_v44, %v1990_v7  ;;  %v1988_v9 = vsel %vm1987_vm11, %v3051_v6, %v1984_v54 }
 0x619   : > { %v2039_v17 = vmul.f32 %v1988_v9, %v3820_v23 }
 0x61a   : > { %v1992_v45 = vmul.f32 0.5, %v1991_v48 }
 0x61b   : > { %v2048_v36 = vmul.f32 %v3864_v15, %v2039_v17 }
 0x61c   : > { %v1993_v31 = vsub.f32 1.5, %v1992_v45 }
 0x61d   : > { %v3879_v63 = vadd.f32 %v3872_v56, %v2048_v36 }
 0x61e   : > { %v1994_v10 = vmul.f32 %v3053_v44, %v1993_v31 }
 0x620   : > { %v1998_v13 = vsel %vm1997_vm14, %v3053_v44, %v1994_v10  ;;  %v1957_v55 = vpop.xlane.xlu2 %1956 }
 0x621   : > { %v2040_v19 = vmul.f32 %v1998_v13, %v3826_v37  ;;  %v1969_v59 = vmul.f32 %v1957_v55, %v3817_v24 }
 0x623   : > { %v2049_v62 = vmul.f32 %v3864_v15, %v2040_v19  ;;  %v1975_v25 = vadd.f32 1e-05, %v1969_v59 }
 0x625   : > { %v3882_v2 = vadd.f32 %v3872_v56, %v2049_v62  ;;  %3054 = vrsqrt.f32 %v1975_v25  ;;  %vm2005_vm0 = vweird.f32 %v1975_v25 }
 0x627   : > { %v2063_v43 = vpack.c.bf16 %v3882_v2, %v3879_v63 }
 0x628   : > { %v1960_v47 = vpop.xlane.xlu0 %1959 }
 0x629   : > { %v1970_v23 = vmul.f32 %v1960_v47, %v3817_v24  ;;  %2862 = vmatmul.msk.bf16.vlgmr.msra.gmra.mxu2 %vm722_vm1, %v2063_v43 }
 0x62b   : > { %v3055_v53 = vpop.eup %3054  ;;  %v1976_v21 = vadd.f32 1e-05, %v1970_v23 }
 0x62c   : > { %v2000_v57 = vmul.f32 %v3055_v53, %v1975_v25  ;;  %vm2006_vm15 = vweird.f32 %v3055_v53 }
 0x62d   : > { %3056 = vrsqrt.f32 %v1976_v21  ;;  %vm2007_vm2 = vmor %vm2005_vm0, %vm2006_vm15  ;;  %vm2015_vm4 = vweird.f32 %v1976_v21 }
 0x62e   : > { %v2001_v8 = vmul.f32 %v3055_v53, %v2000_v57 }
 0x630   : > { %v2002_v37 = vmul.f32 0.5, %v2001_v8 }
 0x632   : > { %v2003_v14 = vsub.f32 1.5, %v2002_v37  ;;  %v2900_v37 = vld [vmem:[%s3277_s30 + $0x18] sm:$0xff] }
 0x633   : > { %v3057_v46 = vpop.eup %3056  ;;  %2412 = vmatpush.bf16.msra.mxu0 %v2900_v37 }
 0x634   : > { %v2004_v12 = vmul.f32 %v3055_v53, %v2003_v14  ;;  %v2010_v52 = vmul.f32 %v3057_v46, %v1976_v21  ;;  %vm2016_vm3 = vweird.f32 %v3057_v46 }
 0x635   : > { %vm2017_vm5 = vmor %vm2015_vm4, %vm2016_vm3 }
 0x636   : > { %v2011_v3 = vmul.f32 %v3057_v46, %v2010_v52  ;;  %v2008_v50 = vsel %vm2007_vm2, %v3055_v53, %v2004_v12 }
 0x637   : > { %v2041_v60 = vmul.f32 %v2008_v50, %v3832_v51 }
 0x638   : > { %v2012_v18 = vmul.f32 0.5, %v2011_v3  ;;  %v2899_v3 = vld [vmem:[%s3277_s30 + $0x10] sm:$0xff] }
 0x639   : > { %v2050_v34 = vmul.f32 %v3864_v15, %v2041_v60  ;;  %2413 = vmatpush.bf16.msra.mxu0 %v2899_v3 }
 0x63a   : > { %v2013_v16 = vsub.f32 1.5, %v2012_v18 }
 0x63b   : > { %v3893_v29 = vadd.f32 %v3872_v56, %v2050_v34  ;;  %v2898_v34 = vld [vmem:[%s3277_s30 + $0x8] sm:$0xff] }
 0x63c   : > { %v2014_v22 = vmul.f32 %v3057_v46, %v2013_v16 }
 0x63d   : > { %2414 = vmatpush.bf16.msra.mxu0 %v2898_v34 }
 0x63e   : > { %v2018_v58 = vsel %vm2017_vm5, %v3057_v46, %v2014_v22 }
 0x63f   : > { %v2042_v27 = vmul.f32 %v2018_v58, %v3838_v20 }
 0x641   : > { %v2051_v26 = vmul.f32 %v3864_v15, %v2042_v27 }
 0x643   : > { %v3896_v41 = vadd.f32 %v3872_v56, %v2051_v26 }
 0x645   : > { %v2064_v30 = vpack.c.bf16 %v3896_v41, %v3893_v29 }
 0x646   : > { %v1963_v51 = vpop.xlane.xlu1 %1962 }
 0x647   : > { %v1971_v61 = vmul.f32 %v1963_v51, %v3817_v24  ;;  %2863 = vmatmul.msk.bf16.gmra.mxu2 %vm722_vm1, %v2064_v30 }
 0x649   : > { %v1977_v38 = vadd.f32 1e-05, %v1971_v61 }
 0x64b   : > { %3058 = vrsqrt.f32 %v1977_v38  ;;  %vm2025_vm7 = vweird.f32 %v1977_v38 }
 0x64e   : > { %v1966_v20 = vpop.xlane.xlu2 %1965 }
 0x64f   : > { %v1972_v0 = vmul.f32 %v1966_v20, %v3817_v24 }
 0x651   : > { %v3059_v39 = vpop.eup %3058  ;;  %v1978_v49 = vadd.f32 1e-05, %v1972_v0 }
 0x652   : > { %v2020_v1 = vmul.f32 %v3059_v39, %v1977_v38  ;;  %vm2026_vm6 = vweird.f32 %v3059_v39 }
 0x653   : > { %3060 = vrsqrt.f32 %v1978_v49  ;;  %vm2027_vm8 = vmor %vm2025_vm7, %vm2026_vm6  ;;  %vm2035_vm10 = vweird.f32 %v1978_v49 }
 0x654   : > { %v2021_v40 = vmul.f32 %v3059_v39, %v2020_v1  ;;  %v2897_v1 = vld [vmem:[%s3277_s30] sm:$0xff] }
 0x655   : > { %2415 = vmatpush.bf16.msra.mxu0 %v2897_v1 }
 0x656   : > { %v2022_v4 = vmul.f32 0.5, %v2021_v40 }
 0x658   : > { %v2023_v6 = vsub.f32 1.5, %v2022_v4 }
 0x659   : > { %v3061_v32 = vpop.eup %3060 }
 0x65a   : > { %v2024_v28 = vmul.f32 %v3059_v39, %v2023_v6  ;;  %v2030_v11 = vmul.f32 %v3061_v32, %v1978_v49  ;;  %vm2036_vm9 = vweird.f32 %v3061_v32 }
 0x65b   : > { %vm2037_vm11 = vmor %vm2035_vm10, %vm2036_vm9 }
 0x65c   : > { %v2031_v35 = vmul.f32 %v3061_v32, %v2030_v11  ;;  %v2028_v5 = vsel %vm2027_vm8, %v3059_v39, %v2024_v28 }
 0x65d   : > { %v2043_v7 = vmul.f32 %v2028_v5, %v3844_v33  ;;  %v3921_v33 = vld [vmem:[%s4152_s4] ss:$0 sm:$0xff] }
 0x65e   : > { %v2032_v44 = vmul.f32 0.5, %v2031_v35 }
 0x65f   : > { %v2052_v31 = vmul.f32 %v3864_v15, %v2043_v7 }
 0x660   : > { %v2033_v54 = vsub.f32 1.5, %v2032_v44 }
 0x661   : > { %v3908_v10 = vadd.f32 %v3872_v56, %v2052_v31 }
 0x662   : > { %v2034_v48 = vmul.f32 %v3061_v32, %v2033_v54 }
 0x664   : > { %v2038_v9 = vsel %vm2037_vm11, %v3061_v32, %v2034_v48 }
 0x665   : > { %v2044_v45 = vmul.f32 %v2038_v9, %v3850_v42 }
 0x667   : > { %v2053_v17 = vmul.f32 %v3864_v15, %v2044_v45 }
 0x669   : > { %v3911_v13 = vadd.f32 %v3872_v56, %v2053_v17 }
 0x66b   : > { %v2065_v55 = vpack.c.bf16 %v3911_v13, %v3908_v10 }
 0x66d   : > { %2864 = vmatmul.msk.bf16.gmra.mxu2 %vm722_vm1, %v2065_v55 }
 0x6ac   : > { %v2104_v42 = vpop.f32.mrf.mxu2 }
 0x6ad   : > { %v3924_v15 = vadd.f32 %v3921_v33, %v2104_v42 }
 0x6af   : > { %v3927_v36 = vmul.f32 0.70710677, %v3924_v15 }
 0x6b1   : > { %v2143_v56 = vand.u32 2147483647, %v3927_v36  ;;  %vm2131_vm5 = vcmp.ge.f32.partialorder %v3927_v36, 0.0 }
 0x6b3   : > { %v2149_v19 = vmul.f32 0.3275911, %v2143_v56  ;;  %v2305_v27 = vsub.f32 0.0, %v2143_v56 }
 0x6b4   : > { %v2106_v59 = vpop.f32.mrf.mxu2 }
 0x6b5   : > { %v2155_v62 = vadd.f32 1.0, %v2149_v19  ;;  %v3931_v25 = vadd.f32 %v3921_v33, %v2106_v59  ;;  %v2311_v49 = vmul.f32 %v2305_v27, %v2143_v56 }
 0x6b7   : > { %3062 = vrcp.f32 %v2155_v62  ;;  %v3934_v43 = vmul.f32 0.70710677, %v3931_v25  ;;  %v2172_v14 = vand.u32 2147483648, %v2155_v62  ;;  %v2170_v12 = vand.u32 2147483647, %v2155_v62 }
 0x6b8   : > { %vm2166_vm13 = vweird.f32 %v2155_v62  ;;  %v2317_v5 = vmul.f32 1.442695, %v2311_v49 }
 0x6b9   : > { %v2144_v47 = vand.u32 2147483647, %v3934_v43  ;;  %v2173_v50 = vor.u32 1.1754944e-38, %v2172_v14  ;;  %vm2171_vm15 = vcmp.eq.f32.partialorder %v2170_v12, 8.507059e+37  ;;  %vm2132_vm8 = vcmp.ge.f32.partialorder %v3934_v43, 0.0 }
 0x6ba   : > { %v2119_v43 = vmul.f32 0.5, %v3924_v15 }
 0x6bb   : > { %v2150_v23 = vmul.f32 0.3275911, %v2144_v47  ;;  %v2306_v54 = vsub.f32 0.0, %v2144_v47 }
 0x6bd   : > { %v3063_v53 = vpop.eup %3062  ;;  %v2156_v57 = vadd.f32 1.0, %v2150_v23  ;;  %v2312_v56 = vmul.f32 %v2306_v54, %v2144_v47 }
 0x6be   : > { %v2162_v21 = vmul.f32 %v3063_v53, %v2155_v62  ;;  %vm2167_vm12 = vweird.f32 %v3063_v53 }
 0x6bf   : > { %3064 = vrcp.f32 %v2156_v57  ;;  %vm2168_vm14 = vmor %vm2166_vm13, %vm2167_vm12  ;;  %v2187_v51 = vand.u32 2147483648, %v2156_v57  ;;  %v2185_v20 = vand.u32 2147483647, %v2156_v57  ;;  %vm2181_vm2 = vweird.f32 %v2156_v57 }
 0x6c0   : > { %v2163_v8 = vsub.f32 1.0, %v2162_v21  ;;  %3066 = vpow2.f32 %v2317_v5  ;;  %v2319_v21 = vmul.f32 1.442695, %v2312_v56  ;;  %vm2398_vm13 = vcmask 523264  }
 0x6c1   : > { %v2188_v32 = vor.u32 1.1754944e-38, %v2187_v51  ;;  %vm2186_vm4 = vcmp.eq.f32.partialorder %v2185_v20, 8.507059e+37 }
 0x6c2   : > { %v2164_v46 = vmul.f32 %v3063_v53, %v2163_v8 }
 0x6c4   : > { %v2165_v52 = vadd.f32 %v3063_v53, %v2164_v46 }
 0x6c5   : > { %v3065_v18 = vpop.eup %3064 }
 0x6c6   : > { %v2169_v16 = vsel %vm2168_vm14, %v3063_v53, %v2165_v52  ;;  %v2177_v22 = vmul.f32 %v3065_v18, %v2156_v57  ;;  %vm2182_vm0 = vweird.f32 %v3065_v18  ;;  %v3067_v37 = vpop.eup %3066 }
 0x6c7   : > { %v2174_v60 = vsel %vm2171_vm15, %v2173_v50, %v2169_v16  ;;  %vm2183_vm3 = vmor %vm2181_vm2, %vm2182_vm0 }
 0x6c8   : > { %v2251_v58 = vmul.f32 1.0614054, %v2174_v60  ;;  %v2178_v26 = vsub.f32 1.0, %v2177_v22 }
 0x6ca   : > { %v2257_v30 = vadd.f32 -1.4531521, %v2251_v58  ;;  %v2109_v61 = vpop.f32.mrf.mxu2  ;;  %v2179_v38 = vmul.f32 %v3065_v18, %v2178_v26 }
 0x6cb   : > { %v3941_v0 = vadd.f32 %v3921_v33, %v2109_v61 }
 0x6cc   : > { %v2263_v39 = vmul.f32 %v2257_v30, %v2174_v60  ;;  %v2180_v40 = vadd.f32 %v3065_v18, %v2179_v38  ;;  %v3143_v30 = vmov -1.0  }
 0x6cd   : > { %v3945_v4 = vmul.f32 0.70710677, %v3941_v0  ;;  %v2137_v51 = vsel %vm2131_vm5, 1.0, %v3143_v30 }
 0x6ce   : > { %v2269_v6 = vadd.f32 1.4214138, %v2263_v39  ;;  %v2184_v28 = vsel %vm2183_vm3, %v3065_v18, %v2180_v40 }
 0x6cf   : > { %v3948_v11 = vand.u32 2147483647, %v3945_v4  ;;  %v2189_v44 = vsel %vm2186_vm4, %v2188_v32, %v2184_v28  ;;  %vm2133_vm0 = vcmp.ge.f32.partialorder %v3945_v4, 0.0 }
 0x6d0   : > { %v2275_v35 = vmul.f32 %v2269_v6, %v2174_v60  ;;  %v2252_v7 = vmul.f32 1.0614054, %v2189_v44  ;;  %v2138_v6 = vsel %vm2132_vm8, 1.0, %v3143_v30 }
 0x6d1   : > { %v2151_v48 = vmul.f32 0.3275911, %v3948_v11 }
 0x6d2   : > { %v2281_v9 = vadd.f32 -0.28449672, %v2275_v35  ;;  %v2111_v45 = vpop.f32.mrf.mxu2  ;;  %v2258_v31 = vadd.f32 -1.4531521, %v2252_v7 }
 0x6d3   : > { %v2157_v17 = vadd.f32 1.0, %v2151_v48  ;;  %v3952_v55 = vadd.f32 %v3921_v33, %v2111_v45  ;;  %v2120_v48 = vmul.f32 0.5, %v3931_v25 }
 0x6d4   : > { %v2287_v42 = vmul.f32 %v2281_v9, %v2174_v60  ;;  %v2264_v19 = vmul.f32 %v2258_v31, %v2189_v44 }
 0x6d5   : > { %3068 = vrcp.f32 %v2157_v17  ;;  %v3955_v23 = vmul.f32 0.70710677, %v3952_v55  ;;  %v2202_v22 = vand.u32 2147483648, %v2157_v17  ;;  %v2200_v27 = vand.u32 2147483647, %v2157_v17 }
 0x6d6   : > { %v2293_v59 = vadd.f32 0.2548296, %v2287_v42  ;;  %v2270_v62 = vadd.f32 1.4214138, %v2264_v19  ;;  %3070 = vpow2.f32 %v2319_v21  ;;  %vm2196_vm7 = vweird.f32 %v2157_v17 }
 0x6d7   : > { %v3958_v8 = vand.u32 2147483647, %v3955_v23  ;;  %v2203_v36 = vor.u32 1.1754944e-38, %v2202_v22  ;;  %vm2201_vm10 = vcmp.eq.f32.partialorder %v2200_v27, 8.507059e+37  ;;  %vm2134_vm2 = vcmp.ge.f32.partialorder %v3955_v23, 0.0 }
 0x6d8   : > { %v2299_v53 = vmul.f32 %v2293_v59, %v2174_v60  ;;  %v2276_v57 = vmul.f32 %v2270_v62, %v2189_v44 }
 0x6d9   : > { %v2152_v52 = vmul.f32 0.3275911, %v3958_v8  ;;  %v2308_v25 = vsub.f32 0.0, %v3958_v8 }
 0x6da   : > { %v2329_v46 = vmul.f32 %v3067_v37, %v2299_v53  ;;  %v2282_v12 = vadd.f32 -0.28449672, %v2276_v57 }
 0x6db   : > { %v3069_v14 = vpop.eup %3068  ;;  %v2158_v50 = vadd.f32 1.0, %v2152_v52 }
 0x6dc   : > { %v2192_v47 = vmul.f32 %v3069_v14, %v2157_v17  ;;  %v2288_v3 = vmul.f32 %v2282_v12, %v2189_v44  ;;  %v2335_v16 = vsub.f32 1.0, %v2329_v46  ;;  %vm2197_vm6 = vweird.f32 %v3069_v14  ;;  %v3071_v26 = vpop.eup %3070 }
 0x6dd   : > { %3072 = vrcp.f32 %v2158_v50  ;;  %vm2198_vm9 = vmor %vm2196_vm7, %vm2197_vm6  ;;  %v2217_v45 = vand.u32 2147483648, %v2158_v50  ;;  %v2215_v42 = vand.u32 2147483647, %v2158_v50  ;;  %vm2211_vm12 = vweird.f32 %v2158_v50 }
 0x6de   : > { %v2193_v18 = vsub.f32 1.0, %v2192_v47  ;;  %v2294_v60 = vadd.f32 0.2548296, %v2288_v3  ;;  %v2341_v38 = vmul.f32 %v2335_v16, %v2137_v51 }
 0x6df   : > { %v2218_v57 = vor.u32 1.1754944e-38, %v2217_v45  ;;  %vm2216_vm15 = vcmp.eq.f32.partialorder %v2215_v42, 8.507059e+37 }
 0x6e0   : > { %v2194_v58 = vmul.f32 %v3069_v14, %v2193_v18  ;;  %v2300_v34 = vmul.f32 %v2294_v60, %v2189_v44  ;;  %v2347_v35 = vadd.f32 1.0, %v2341_v38  ;;  %v2307_v44 = vsub.f32 0.0, %v3948_v11 }
 0x6e1   : > { %v2314_v18 = vmul.f32 %v2308_v25, %v3958_v8 }
 0x6e2   : > { %v2195_v61 = vadd.f32 %v3069_v14, %v2194_v58  ;;  %v2330_v20 = vmul.f32 %v3071_v26, %v2300_v34  ;;  %v2353_v56 = vmul.f32 %v2347_v35, %v2119_v43  ;;  %v2313_v59 = vmul.f32 %v2307_v44, %v3948_v11 }
 0x6e3   : > { %v3073_v49 = vpop.eup %3072  ;;  %v2323_v26 = vmul.f32 1.442695, %v2314_v18 }
 0x6e4   : > { %v2199_v39 = vsel %vm2198_vm9, %v3069_v14, %v2195_v61  ;;  %v2336_v1 = vsub.f32 1.0, %v2330_v20  ;;  %v2207_v28 = vmul.f32 %v3073_v49, %v2158_v50  ;;  %vm2212_vm11 = vweird.f32 %v3073_v49 }
 0x6e5   : > { %v2204_v40 = vsel %vm2201_vm10, %v2203_v36, %v2199_v39  ;;  %vm2213_vm14 = vmor %vm2211_vm12, %vm2212_vm11  ;;  %v2321_v14 = vmul.f32 1.442695, %v2313_v59 }
 0x6e6   : > { %v2253_v32 = vmul.f32 1.0614054, %v2204_v40  ;;  %v2342_v5 = vmul.f32 %v2336_v1, %v2138_v6  ;;  %v2208_v7 = vsub.f32 1.0, %v2207_v28 }
 0x6e7   : > { %3074 = vpow2.f32 %v2321_v14 }
 0x6e8   : > { %v2259_v54 = vadd.f32 -1.4531521, %v2253_v32  ;;  %v2348_v9 = vadd.f32 1.0, %v2342_v5  ;;  %v2209_v17 = vmul.f32 %v3073_v49, %v2208_v7  ;;  %3076 = vpow2.f32 %v2323_v26 }
 0x6ea   : > { %v2265_v31 = vmul.f32 %v2259_v54, %v2204_v40  ;;  %v2354_v19 = vmul.f32 %v2348_v9, %v2120_v48  ;;  %v2210_v53 = vadd.f32 %v3073_v49, %v2209_v17 }
 0x6ec   : > { %v2271_v62 = vadd.f32 1.4214138, %v2265_v31  ;;  %v2359_v21 = vpack.c.bf16 %v2354_v19, %v2353_v56  ;;  %v2214_v37 = vsel %vm2213_vm14, %v3073_v49, %v2210_v53  ;;  %v2140_v31 = vsel %vm2134_vm2, 1.0, %v3143_v30 }
 0x6ed   : > { %v2219_v46 = vsel %vm2216_vm15, %v2218_v57, %v2214_v37  ;;  %v3075_v20 = vpop.eup %3074  ;;  %v2122_v53 = vmul.f32 0.5, %v3952_v55 }
 0x6ee   : > { %v2277_v15 = vmul.f32 %v2271_v62, %v2204_v40  ;;  %2881 = vmatmul.msk.bf16.vlgmr.msra.gmra.mxu0 %vm2398_vm13, %v2359_v21  ;;  %v2254_v52 = vmul.f32 1.0614054, %v2219_v46  ;;  %v3077_v35 = vpop.eup %3076  ;;  %v2121_v62 = vmul.f32 0.5, %v3941_v0 }
 0x6f0   : > { %v2283_v12 = vadd.f32 -0.28449672, %v2277_v15  ;;  %v2114_v47 = vpop.f32.mrf.mxu2  ;;  %v2260_v50 = vadd.f32 -1.4531521, %v2254_v52 }
 0x6f1   : > { %v3972_v11 = vadd.f32 %v3921_v33, %v2114_v47 }
 0x6f2   : > { %v2289_v3 = vmul.f32 %v2283_v12, %v2204_v40  ;;  %v2266_v22 = vmul.f32 %v2260_v50, %v2219_v46 }
 0x6f3   : > { %v3976_v16 = vmul.f32 0.70710677, %v3972_v11 }
 0x6f4   : > { %v2295_v60 = vadd.f32 0.2548296, %v2289_v3  ;;  %v2272_v34 = vadd.f32 1.4214138, %v2266_v22 }
 0x6f5   : > { %v3979_v58 = vand.u32 2147483647, %v3976_v16  ;;  %vm2135_vm11 = vcmp.ge.f32.partialorder %v3976_v16, 0.0 }
 0x6f6   : > { %v2301_v27 = vmul.f32 %v2295_v60, %v2204_v40  ;;  %v2278_v61 = vmul.f32 %v2272_v34, %v2219_v46 }
 0x6f7   : > { %v2153_v51 = vmul.f32 0.3275911, %v3979_v58  ;;  %v2309_v3 = vsub.f32 0.0, %v3979_v58 }
 0x6f8   : > { %v2116_v38 = vpop.f32.mrf.mxu2  ;;  %v2331_v39 = vmul.f32 %v3075_v20, %v2301_v27  ;;  %v2284_v49 = vadd.f32 -0.28449672, %v2278_v61 }
 0x6f9   : > { %v2159_v36 = vadd.f32 1.0, %v2153_v51  ;;  %v3983_v8 = vadd.f32 %v3921_v33, %v2116_v38  ;;  %v2139_v33 = vsel %vm2133_vm0, 1.0, %v3143_v30  ;;  %v2315_v27 = vmul.f32 %v2309_v3, %v3979_v58 }
 0x6fa   : > { %v2290_v1 = vmul.f32 %v2284_v49, %v2219_v46  ;;  %v2337_v40 = vsub.f32 1.0, %v2331_v39 }
 0x6fb   : > { %3078 = vrcp.f32 %v2159_v36  ;;  %v3986_v6 = vmul.f32 0.70710677, %v3983_v8  ;;  %v2230_v17 = vand.u32 2147483647, %v2159_v36  ;;  %v2232_v42 = vand.u32 2147483648, %v2159_v36 }
 0x6fc   : > { %v2296_v32 = vadd.f32 0.2548296, %v2290_v1  ;;  %v2343_v7 = vmul.f32 %v2337_v40, %v2139_v33  ;;  %vm2226_vm4 = vweird.f32 %v2159_v36  ;;  %v2325_v20 = vmul.f32 1.442695, %v2315_v27 }
 0x6fd   : > { %v3990_v28 = vand.u32 2147483647, %v3986_v6  ;;  %v2233_v57 = vor.u32 1.1754944e-38, %v2232_v42  ;;  %vm2231_vm6 = vcmp.eq.f32.partialorder %v2230_v17, 8.507059e+37  ;;  %vm2136_vm12 = vcmp.ge.f32.partialorder %v3986_v6, 0.0 }
 0x6fe   : > { %v2302_v5 = vmul.f32 %v2296_v32, %v2219_v46  ;;  %v2349_v56 = vadd.f32 1.0, %v2343_v7  ;;  %v2124_v16 = vmul.f32 0.5, %v3983_v8  ;;  %v2949_v6 = vld [vmem:[%s664_s1] ss:$0 sm:$0xff] }
 0x6ff   : > { %v2154_v54 = vmul.f32 0.3275911, %v3990_v28  ;;  %v2310_v39 = vsub.f32 0.0, %v3990_v28 }
 0x700   : > { %v2332_v43 = vmul.f32 %v3077_v35, %v2302_v5  ;;  %v2355_v15 = vmul.f32 %v2349_v56, %v2121_v62  ;;  %v2142_v62 = vsel %vm2136_vm12, 1.0, %v3143_v30 }
 0x701   : > { %v3079_v44 = vpop.eup %3078  ;;  %v2160_v9 = vadd.f32 1.0, %v2154_v54  ;;  %v2316_v35 = vmul.f32 %v2310_v39, %v3990_v28  ;;  %v2141_v28 = vsel %vm2135_vm11, 1.0, %v3143_v30 }
 0x702   : > { %v2222_v48 = vmul.f32 %v3079_v44, %v2159_v36  ;;  %v2338_v45 = vsub.f32 1.0, %v2332_v43  ;;  %vm2227_vm3 = vweird.f32 %v3079_v44 }
 0x703   : > { %3080 = vrcp.f32 %v2160_v9  ;;  %vm2228_vm5 = vmor %vm2226_vm4, %vm2227_vm3  ;;  %v2247_v55 = vand.u32 2147483648, %v2160_v9  ;;  %v2245_v22 = vand.u32 2147483647, %v2160_v9  ;;  %vm2241_vm8 = vweird.f32 %v2160_v9 }
 0x704   : > { %v2223_v4 = vsub.f32 1.0, %v2222_v48  ;;  %v2344_v19 = vmul.f32 %v2338_v45, %v2140_v31  ;;  %3082 = vpow2.f32 %v2325_v20  ;;  %v2327_v54 = vmul.f32 1.442695, %v2316_v35 }
 0x705   : > { %v2248_v51 = vor.u32 1.1754944e-38, %v2247_v55  ;;  %vm2246_vm10 = vcmp.eq.f32.partialorder %v2245_v22, 8.507059e+37 }
 0x706   : > { %v2224_v59 = vmul.f32 %v3079_v44, %v2223_v4  ;;  %v2350_v21 = vadd.f32 1.0, %v2344_v19  ;;  %3084 = vpow2.f32 %v2327_v54 }
 0x708   : > { %v2225_v23 = vadd.f32 %v3079_v44, %v2224_v59  ;;  %v2356_v37 = vmul.f32 %v2350_v21, %v2122_v53 }
 0x709   : > { %v3081_v14 = vpop.eup %3080 }
 0x70a   : > { %v2229_v25 = vsel %vm2228_vm5, %v3079_v44, %v2225_v23  ;;  %v2237_v52 = vmul.f32 %v3081_v14, %v2160_v9  ;;  %v2360_v47 = vpack.c.bf16 %v2356_v37, %v2355_v15  ;;  %vm2242_vm7 = vweird.f32 %v3081_v14  ;;  %v3083_v43 = vpop.eup %3082 }
 0x70b   : > { %v2234_v46 = vsel %vm2231_vm6, %v2233_v57, %v2229_v25  ;;  %vm2243_vm9 = vmor %vm2241_vm8, %vm2242_vm7  ;;  %v2123_v23 = vmul.f32 0.5, %v3972_v11 }
 0x70c   : > { %v2255_v12 = vmul.f32 1.0614054, %v2234_v46  ;;  %v2238_v0 = vsub.f32 1.0, %v2237_v52  ;;  %2882 = vmatmul.msk.bf16.gmra.mxu0 %vm2398_vm13, %v2360_v47  ;;  %v3085_v42 = vpop.eup %3084 }
 0x70e   : > { %v2261_v50 = vadd.f32 -1.4531521, %v2255_v12  ;;  %v2239_v60 = vmul.f32 %v3081_v14, %v2238_v0 }
 0x710   : > { %v2267_v18 = vmul.f32 %v2261_v50, %v2234_v46  ;;  %v2240_v26 = vadd.f32 %v3081_v14, %v2239_v60 }
 0x712   : > { %v2273_v34 = vadd.f32 1.4214138, %v2267_v18  ;;  %v2244_v38 = vsel %vm2243_vm9, %v3081_v14, %v2240_v26 }
 0x713   : > { %v2249_v36 = vsel %vm2246_vm10, %v2248_v51, %v2244_v38 }
 0x714   : > { %v2279_v61 = vmul.f32 %v2273_v34, %v2234_v46  ;;  %v2256_v1 = vmul.f32 1.0614054, %v2249_v36 }
 0x716   : > { %v2285_v49 = vadd.f32 -0.28449672, %v2279_v61  ;;  %v2262_v32 = vadd.f32 -1.4531521, %v2256_v1 }
 0x718   : > { %v2291_v40 = vmul.f32 %v2285_v49, %v2234_v46  ;;  %v2268_v5 = vmul.f32 %v2262_v32, %v2249_v36 }
 0x71a   : > { %v2297_v58 = vadd.f32 0.2548296, %v2291_v40  ;;  %v2274_v33 = vadd.f32 1.4214138, %v2268_v5 }
 0x71c   : > { %v2303_v44 = vmul.f32 %v2297_v58, %v2234_v46  ;;  %v2280_v7 = vmul.f32 %v2274_v33, %v2249_v36 }
 0x71e   : > { %v2333_v48 = vmul.f32 %v3083_v43, %v2303_v44  ;;  %v2286_v9 = vadd.f32 -0.28449672, %v2280_v7 }
 0x720   : > { %v2292_v45 = vmul.f32 %v2286_v9, %v2249_v36  ;;  %v2339_v4 = vsub.f32 1.0, %v2333_v48 }
 0x722   : > { %v2298_v31 = vadd.f32 0.2548296, %v2292_v45  ;;  %v2345_v56 = vmul.f32 %v2339_v4, %v2141_v28 }
 0x724   : > { %v2304_v17 = vmul.f32 %v2298_v31, %v2249_v36  ;;  %v2351_v53 = vadd.f32 1.0, %v2345_v56 }
 0x726   : > { %v2334_v19 = vmul.f32 %v3085_v42, %v2304_v17  ;;  %v2357_v15 = vmul.f32 %v2351_v53, %v2123_v23 }
 0x728   : > { %v2340_v59 = vsub.f32 1.0, %v2334_v19 }
 0x72a   : > { %v2346_v21 = vmul.f32 %v2340_v59, %v2142_v62 }
 0x72c   : > { %v2352_v57 = vadd.f32 1.0, %v2346_v21 }
 0x72e   : > { %v2358_v37 = vmul.f32 %v2352_v57, %v2124_v16 }
 0x730   : > { %v2361_v25 = vpack.c.bf16 %v2358_v37, %v2357_v15 }
 0x732   : > { %2883 = vmatmul.msk.bf16.gmra.mxu0 %vm2398_vm13, %v2361_v25 }
 0x76b   : > { %v2417_v14 = vpop.f32.mrf.mxu0 }
 0x76c   : > { %v2418_v46 = vadd.f32 %v2949_v6, %v2417_v14  ;;  %v4065_v14 = vld [vmem:[%s667_s21] ss:$0 sm:$0xff]  ;;  %s4153_s21 = sld [smem:[#allocation11_spill]] }
 0x76e   : > { %v2432_v30 = vadd.f32 %v2418_v46, %v3879_v63 }
 0x770   : > { %v2440_v12 = vsel %vm722_vm1, %v2432_v30, 0.0 }
 0x771   : > { %2441 = vadd.xlane.f32.xlu2 %v2440_v12 }
 0x773   : > { %v2419_v11 = vpop.f32.mrf.mxu0 }
 0x774   : > { %v2420_v51 = vadd.f32 %v2949_v6, %v2419_v11 }
 0x789   : > { %v2422_v8 = vpop.f32.mrf.mxu0 }
 0x78a   : > { %v2423_v52 = vadd.f32 %v2949_v6, %v2422_v8 }
 0x78c   : > { %v2434_v47 = vadd.f32 %v2423_v52, %v3893_v29 }
 0x78e   : > { %v2446_v3 = vsel %vm722_vm1, %v2434_v47, 0.0 }
 0x78f   : > { %2447 = vadd.xlane.f32.xlu1 %v2446_v3 }
 0x791   : > { %v2424_v50 = vpop.f32.mrf.mxu0 }
 0x792   : > { %v2425_v0 = vadd.f32 %v2949_v6, %v2424_v50 }
 0x794   : > { %v2435_v55 = vadd.f32 %v2425_v0, %v3896_v41  ;;  %v2433_v41 = vadd.f32 %v2420_v51, %v3882_v2 }
 0x796   : > { %v2449_v18 = vsel %vm722_vm1, %v2435_v55, 0.0  ;;  %v2443_v38 = vsel %vm722_vm1, %v2433_v41, 0.0 }
 0x797   : > { %2450 = vadd.xlane.f32.xlu1 %v2449_v18 }
 0x7af   : > { %v2427_v60 = vpop.f32.mrf.mxu0 }
 0x7b0   : > { %v2428_v63 = vadd.f32 %v2949_v6, %v2427_v60 }
 0x7b2   : > { %v2436_v22 = vadd.f32 %v2428_v63, %v3908_v10 }
 0x7b4   : > { %v2452_v27 = vsel %vm722_vm1, %v2436_v22, 0.0 }
 0x7b5   : > { %2453 = vadd.xlane.f32.xlu2 %v2452_v27 }
 0x7b7   : > { %v2429_v34 = vpop.f32.mrf.mxu0 }
 0x7b8   : > { %v2430_v26 = vadd.f32 %v2949_v6, %v2429_v34 }
 0x7ba   : > { %v2437_v29 = vadd.f32 %v2430_v26, %v3911_v13 }
 0x7bc   : > { %v2455_v61 = vsel %vm722_vm1, %v2437_v29, 0.0 }
 0x7bd   : > { %2456 = vadd.xlane.f32.xlu0 %v2455_v61 }
 0x7c5   : > { %2444 = vadd.xlane.f32.xlu0 %v2443_v38 }
 0x7e4   : > { %v2442_v20 = vpop.xlane.xlu2 %2441 }
 0x7e5   : > { %v2458_v36 = vmul.f32 %v2442_v20, %v3817_v24 }
 0x7e7   : > { %v2464_v10 = vsub.f32 %v2432_v30, %v2458_v36  ;;  %v4072_v30 = vld [vmem:[%s670_s0] ss:$0 sm:$0xff] }
 0x7e9   : > { %v2470_v39 = vmul.f32 %v2464_v10, %v2464_v10 }
 0x7eb   : > { %v2476_v49 = vsel %vm722_vm1, %v2470_v39, 0.0 }
 0x7ec   : > { %2477 = vadd.xlane.f32.xlu2 %v2476_v49 }
 0x802   : > { %v2448_v1 = vpop.xlane.xlu1 %2447 }
 0x803   : > { %v2460_v13 = vmul.f32 %v2448_v1, %v3817_v24 }
 0x805   : > { %v4030_v40 = vsub.f32 %v2434_v47, %v2460_v13 }
 0x807   : > { %v2472_v32 = vmul.f32 %v4030_v40, %v4030_v40 }
 0x809   : > { %v2482_v2 = vsel %vm722_vm1, %v2472_v32, 0.0 }
 0x80a   : > { %2483 = vadd.xlane.f32.xlu1 %v2482_v2  ;;  %v2451_v35 = vpop.xlane.xlu1 %2450 }
 0x80b   : > { %v2461_v58 = vmul.f32 %v2451_v35, %v3817_v24 }
 0x80d   : > { %v4036_v5 = vsub.f32 %v2435_v55, %v2461_v58 }
 0x80f   : > { %v2473_v44 = vmul.f32 %v4036_v5, %v4036_v5 }
 0x811   : > { %v2485_v33 = vsel %vm722_vm1, %v2473_v44, 0.0 }
 0x812   : > { %2486 = vadd.xlane.f32.xlu1 %v2485_v33 }
 0x828   : > { %v2454_v54 = vpop.xlane.xlu2 %2453 }
 0x829   : > { %v2462_v7 = vmul.f32 %v2454_v54, %v3817_v24 }
 0x82b   : > { %v4042_v43 = vsub.f32 %v2436_v22, %v2462_v7 }
 0x82d   : > { %v2474_v48 = vmul.f32 %v4042_v43, %v4042_v43 }
 0x82f   : > { %v2488_v9 = vsel %vm722_vm1, %v2474_v48, 0.0 }
 0x830   : > { %v2457_v45 = vpop.xlane.xlu0 %2456  ;;  %2489 = vadd.xlane.f32.xlu2 %v2488_v9 }
 0x831   : > { %v2463_v4 = vmul.f32 %v2457_v45, %v3817_v24 }
 0x833   : > { %v4048_v31 = vsub.f32 %v2437_v29, %v2463_v4 }
 0x835   : > { %v2475_v17 = vmul.f32 %v4048_v31, %v4048_v31 }
 0x837   : > { %v2491_v42 = vsel %vm722_vm1, %v2475_v17, 0.0 }
 0x838   : > { %2492 = vadd.xlane.f32.xlu0 %v2491_v42  ;;  %v2445_v28 = vpop.xlane.xlu0 %2444 }
 0x839   : > { %v2459_v56 = vmul.f32 %v2445_v28, %v3817_v24 }
 0x83b   : > { %v4054_v19 = vsub.f32 %v2433_v41, %v2459_v56 }
 0x83d   : > { %v2471_v59 = vmul.f32 %v4054_v19, %v4054_v19 }
 0x83f   : > { %v2479_v62 = vsel %vm722_vm1, %v2471_v59, 0.0 }
 0x840   : > { %2480 = vadd.xlane.f32.xlu0 %v2479_v62 }
 0x85f   : > { %v2478_v53 = vpop.xlane.xlu2 %2477 }
 0x860   : > { %v2494_v21 = vmul.f32 %v2478_v53, %v3817_v24 }
 0x862   : > { %v2500_v23 = vadd.f32 1e-05, %v2494_v21 }
 0x864   : > { %3086 = vrsqrt.f32 %v2500_v23  ;;  %vm2512_vm14 = vweird.f32 %v2500_v23 }
 0x86a   : > { %v3087_v16 = vpop.eup %3086 }
 0x86b   : > { %v2507_v57 = vmul.f32 %v3087_v16, %v2500_v23  ;;  %vm2513_vm13 = vweird.f32 %v3087_v16 }
 0x86c   : > { %vm2514_vm15 = vmor %vm2512_vm14, %vm2513_vm13  ;;  %vm2599_vm14 = vcmask 1041409  }
 0x86d   : > { %v2508_v15 = vmul.f32 %v3087_v16, %v2507_v57 }
 0x86f   : > { %v2509_v37 = vmul.f32 0.5, %v2508_v15 }
 0x871   : > { %v2510_v25 = vsub.f32 1.5, %v2509_v37 }
 0x873   : > { %v2511_v6 = vmul.f32 %v3087_v16, %v2510_v25 }
 0x875   : > { %v2515_v46 = vsel %vm2514_vm15, %v3087_v16, %v2511_v6 }
 0x876   : > { %v2566_v12 = vmul.f32 %v2515_v46, %v2464_v10 }
 0x878   : > { %v2575_v11 = vmul.f32 %v4065_v14, %v2566_v12 }
 0x87a   : > { %v2584_v8 = vadd.f32 %v4072_v30, %v2575_v11 }
 0x87c   : > { %2590 = vst.msk [vmem:[#allocation2] sm:$0xff] %vm722_vm1, %v2584_v8 }
 0x87d   : > { %v2484_v52 = vpop.xlane.xlu1 %2483 }
 0x87e   : > { %v2496_v47 = vmul.f32 %v2484_v52, %v3817_v24 }
 0x880   : > { %v2502_v3 = vadd.f32 1e-05, %v2496_v47 }
 0x882   : > { %3088 = vrsqrt.f32 %v2502_v3  ;;  %vm2532_vm2 = vweird.f32 %v2502_v3 }
 0x885   : > { %v2487_v50 = vpop.xlane.xlu1 %2486 }
 0x886   : > { %v2497_v0 = vmul.f32 %v2487_v50, %v3817_v24 }
 0x888   : > { %v3089_v55 = vpop.eup %3088  ;;  %v2503_v18 = vadd.f32 1e-05, %v2497_v0 }
 0x889   : > { %v2527_v60 = vmul.f32 %v3089_v55, %v2502_v3  ;;  %vm2533_vm0 = vweird.f32 %v3089_v55 }
 0x88a   : > { %3090 = vrsqrt.f32 %v2503_v18  ;;  %vm2534_vm3 = vmor %vm2532_vm2, %vm2533_vm0  ;;  %vm2542_vm5 = vweird.f32 %v2503_v18  ;;  %vm2602_vm0 = vcmask 254976  }
 0x88b   : > { %v2528_v63 = vmul.f32 %v3089_v55, %v2527_v60 }
 0x88d   : > { %v2529_v22 = vmul.f32 0.5, %v2528_v63 }
 0x88f   : > { %v2530_v27 = vsub.f32 1.5, %v2529_v22 }
 0x890   : > { %v3091_v34 = vpop.eup %3090 }
 0x891   : > { %v2531_v26 = vmul.f32 %v3089_v55, %v2530_v27  ;;  %v2537_v29 = vmul.f32 %v3091_v34, %v2503_v18  ;;  %vm2543_vm4 = vweird.f32 %v3091_v34 }
 0x892   : > { %vm2544_vm6 = vmor %vm2542_vm5, %vm2543_vm4 }
 0x893   : > { %v2535_v51 = vsel %vm2534_vm3, %v3089_v55, %v2531_v26  ;;  %v2538_v61 = vmul.f32 %v3091_v34, %v2537_v29 }
 0x894   : > { %v2568_v41 = vmul.f32 %v2535_v51, %v4030_v40 }
 0x895   : > { %v2539_v38 = vmul.f32 0.5, %v2538_v61 }
 0x896   : > { %v2577_v20 = vmul.f32 %v4065_v14, %v2568_v41 }
 0x897   : > { %v2540_v36 = vsub.f32 1.5, %v2539_v38 }
 0x898   : > { %v4082_v10 = vadd.f32 %v4072_v30, %v2577_v20 }
 0x899   : > { %v2541_v39 = vmul.f32 %v3091_v34, %v2540_v36 }
 0x89a   : > { %2592 = vst.msk [vmem:[#allocation2 + $0x10] sm:$0xff] %vm722_vm1, %v4082_v10 }
 0x89b   : > { %v2545_v49 = vsel %vm2544_vm6, %v3091_v34, %v2541_v39 }
 0x89c   : > { %v2569_v1 = vmul.f32 %v2545_v49, %v4036_v5 }
 0x89e   : > { %v2578_v13 = vmul.f32 %v4065_v14, %v2569_v1 }
 0x8a0   : > { %v2587_v40 = vadd.f32 %v4072_v30, %v2578_v13 }
 0x8a2   : > { %2593 = vst.msk [vmem:[#allocation2 + $0x18] sm:$0xff] %vm722_vm1, %v2587_v40 }
 0x8a3   : > { %v2490_v32 = vpop.xlane.xlu2 %2489 }
 0x8a4   : > { %v2498_v2 = vmul.f32 %v2490_v32, %v3817_v24 }
 0x8a6   : > { %v2504_v35 = vadd.f32 1e-05, %v2498_v2 }
 0x8a8   : > { %3092 = vrsqrt.f32 %v2504_v35  ;;  %vm2552_vm8 = vweird.f32 %v2504_v35 }
 0x8ab   : > { %v2493_v58 = vpop.xlane.xlu0 %2492 }
 0x8ac   : > { %v2499_v44 = vmul.f32 %v2493_v58, %v3817_v24 }
 0x8ae   : > { %v3093_v33 = vpop.eup %3092  ;;  %v2505_v54 = vadd.f32 1e-05, %v2499_v44 }
 0x8af   : > { %v2547_v7 = vmul.f32 %v3093_v33, %v2504_v35  ;;  %vm2553_vm7 = vweird.f32 %v3093_v33 }
 0x8b0   : > { %3094 = vrsqrt.f32 %v2505_v54  ;;  %vm2554_vm9 = vmor %vm2552_vm8, %vm2553_vm7  ;;  %vm2562_vm11 = vweird.f32 %v2505_v54 }
 0x8b1   : > { %v2548_v48 = vmul.f32 %v3093_v33, %v2547_v7 }
 0x8b3   : > { %v2549_v5 = vmul.f32 0.5, %v2548_v48  ;;  %v2481_v9 = vpop.xlane.xlu0 %2480 }
 0x8b4   : > { %v2495_v45 = vmul.f32 %v2481_v9, %v3817_v24 }
 0x8b5   : > { %v2550_v4 = vsub.f32 1.5, %v2549_v5 }
 0x8b6   : > { %v3095_v17 = vpop.eup %3094  ;;  %v2501_v42 = vadd.f32 1e-05, %v2495_v45 }
 0x8b7   : > { %v2551_v28 = vmul.f32 %v3093_v33, %v2550_v4  ;;  %v2557_v56 = vmul.f32 %v3095_v17, %v2505_v54  ;;  %vm2563_vm10 = vweird.f32 %v3095_v17 }
 0x8b8   : > { %3096 = vrsqrt.f32 %v2501_v42  ;;  %vm2564_vm12 = vmor %vm2562_vm11, %vm2563_vm10  ;;  %vm2522_vm15 = vweird.f32 %v2501_v42 }
 0x8b9   : > { %v2555_v59 = vsel %vm2554_vm9, %v3093_v33, %v2551_v28  ;;  %v2558_v62 = vmul.f32 %v3095_v17, %v2557_v56 }
 0x8ba   : > { %v2570_v53 = vmul.f32 %v2555_v59, %v4042_v43 }
 0x8bb   : > { %v2559_v21 = vmul.f32 0.5, %v2558_v62 }
 0x8bc   : > { %v2579_v23 = vmul.f32 %v4065_v14, %v2570_v53 }
 0x8bd   : > { %v2560_v16 = vsub.f32 1.5, %v2559_v21 }
 0x8be   : > { %v3097_v57 = vpop.eup %3096  ;;  %v2588_v24 = vadd.f32 %v4072_v30, %v2579_v23 }
 0x8bf   : > { %v2561_v15 = vmul.f32 %v3095_v17, %v2560_v16  ;;  %v2517_v37 = vmul.f32 %v3097_v57, %v2501_v42  ;;  %vm2523_vm13 = vweird.f32 %v3097_v57 }
 0x8c0   : > { %2594 = vst.msk [vmem:[#allocation2 + $0x20] sm:$0xff] %vm722_vm1, %v2588_v24  ;;  %vm2524_vm2 = vmor %vm2522_vm15, %vm2523_vm13 }
 0x8c1   : > { %v2565_v25 = vsel %vm2564_vm12, %v3095_v17, %v2561_v15  ;;  %v2518_v6 = vmul.f32 %v3097_v57, %v2517_v37 }
 0x8c2   : > { %v2571_v46 = vmul.f32 %v2565_v25, %v4048_v31 }
 0x8c3   : > { %v2519_v12 = vmul.f32 0.5, %v2518_v6 }
 0x8c4   : > { %v2580_v43 = vmul.f32 %v4065_v14, %v2571_v46 }
 0x8c5   : > { %v2520_v11 = vsub.f32 1.5, %v2519_v12 }
 0x8c6   : > { %v2589_v8 = vadd.f32 %v4072_v30, %v2580_v43 }
 0x8c7   : > { %v2521_v52 = vmul.f32 %v3097_v57, %v2520_v11 }
 0x8c8   : > { %2595 = vst.msk [vmem:[#allocation2 + $0x28] sm:$0xff] %vm722_vm1, %v2589_v8  ;;  %v2598_v47 = vrot.slane %v2589_v8, 7 }
 0x8c9   : > { %v2525_v3 = vsel %vm2524_vm2, %v3097_v57, %v2521_v52 }
 0x8ca   : > { %v2600_v50 = vsel %vm2599_vm14, %v2598_v47, %v4082_v10  ;;  %v2567_v31 = vmul.f32 %v2525_v3, %v4054_v19 }
 0x8cb   : > { %2603 = vst.msk [vmem:[%s4153_s21] sm:$0x3] %vm2602_vm0, %v2600_v50 }
 0x8cc   : > { %v2576_v0 = vmul.f32 %v4065_v14, %v2567_v31 }
 0x8ce   : > { %v2585_v55 = vadd.f32 %v4072_v30, %v2576_v0 }
 0x8d0   : > { %2591 = vst.msk [vmem:[#allocation2 + $0x8] sm:$0xff] %vm722_vm1, %v2585_v55 }
 0x8d1 PF: > { %s4154_s20 = sld [smem:[#allocation5_spill]] }
 0x8d2   : > { %s4155_s29 = sld [smem:[#allocation4_spill]] }
 0x8d3   : > { %s4156_s30 = sld [smem:[#allocation6_spill]] }
 0x8d7   : > { %s24_s15 = sadd.s32 1, %s4154_s20  }
 0x8d8   : > { %p21_p6 = scmp.ge.s32.totalorder %s24_s15, 4  }
 0x8da   :  { %23 = sbr.rel (!%p21_p6) target bundleno = 6 (0x6), region = 146 }

</bundles_post_ra>
